<compile_context>
chip_gen: v7x
topology: tpu7x:2x2x1
jax: 0.10.0
libtpu: 0.0.40
codegen_flags: <defaults>
</compile_context>

<pallas_src>
import functools
import math

import jax
import jax.numpy as jnp
from jax.experimental import pallas as pl
from jax.experimental.pallas import tpu as pltpu

LEAKY_SLOPE = 0.01      # InPlaceABNSync default activation: leaky_relu(0.01)
BN_EPS = 1e-5

_VMEM_LIMIT_CACHE = None


def _round_up(x, m):
    return (x + m - 1) // m * m


def _vmem_limit_bytes():
    """~75% of this chip's VMEM (96 MiB on 128-MiB parts, 48 MiB on v7x)."""
    global _VMEM_LIMIT_CACHE
    if _VMEM_LIMIT_CACHE is None:
        cap = None
        try:
            cap = getattr(pltpu.get_tpu_info(), "vmem_capacity_bytes", None)
        except Exception:
            cap = None
        if not cap:
            cap = 64 * 1024 * 1024          # conservative fallback (v7x per-core)
        _VMEM_LIMIT_CACHE = int(cap) * 3 // 4
    return _VMEM_LIMIT_CACHE


# --------------------------------------------------------------------------
# Kernel A: all pyramid-stage 1x1 convs + folded-BN shift + leaky ReLU in one
# pallas_call. Grid is the stage index; each stage is a single full-K MXU pass
# (no K reduction axis, no accumulator scratch).
# --------------------------------------------------------------------------
def _stage_conv1x1_kernel(x_ref, w_ref, shift_ref, o_ref):
    y = jnp.dot(x_ref[0], w_ref[0], preferred_element_type=jnp.float32)
    y = y + shift_ref[0]                                   # f32 epilogue
    y = jnp.where(y >= 0.0, y, LEAKY_SLOPE * y)
    o_ref[...] = y.reshape(o_ref.shape).astype(o_ref.dtype)


def stages_conv1x1(x_stack, w_stack, shift_stack):
    """x:(S,M_p,K_p) bf16 zero-padded; w:(S,K_p,Cout_p) bf16 (BN scale folded);
    shift:(S,1,Cout_p) f32 -> (S,M_p,Cout_p) f32."""
    S, M_p, K_p = x_stack.shape
    Cout_p = w_stack.shape[-1]
    flops = 2 * S * M_p * K_p * Cout_p
    bytes_accessed = (x_stack.size * 2 + w_stack.size * 2 + shift_stack.size * 4
                      + S * M_p * Cout_p * 4)
    return pl.pallas_call(
        _stage_conv1x1_kernel,
        out_shape=jax.ShapeDtypeStruct((S, M_p, Cout_p), jnp.float32),
        grid_spec=pltpu.PrefetchScalarGridSpec(
            num_scalar_prefetch=0,
            grid=(S,),
            in_specs=[
                pl.BlockSpec((1, M_p, K_p), lambda s: (s, 0, 0)),
                pl.BlockSpec((1, K_p, Cout_p), lambda s: (s, 0, 0)),
                pl.BlockSpec((1, 1, Cout_p), lambda s: (s, 0, 0)),
            ],
            out_specs=pl.BlockSpec((1, M_p, Cout_p), lambda s: (s, 0, 0)),
        ),
        compiler_params=pltpu.CompilerParams(
            dimension_semantics=("parallel",),
            vmem_limit_bytes=_vmem_limit_bytes()),
        cost_estimate=pl.CostEstimate(flops=flops, transcendentals=0,
                                      bytes_accessed=bytes_accessed),
    )(x_stack, w_stack, shift_stack)


# --------------------------------------------------------------------------
# Kernel B: fused 3x3 conv (pad=1) + folded-BN shift + leaky ReLU over the
# flattened (H*W, C) image. The spatial halo is built in-kernel (no HBM pad):
# zero rows absorb the H boundary, a row-index mask zeroes the W wrap-around.
# Channel tiles are the (last, "arbitrary") reduction grid axis into an f32
# VMEM accumulator; the 3 kx taps are fused into one K=3*tc matmul per ky.
# --------------------------------------------------------------------------
def _bottleneck_conv3x3_kernel(x_ref, w_ref, shift_ref, o_ref, acc_ref, *, W):
    c = pl.program_id(1)

    @pl.when(c == 0)
    def _init():
        acc_ref[...] = jnp.zeros_like(acc_ref)

    HW = o_ref.shape[1]
    Cout_p = o_ref.shape[2]
    x = x_ref[0]                                           # (HW, tc) bf16
    tc = x.shape[-1]

    # Zero-padded flattened image; the front/back pads absorb the H halo.
    pad_front = W + 8
    pad_back = W + 8
    p = jnp.concatenate(
        [jnp.zeros((pad_front, tc), x.dtype), x,
         jnp.zeros((pad_back, tc), x.dtype)], axis=0)

    R = HW + 2 * W
    base = pad_front - W                                   # = 8 (static)
    # kx-shifted windows: 3 relayout copies instead of 9 per-tap relayouts.
    q0 = p[base - 1: base - 1 + R]                         # kx = 0 (left neighbour)
    q1 = p[base:      base + R]                            # kx = 1 (centre)
    q2 = p[base + 1: base + 1 + R]                         # kx = 2 (right neighbour)

    # Mask the W-boundary wrap-around of the shifted windows.
    col = jax.lax.broadcasted_iota(jnp.int32, (R, 1), 0) % W
    q0 = q0 * (col != 0).astype(x.dtype)
    q2 = q2 * (col != W - 1).astype(x.dtype)

    # One lane-aligned concat -> 3 wide-K matmuls, so the MXU accumulates the
    # kx taps internally (3 accumulator round trips instead of 9).
    qcat = jnp.concatenate([q0, q1, q2], axis=-1)          # (R, 3*tc) bf16

    acc = acc_ref[...]
    for ky in range(3):                                    # static unroll
        lhs = qcat[ky * W: ky * W + HW]                    # aligned row slice when W % 8 == 0
        rhs = w_ref[ky].reshape(3 * tc, Cout_p)            # (kx, tc)->3*tc merge: layout-free
        acc = acc + jnp.dot(lhs, rhs, preferred_element_type=jnp.float32)
    acc_ref[...] = acc

    @pl.when(c == pl.num_programs(1) - 1)
    def _finalize():
        y = acc_ref[...] + shift_ref[...]
        y = jnp.where(y >= 0.0, y, LEAKY_SLOPE * y)
        o_ref[...] = y.reshape(o_ref.shape).astype(o_ref.dtype)


def bottleneck_conv3x3(chan_parts, w_kkio, shift, *, H, W,
                       out_dtype=jnp.float32, tc=512):
    """3x3 same-conv + folded-BN shift + leaky over the virtual channel concat.

    chan_parts: list of (N, H*W, c_i) tensors in concat order [stage0..2, feats].
                The concat below is their *first* (and only) materialization.
    w_kkio:     (3, 3, Cin, Cout) f32, BN scale folded into the Cout axis.
    shift:      (Cout,) f32.
    Returns (N, H*W, Cout_p) in out_dtype (bf16 recommended on v7x to halve writeback).
    """
    N, HW, _ = chan_parts[0].shape
    assert HW == H * W
    Cin = sum(int(p.shape[-1]) for p in chan_parts)
    Cout = int(w_kkio.shape[-1])
    Cout_p = _round_up(Cout, 128)
    tc = min(tc, _round_up(Cin, 128))
    Cin_p = _round_up(Cin, tc)
    c_tiles = Cin_p // tc

    parts = [p.astype(jnp.bfloat16) for p in chan_parts]
    if Cin_p > Cin:                                        # channel pad fused into the concat
        parts.append(jnp.zeros((N, HW, Cin_p - Cin), jnp.bfloat16))
    xcat = jnp.concatenate(parts, axis=-1)                 # (N, HW, Cin_p) bf16, no jnp.pad

    wb = jnp.pad(w_kkio.astype(jnp.bfloat16),
                 ((0, 0), (0, 0), (0, Cin_p - Cin), (0, Cout_p - Cout)))
    sb = jnp.pad(shift.astype(jnp.float32), (0, Cout_p - Cout)).reshape(1, Cout_p)

    out_itemsize = jnp.dtype(out_dtype).itemsize
    flops = 2 * N * HW * 9 * Cin_p * Cout_p
    bytes_accessed = (xcat.size * 2 + wb.size * 2 * N + sb.size * 4
                      + N * HW * Cout_p * out_itemsize)

    # TODO(synk): for production spatial sizes on v7x, tile H with a 2-row halo
    # (pl.Element offsets or manual DMA) so blocks + temporaries stay under ~40 MiB.
    kernel = functools.partial(_bottleneck_conv3x3_kernel, W=W)
    return pl.pallas_call(
        kernel,
        out_shape=jax.ShapeDtypeStruct((N, HW, Cout_p), out_dtype),
        grid_spec=pltpu.PrefetchScalarGridSpec(
            num_scalar_prefetch=0,
            grid=(N, c_tiles),
            in_specs=[
                pl.BlockSpec((1, HW, tc), lambda n, c: (n, 0, c)),
                pl.BlockSpec((3, 3, tc, Cout_p), lambda n, c: (0, 0, c, 0)),
                pl.BlockSpec((1, Cout_p), lambda n, c: (0, 0)),
            ],
            out_specs=pl.BlockSpec((1, HW, Cout_p), lambda n, c: (n, 0, 0)),
            scratch_shapes=[pltpu.VMEM((HW, Cout_p), jnp.float32)],
        ),
        compiler_params=pltpu.CompilerParams(
            dimension_semantics=("parallel", "arbitrary"),
            vmem_limit_bytes=_vmem_limit_bytes()),
        cost_estimate=pl.CostEstimate(flops=flops, transcendentals=0,
                                      bytes_accessed=bytes_accessed),
    )(xcat, wb, sb)


# ------------------------------- JAX glue -----------------------------------
def fold_bn(gamma, beta, mean, var, eps=BN_EPS):
    scale = gamma / jnp.sqrt(var + eps)
    shift = beta - mean * scale
    return scale, shift


def adaptive_avg_pool_nhwc(x, s):
    """Exact PyTorch AdaptiveAvgPool2d((s,s)) bin semantics (static bins)."""
    N, H, W, C = x.shape
    hb = [(math.floor(i * H / s), math.ceil((i + 1) * H / s)) for i in range(s)]
    wb = [(math.floor(i * W / s), math.ceil((i + 1) * W / s)) for i in range(s)]
    rows = []
    for h0, h1 in hb:
        cols = [jnp.mean(x[:, h0:h1, w0:w1, :], axis=(1, 2)) for w0, w1 in wb]
        rows.append(jnp.stack(cols, axis=1))
    return jnp.stack(rows, axis=1)        # (N, s, s, C)


def _interp_matrix(out_size, in_size):
    """Rows of bilinear align_corners=True weights mapping in_size -> out_size."""
    if in_size == 1:
        return jnp.ones((out_size, 1), jnp.float32)
    pos = jnp.arange(out_size, dtype=jnp.float32) * (in_size - 1) / (out_size - 1)
    lo = jnp.clip(jnp.floor(pos), 0, in_size - 2).astype(jnp.int32)
    frac = pos - lo.astype(jnp.float32)
    idx = jnp.arange(out_size)
    m = jnp.zeros((out_size, in_size), jnp.float32)
    m = m.at[idx, lo].set(1.0 - frac)
    m = m.at[idx, lo + 1].add(frac)
    return m


def upsample_bilinear_align_corners(x, H, W):
    """x: (N, s, s, C) -> (N, H, W, C), exact bilinear align_corners=True."""
    N, sh, sw, C = x.shape
    Mh = _interp_matrix(H, sh)
    Mw = _interp_matrix(W, sw)
    return jnp.einsum("hj,wk,njkc->nhwc", Mh, Mw, x.astype(jnp.float32))


def psp_forward(x_nchw, params, sizes=(1, 2, 3)):
    N, C, H, W = x_nchw.shape
    x = jnp.transpose(x_nchw, (0, 2, 3, 1))                    # NHWC f32

    out_features = int(params["stage_w"].shape[-1])
    S = len(sizes)

    # ---- pyramid stages: adaptive pool (glue) + ONE pallas_call for all 1x1 convs ----
    M_max = N * max(s * s for s in sizes)
    M_p = _round_up(max(M_max, 8), 8)
    K_p = _round_up(C, 128)
    Cout_p = _round_up(out_features, 128)

    xs = jnp.zeros((S, M_p, K_p), jnp.bfloat16)
    for i, s in enumerate(sizes):
        pooled = adaptive_avg_pool_nhwc(x, s).reshape(N * s * s, C)
        xs = xs.at[i, :N * s * s, :C].set(pooled.astype(jnp.bfloat16))

    wst = jnp.pad(params["stage_w"].astype(jnp.bfloat16),
                  ((0, 0), (0, K_p - C), (0, Cout_p - out_features)))
    sst = jnp.pad(params["stage_shift"].astype(jnp.float32),
                  ((0, 0), (0, Cout_p - out_features))).reshape(S, 1, Cout_p)
    stage_out = stages_conv1x1(xs, wst, sst)                   # (S, M_p, Cout_p) f32

    # ---- exact align_corners upsample of the tiny (s,s) maps (glue) ----
    parts = []
    for i, s in enumerate(sizes):
        f = stage_out[i, :N * s * s, :out_features].reshape(N, s, s, out_features)
        up = upsample_bilinear_align_corners(f, H, W)          # (N,H,W,out) f32
        parts.append(up.astype(jnp.bfloat16).reshape(N, H * W, out_features))
    parts.append(x.astype(jnp.bfloat16).reshape(N, H * W, C))  # feats (layout cast only)

    # ---- bottleneck: fused 3x3 conv + BN + leaky; halo handled in-kernel ----
    out2d = bottleneck_conv3x3(parts, params["bott_w"], params["bott_shift"],
                               H=H, W=W, out_dtype=jnp.float32)
    Cout = int(params["bott_w"].shape[-1])
    out = out2d.reshape(N, H, W, -1)[..., :Cout]
    return jnp.transpose(out, (0, 3, 1, 2))                    # back to NCHW


def psp_forward_reference(x_nchw, params, sizes=(1, 2, 3)):
    """Pure-JAX reference (no Pallas) with identical parameter folding."""
    N, C, H, W = x_nchw.shape
    x = jnp.transpose(x_nchw, (0, 2, 3, 1))
    priors = []
    for i, s in enumerate(sizes):
        pooled = adaptive_avg_pool_nhwc(x, s)
        y = jnp.einsum("nijc,co->nijo", pooled, params["stage_w"][i]) + params["stage_shift"][i]
        y = jnp.where(y >= 0.0, y, LEAKY_SLOPE * y)
        priors.append(upsample_bilinear_align_corners(y, H, W))
    priors.append(x)
    cat = jnp.concatenate(priors, axis=-1)
    out = jax.lax.conv_general_dilated(
        cat, params["bott_w"], window_strides=(1, 1), padding="SAME",
        dimension_numbers=("NHWC", "HWIO", "NHWC"))
    out = out + params["bott_shift"]
    out = jnp.where(out >= 0.0, out, LEAKY_SLOPE * out)
    return jnp.transpose(out, (0, 3, 1, 2))


def make_params(key, features, out_features, sizes):
    ks = jax.random.split(key, 2 * len(sizes) + 2)

    def bn(k, c):
        g = 1.0 + 0.1 * jax.random.normal(k, (c,), jnp.float32)
        b = 0.05 * jnp.arange(c, dtype=jnp.float32)
        m = 0.01 * jax.random.normal(jax.random.fold_in(k, 1), (c,), jnp.float32)
        v = 1.0 + 0.1 * jax.random.uniform(jax.random.fold_in(k, 2), (c,), jnp.float32)
        return fold_bn(g, b, m, v)

    stage_w, stage_shift = [], []
    for i, _s in enumerate(sizes):
        w = 0.1 * jax.random.normal(ks[2 * i], (features, out_features), jnp.float32)
        scale, shift = bn(ks[2 * i + 1], out_features)
        stage_w.append(w * scale[None, :])                 # fold BN scale into columns
        stage_shift.append(shift)
    p = {"stage_w": jnp.stack(stage_w), "stage_shift": jnp.stack(stage_shift)}

    cin = features + len(sizes) * out_features
    # 3x3 conv (Cout, Cin, 3, 3) -> (ky, kx, Cin, Cout); fold BN scale into Cout.
    w_oihw = 0.05 * jax.random.normal(ks[-2], (out_features, cin, 3, 3), jnp.float32)
    w_kkio = jnp.transpose(w_oihw, (2, 3, 1, 0))
    scale, shift = bn(ks[-1], out_features)
    p["bott_w"] = w_kkio * scale[None, None, None, :]
    p["bott_shift"] = shift
    return p


if __name__ == "__main__":
    key = jax.random.PRNGKey(0)
    kx, kp = jax.random.split(key)

    # Small shapes: batch=2, features=4, H=W=16, out_features=16, sizes=(1,2,3)
    N, C, H, W = 2, 4, 16, 16
    out_features = 16
    sizes = (1, 2, 3)

    x = jax.random.normal(kx, (N, C, H, W), jnp.float32)
    params = make_params(kp, C, out_features, sizes)

    fwd = jax.jit(psp_forward, static_argnames=("sizes",))
    out = jax.block_until_ready(fwd(x, params, sizes=sizes))

    assert out.shape == (N, out_features, H, W), out.shape
    assert bool(jnp.isfinite(out).all())

    # Loose tolerance: the kernels use bf16 MXU operands vs an f32-ish XLA reference.
    ref = psp_forward_reference(x, params, sizes=sizes)
    err = float(jnp.max(jnp.abs(out - ref)))
    assert err < 1e-1, f"max abs err vs reference: {err}"

    print("KERNEL_OK")
</pallas_src>

<mosaic_0001>
module attributes {stable_mosaic.version = 11 : i64} {
  func.func private @main(%arg0: i32) attributes {dimension_semantics = [#tpu.dimension_semantics<core_parallel>], iteration_bounds = array<i64: 2>, tpu.core_type = #tpu.core_type<sc_scalar_subcore>, window_params = []} {
    return
  }
}

module attributes {stable_mosaic.version = 11 : i64} {
  func.func private @main(%arg0: i32) attributes {dimension_semantics = [#tpu.dimension_semantics<core_parallel>], iteration_bounds = array<i64: 2>, tpu.core_type = #tpu.core_type<sc_scalar_subcore>, window_params = []} {
    return
  }
}

module attributes {stable_mosaic.version = 11 : i64} {
  func.func @_stage_conv1x1_kernel(%arg0: i32, %arg1: memref<1x24x128xbf16, #tpu.memory_space<vmem>>, %arg2: memref<1x128x128xbf16, #tpu.memory_space<vmem>>, %arg3: memref<1x1x128xf32, #tpu.memory_space<vmem>>, %arg4: memref<1x24x128xf32, #tpu.memory_space<vmem>>) attributes {dimension_semantics = [#tpu.dimension_semantics<parallel>], iteration_bounds = array<i64: 3>, scalar_prefetch = 0 : i64, scratch_operands = 0 : i64, tpu.core_type = #tpu.core_type<tc>, window_params = [{transform_indices = @transform_0, window_bounds = array<i64: 1, 24, 128>}, {transform_indices = @transform_1, window_bounds = array<i64: 1, 128, 128>}, {transform_indices = @transform_2, window_bounds = array<i64: 1, 1, 128>}, {transform_indices = @transform_3, window_bounds = array<i64: 1, 24, 128>}]} {
    %c0 = arith.constant 0 : index
    %c0_0 = arith.constant 0 : index
    %c0_1 = arith.constant 0 : index
    %0 = vector.load %arg1[%c0, %c0_0, %c0_1] : memref<1x24x128xbf16, #tpu.memory_space<vmem>>, vector<1x24x128xbf16>
    %1 = vector.shape_cast %0 : vector<1x24x128xbf16> to vector<24x128xbf16>
    %c0_2 = arith.constant 0 : index
    %c0_3 = arith.constant 0 : index
    %c0_4 = arith.constant 0 : index
    %2 = vector.load %arg2[%c0_2, %c0_3, %c0_4] : memref<1x128x128xbf16, #tpu.memory_space<vmem>>, vector<1x128x128xbf16>
    %3 = vector.shape_cast %2 : vector<1x128x128xbf16> to vector<128x128xbf16>
    %cst = arith.constant dense<0.000000e+00> : vector<24x128xf32>
    %4 = tpu.matmul %1, %3, %cst {dimension_numbers = #tpu.dot_dimension_numbers<[1], [0], [0], [1], [0, 0, 1, 1], [], []>} : vector<24x128xbf16>, vector<128x128xbf16>, vector<24x128xf32> -> vector<24x128xf32>
    %c0_5 = arith.constant 0 : index
    %c0_6 = arith.constant 0 : index
    %c0_7 = arith.constant 0 : index
    %5 = vector.load %arg3[%c0_5, %c0_6, %c0_7] : memref<1x1x128xf32, #tpu.memory_space<vmem>>, vector<1x1x128xf32>
    %6 = vector.shape_cast %5 : vector<1x1x128xf32> to vector<1x128xf32>
    %7 = vector.broadcast %6 : vector<1x128xf32> to vector<24x128xf32>
    %8 = arith.addf %4, %7 : vector<24x128xf32>
    %cst_8 = arith.constant 0.000000e+00 : f32
    %9 = vector.broadcast %cst_8 : f32 to vector<24x128xf32>
    %10 = arith.cmpf oge, %8, %9 : vector<24x128xf32>
    %cst_9 = arith.constant 0.00999999977 : f32
    %11 = vector.broadcast %cst_9 : f32 to vector<24x128xf32>
    %12 = arith.mulf %11, %8 : vector<24x128xf32>
    %13 = arith.select %10, %8, %12 : vector<24x128xi1>, vector<24x128xf32>
    %14 = vector.shape_cast %13 : vector<24x128xf32> to vector<1x24x128xf32>
    %c0_10 = arith.constant 0 : index
    %c0_11 = arith.constant 0 : index
    %c0_12 = arith.constant 0 : index
    %15 = vector.load %arg4[%c0_10, %c0_11, %c0_12] : memref<1x24x128xf32, #tpu.memory_space<vmem>>, vector<1x24x128xf32>
    tpu.vector_store %arg4[%c0_10, %c0_11, %c0_12], %14 {strides = array<i32>} : memref<1x24x128xf32, #tpu.memory_space<vmem>>, vector<1x24x128xf32>,
    return
  }
  func.func @transform_0(%arg0: i32) -> (i32, i32, i32) {
    %c0_i32 = arith.constant 0 : i32
    %c0_i32_0 = arith.constant 0 : i32
    %c0_i32_1 = arith.constant 0 : i32
    return %arg0, %c0_i32, %c0_i32_0 : i32, i32, i32
  }
  func.func @transform_1(%arg0: i32) -> (i32, i32, i32) {
    %c0_i32 = arith.constant 0 : i32
    %c0_i32_0 = arith.constant 0 : i32
    %c0_i32_1 = arith.constant 0 : i32
    return %arg0, %c0_i32, %c0_i32_0 : i32, i32, i32
  }
  func.func @transform_2(%arg0: i32) -> (i32, i32, i32) {
    %c0_i32 = arith.constant 0 : i32
    %c0_i32_0 = arith.constant 0 : i32
    %c0_i32_1 = arith.constant 0 : i32
    return %arg0, %c0_i32, %c0_i32_0 : i32, i32, i32
  }
  func.func @transform_3(%arg0: i32) -> (i32, i32, i32) {
    %c0_i32 = arith.constant 0 : i32
    %c0_i32_0 = arith.constant 0 : i32
    %c0_i32_1 = arith.constant 0 : i32
    return %arg0, %c0_i32, %c0_i32_0 : i32, i32, i32
  }
}

module attributes {stable_mosaic.version = 11 : i64} {
  func.func @_bottleneck_conv3x3_kernel(%arg0: i32, %arg1: i32, %arg2: memref<1x256x128xbf16, #tpu.memory_space<vmem>>, %arg3: memref<3x3x128x128xbf16, #tpu.memory_space<vmem>>, %arg4: memref<1x128xf32, #tpu.memory_space<vmem>>, %arg5: memref<1x256x128xf32, #tpu.memory_space<vmem>>, %arg6: memref<256x128xf32, #tpu.memory_space<vmem>>) attributes {dimension_semantics = [#tpu.dimension_semantics<parallel>, #tpu.dimension_semantics<arbitrary>], iteration_bounds = array<i64: 2, 1>, scalar_prefetch = 0 : i64, scratch_operands = 1 : i64, tpu.core_type = #tpu.core_type<tc>, window_params = [{transform_indices = @transform_0, window_bounds = array<i64: 1, 256, 128>}, {transform_indices = @transform_1, window_bounds = array<i64: 3, 3, 128, 128>}, {pipeline_mode = #tpu.pipeline_mode<synchronous>, transform_indices = @transform_2, window_bounds = array<i64: 1, 128>}, {transform_indices = @transform_3, window_bounds = array<i64: 1, 256, 128>}]} {
    %c0_i32 = arith.constant 0 : i32
    %0 = arith.cmpi eq, %arg1, %c0_i32 : i32
    %1 = arith.extui %0 : i1 to i32
    %c0_i32_0 = arith.constant 0 : i32
    %2 = arith.cmpi ne, %1, %c0_i32_0 : i32
    scf.if %2 {
      %cst_28 = arith.constant 0.000000e+00 : f32
      %66 = vector.broadcast %cst_28 : f32 to vector<256x128xf32>
      %c0_29 = arith.constant 0 : index
      %c0_30 = arith.constant 0 : index
      %67 = vector.load %arg6[%c0_29, %c0_30] : memref<256x128xf32, #tpu.memory_space<vmem>>, vector<256x128xf32>
      tpu.vector_store %arg6[%c0_29, %c0_30], %66 {strides = array<i32>} : memref<256x128xf32, #tpu.memory_space<vmem>>, vector<256x128xf32>,
    } else {
    }
    %c0 = arith.constant 0 : index
    %c0_1 = arith.constant 0 : index
    %c0_2 = arith.constant 0 : index
    %3 = vector.load %arg2[%c0, %c0_1, %c0_2] : memref<1x256x128xbf16, #tpu.memory_space<vmem>>, vector<1x256x128xbf16>
    %4 = vector.shape_cast %3 : vector<1x256x128xbf16> to vector<256x128xbf16>
    %cst = arith.constant 0.000000e+00 : bf16
    %5 = vector.broadcast %cst : bf16 to vector<24x128xbf16>
    %cst_3 = arith.constant 0.000000e+00 : bf16
    %6 = vector.broadcast %cst_3 : bf16 to vector<24x128xbf16>
    %7 = tpu.concatenate %5, %4, %6 in 0 : vector<24x128xbf16>, vector<256x128xbf16>, vector<24x128xbf16> -> vector<304x128xbf16>
    %8 = vector.extract_strided_slice %7 {offsets = [7, 0], sizes = [288, 128], strides = [1, 1]} : vector<304x128xbf16> to vector<288x128xbf16>
    %9 = vector.extract_strided_slice %7 {offsets = [8, 0], sizes = [288, 128], strides = [1, 1]} : vector<304x128xbf16> to vector<288x128xbf16>
    %10 = vector.extract_strided_slice %7 {offsets = [9, 0], sizes = [288, 128], strides = [1, 1]} : vector<304x128xbf16> to vector<288x128xbf16>
    %11 = tpu.iota {dimensions = array<i32: 0>} : vector<288x1xi32>
    %c16_i32 = arith.constant 16 : i32
    %c0_i32_4 = arith.constant 0 : i32
    %12 = arith.cmpi eq, %c16_i32, %c0_i32_4 : i32
    %c1_i32 = arith.constant 1 : i32
    %13 = arith.select %12, %c1_i32, %c16_i32 : i32
    %14 = vector.broadcast %13 : i32 to vector<288x1xi32>
    %15 = arith.remsi %11, %14 : vector<288x1xi32>
    %c0_i32_5 = arith.constant 0 : i32
    %16 = vector.broadcast %c0_i32_5 : i32 to vector<288x1xi32>
    %17 = arith.cmpi ne, %15, %16 : vector<288x1xi32>
    %c0_i32_6 = arith.constant 0 : i32
    %18 = vector.broadcast %c0_i32_6 : i32 to vector<288x1xi32>
    %19 = arith.cmpi slt, %15, %18 : vector<288x1xi32>
    %c0_i32_7 = arith.constant 0 : i32
    %20 = arith.cmpi slt, %13, %c0_i32_7 : i32
    %21 = vector.broadcast %20 : i1 to vector<288x1xi1>
    %22 = vector.broadcast %21 : vector<288x1xi1> to vector<288x1xi1>
    %23 = arith.xori %19, %22 : vector<288x1xi1>
    %24 = arith.andi %23, %17 : vector<288x1xi1>
    %25 = vector.broadcast %13 : i32 to vector<288x1xi32>
    %26 = arith.addi %15, %25 : vector<288x1xi32>
    %27 = arith.select %24, %26, %15 : vector<288x1xi1>, vector<288x1xi32>
    %c0_i32_8 = arith.constant 0 : i32
    %28 = vector.broadcast %c0_i32_8 : i32 to vector<288x1xi32>
    %29 = arith.cmpi ne, %27, %28 : vector<288x1xi32>
    %30 = arith.extui %29 : vector<288x1xi1> to vector<288x1xi32>
    %31 = arith.sitofp %30 : vector<288x1xi32> to vector<288x1xf32>
    %32 = arith.truncf %31 : vector<288x1xf32> to vector<288x1xbf16>
    %33 = vector.broadcast %32 : vector<288x1xbf16> to vector<288x128xbf16>
    %34 = arith.mulf %8, %33 : vector<288x128xbf16>
    %c15_i32 = arith.constant 15 : i32
    %35 = vector.broadcast %c15_i32 : i32 to vector<288x1xi32>
    %36 = arith.cmpi ne, %27, %35 : vector<288x1xi32>
    %37 = arith.extui %36 : vector<288x1xi1> to vector<288x1xi32>
    %38 = arith.sitofp %37 : vector<288x1xi32> to vector<288x1xf32>
    %39 = arith.truncf %38 : vector<288x1xf32> to vector<288x1xbf16>
    %40 = vector.broadcast %39 : vector<288x1xbf16> to vector<288x128xbf16>
    %41 = arith.mulf %10, %40 : vector<288x128xbf16>
    %42 = tpu.concatenate %34, %9, %41 in 1 : vector<288x128xbf16>, vector<288x128xbf16>, vector<288x128xbf16> -> vector<288x384xbf16>
    %c0_9 = arith.constant 0 : index
    %c0_10 = arith.constant 0 : index
    %43 = vector.load %arg6[%c0_9, %c0_10] : memref<256x128xf32, #tpu.memory_space<vmem>>, vector<256x128xf32>
    %44 = vector.extract_strided_slice %42 {offsets = [0, 0], sizes = [256, 384], strides = [1, 1]} : vector<288x384xbf16> to vector<256x384xbf16>
    %c0_11 = arith.constant 0 : index
    %c0_12 = arith.constant 0 : index
    %c0_13 = arith.constant 0 : index
    %c0_14 = arith.constant 0 : index
    %45 = vector.load %arg3[%c0_11, %c0_12, %c0_13, %c0_14] : memref<3x3x128x128xbf16, #tpu.memory_space<vmem>>, vector<1x3x128x128xbf16>
    %46 = vector.shape_cast %45 : vector<1x3x128x128xbf16> to vector<3x128x128xbf16>
    %47 = vector.shape_cast %46 : vector<3x128x128xbf16> to vector<384x128xbf16>
    %cst_15 = arith.constant dense<0.000000e+00> : vector<256x128xf32>
    %48 = tpu.matmul %44, %47, %cst_15 {dimension_numbers = #tpu.dot_dimension_numbers<[1], [0], [0], [1], [0, 0, 1, 1], [], []>} : vector<256x384xbf16>, vector<384x128xbf16>, vector<256x128xf32> -> vector<256x128xf32>
    %49 = arith.addf %43, %48 : vector<256x128xf32>
    %50 = vector.extract_strided_slice %42 {offsets = [16, 0], sizes = [256, 384], strides = [1, 1]} : vector<288x384xbf16> to vector<256x384xbf16>
    %c1 = arith.constant 1 : index
    %c0_16 = arith.constant 0 : index
    %c0_17 = arith.constant 0 : index
    %c0_18 = arith.constant 0 : index
    %51 = vector.load %arg3[%c1, %c0_16, %c0_17, %c0_18] : memref<3x3x128x128xbf16, #tpu.memory_space<vmem>>, vector<1x3x128x128xbf16>
    %52 = vector.shape_cast %51 : vector<1x3x128x128xbf16> to vector<3x128x128xbf16>
    %53 = vector.shape_cast %52 : vector<3x128x128xbf16> to vector<384x128xbf16>
    %cst_19 = arith.constant dense<0.000000e+00> : vector<256x128xf32>
    %54 = tpu.matmul %50, %53, %cst_19 {dimension_numbers = #tpu.dot_dimension_numbers<[1], [0], [0], [1], [0, 0, 1, 1], [], []>} : vector<256x384xbf16>, vector<384x128xbf16>, vector<256x128xf32> -> vector<256x128xf32>
    %55 = arith.addf %49, %54 : vector<256x128xf32>
    %56 = vector.extract_strided_slice %42 {offsets = [32, 0], sizes = [256, 384], strides = [1, 1]} : vector<288x384xbf16> to vector<256x384xbf16>
    %c2 = arith.constant 2 : index
    %c0_20 = arith.constant 0 : index
    %c0_21 = arith.constant 0 : index
    %c0_22 = arith.constant 0 : index
    %57 = vector.load %arg3[%c2, %c0_20, %c0_21, %c0_22] : memref<3x3x128x128xbf16, #tpu.memory_space<vmem>>, vector<1x3x128x128xbf16>
    %58 = vector.shape_cast %57 : vector<1x3x128x128xbf16> to vector<3x128x128xbf16>
    %59 = vector.shape_cast %58 : vector<3x128x128xbf16> to vector<384x128xbf16>
    %cst_23 = arith.constant dense<0.000000e+00> : vector<256x128xf32>
    %60 = tpu.matmul %56, %59, %cst_23 {dimension_numbers = #tpu.dot_dimension_numbers<[1], [0], [0], [1], [0, 0, 1, 1], [], []>} : vector<256x384xbf16>, vector<384x128xbf16>, vector<256x128xf32> -> vector<256x128xf32>
    %61 = arith.addf %55, %60 : vector<256x128xf32>
    %c0_24 = arith.constant 0 : index
    %c0_25 = arith.constant 0 : index
    %62 = vector.load %arg6[%c0_24, %c0_25] : memref<256x128xf32, #tpu.memory_space<vmem>>, vector<256x128xf32>
    tpu.vector_store %arg6[%c0_24, %c0_25], %61 {strides = array<i32>} : memref<256x128xf32, #tpu.memory_space<vmem>>, vector<256x128xf32>,
    %c0_i32_26 = arith.constant 0 : i32
    %63 = arith.cmpi eq, %arg1, %c0_i32_26 : i32
    %64 = arith.extui %63 : i1 to i32
    %c0_i32_27 = arith.constant 0 : i32
    %65 = arith.cmpi ne, %64, %c0_i32_27 : i32
    scf.if %65 {
      %c0_28 = arith.constant 0 : index
      %c0_29 = arith.constant 0 : index
      %66 = vector.load %arg6[%c0_28, %c0_29] : memref<256x128xf32, #tpu.memory_space<vmem>>, vector<256x128xf32>
      %c0_30 = arith.constant 0 : index
      %c0_31 = arith.constant 0 : index
      %67 = vector.load %arg4[%c0_30, %c0_31] : memref<1x128xf32, #tpu.memory_space<vmem>>, vector<1x128xf32>
      %68 = vector.broadcast %67 : vector<1x128xf32> to vector<256x128xf32>
      %69 = arith.addf %66, %68 : vector<256x128xf32>
      %cst_32 = arith.constant 0.000000e+00 : f32
      %70 = vector.broadcast %cst_32 : f32 to vector<256x128xf32>
      %71 = arith.cmpf oge, %69, %70 : vector<256x128xf32>
      %cst_33 = arith.constant 0.00999999977 : f32
      %72 = vector.broadcast %cst_33 : f32 to vector<256x128xf32>
      %73 = arith.mulf %72, %69 : vector<256x128xf32>
      %74 = arith.select %71, %69, %73 : vector<256x128xi1>, vector<256x128xf32>
      %75 = vector.shape_cast %74 : vector<256x128xf32> to vector<1x256x128xf32>
      %c0_34 = arith.constant 0 : index
      %c0_35 = arith.constant 0 : index
      %c0_36 = arith.constant 0 : index
      %76 = vector.load %arg5[%c0_34, %c0_35, %c0_36] : memref<1x256x128xf32, #tpu.memory_space<vmem>>, vector<1x256x128xf32>
      tpu.vector_store %arg5[%c0_34, %c0_35, %c0_36], %75 {strides = array<i32>} : memref<1x256x128xf32, #tpu.memory_space<vmem>>, vector<1x256x128xf32>,
    } else {
    }
    return
  }
  func.func @transform_0(%arg0: i32, %arg1: i32) -> (i32, i32, i32) {
    %c0_i32 = arith.constant 0 : i32
    %c0_i32_0 = arith.constant 0 : i32
    return %arg0, %c0_i32, %arg1 : i32, i32, i32
  }
  func.func @transform_1(%arg0: i32, %arg1: i32) -> (i32, i32, i32, i32) {
    %c0_i32 = arith.constant 0 : i32
    %c0_i32_0 = arith.constant 0 : i32
    %c0_i32_1 = arith.constant 0 : i32
    %c0_i32_2 = arith.constant 0 : i32
    return %c0_i32, %c0_i32_0, %arg1, %c0_i32_1 : i32, i32, i32, i32
  }
  func.func @transform_2(%arg0: i32, %arg1: i32) -> (i32, i32) {
    %c0_i32 = arith.constant 0 : i32
    %c0_i32_0 = arith.constant 0 : i32
    %c0_i32_1 = arith.constant 0 : i32
    return %c0_i32, %c0_i32_0 : i32, i32
  }
  func.func @transform_3(%arg0: i32, %arg1: i32) -> (i32, i32, i32) {
    %c0_i32 = arith.constant 0 : i32
    %c0_i32_0 = arith.constant 0 : i32
    %c0_i32_1 = arith.constant 0 : i32
    return %arg0, %c0_i32, %c0_i32_0 : i32, i32, i32
  }
}

</mosaic_0001>

<bundles_post_ra>
// kernel: psp_forward.2
= control target key start
LH: loop header
LB: loop body
LE: loop exit
PB: predicated region body
PF: predicated region fallthrough
CT: control target
= control target key end

     0   :  { %s527_s12 = smov 0   ;;  %s556_s0 = inlined_call_operand.vmem [shape: bf16[3,24,128], index: 0, kind: input, shape index: {}]   ;;  %s557_s1 = inlined_call_operand.vmem [shape: bf16[3,128,128], index: 1, kind: input, shape index: {}]   ;;  %s558_s2 = inlined_call_operand.vmem [shape: f32[3,1,128], index: 2, kind: input, shape index: {}]   ;;  %s559_s3 = inlined_call_operand.vmem [shape: f32[3,24,128], index: 3, kind: output, shape index: {}]  }
   0x1 LB: > { %s426_s13 = sadd.s32 4294967295, %s505_s12   ;;  %p430_p0 = scmp.ge.s32.totalorder %s505_s12, 1  ;;  %s505_s12 = sphi %s527_s12, %s13_s12  }
   0x2   : > { %p155_p1 = scmp.lt.s32.totalorder %s505_s12, 4 }
   0x4   : > { %p156_p2 = pnand %p430_p0, %p155_p1 }
   0x5   : > { %p187_p3 = scmp.lt.s32.totalorder (!%p156_p2), %s426_s13, 2 }
   0x6   : > { %159 = sbr.rel (%p156_p2) target bundleno = 270 (0x10e), region = 32 }
   0xd   : > { %s561_s13 = smov (!%p187_p3, %s426_s13), 2 }
   0xe   : > { %s448_s14 = sshll.u32 %s561_s13, 6  ;;  %s479_s18 = smul.u32 12, %s561_s13 }
   0xf   : > { %s196_s17 = scalar_lea.vmem %s557_s1, %s448_s14  ;;  %s199_s24 = scalar_lea.vmem %s558_s2, %s561_s13 }
  0x10   : > { %v489_v0 = vld [vmem:[%s196_s17] sm:$0xff]   ;;  %v490_v1 = vld [vmem:[%s196_s17 + $0x8] sm:$0xff]   ;;  %v491_v2 = vld [vmem:[%s196_s17 + $0x10] sm:$0xff]   ;;  %s191_s21 = scalar_lea.vmem %s556_s0, %s479_s18  ;;  %s480_s25 = smul.u32 24, %s561_s13 }
  0x11   : > { %459 = vmatprep.subr.bf16.mxu0 %v489_v0  ;;  %v492_v3 = vld [vmem:[%s196_s17 + $0x18] sm:$0xff]   ;;  %v497_v4 = vld [vmem:[%s191_s21] sm:$0xff]   ;;  %v494_v6 = vld [vmem:[%s196_s17 + $0x28] sm:$0xff]  }
  0x12   : > { %460 = vmatpush3.bf16.msra.mxu0 %v489_v0  ;;  %475 = vmatprep.mubr.bf16.mxu0 %v497_v4  ;;  %v493_v5 = vld [vmem:[%s196_s17 + $0x20] sm:$0xff]   ;;  %v495_v7 = vld [vmem:[%s196_s17 + $0x30] sm:$0xff]   ;;  %v496_v8 = vld [vmem:[%s196_s17 + $0x38] sm:$0xff]   ;;  %s204_s28 = scalar_lea.vmem %s559_s3, %s480_s25 }
  0x13   : > { %461 = vmatprep.subr.bf16.mxu0 %v490_v1  ;;  %v498_v9 = vld [vmem:[%s191_s21 + $0x8] ss:$0 sps:$4 sm:$0xff]   ;;  %v435_v10 = vld [vmem:[%s199_s24] ss:$0 sm:$0xff] }
  0x16   : > { %462 = vmatpush3.bf16.msra.mxu0 %v490_v1 }
  0x17   : > { %463 = vmatprep.subr.bf16.mxu0 %v491_v2 }
  0x1a   : > { %464 = vmatpush3.bf16.msra.mxu0 %v491_v2 }
  0x1b   : > { %465 = vmatprep.subr.bf16.mxu0 %v492_v3 }
  0x1e   : > { %466 = vmatpush3.bf16.msra.mxu0 %v492_v3 }
  0x1f   : > { %467 = vmatprep.subr.bf16.mxu0 %v493_v5 }
  0x22   : > { %468 = vmatpush3.bf16.msra.mxu0 %v493_v5 }
  0x23   : > { %469 = vmatprep.subr.bf16.mxu0 %v494_v6 }
  0x26   : > { %470 = vmatpush3.bf16.msra.mxu0 %v494_v6 }
  0x27   : > { %471 = vmatprep.subr.bf16.mxu0 %v495_v7 }
  0x2a   : > { %472 = vmatpush3.bf16.msra.mxu0 %v495_v7 }
  0x2b   : > { %473 = vmatprep.subr.bf16.mxu0 %v496_v8 }
  0x2e   : > { %474 = vmatpush3.bf16.msra.mxu0 %v496_v8 }
  0x31   : > { %476 = vmatmul.mubr.bf16.vlgmr.msra.gmra.mrb[0].mxu0 %v498_v9 }
 0x104   : > { %v477_v11 = vpop.f32.mrb[0].mxu0 }
 0x105   : > { %v333_v12 = vadd.f32 %v477_v11, %v435_v10  ;;  %v324_v13 = vpop.f32.mrb[1].mxu0 }
 0x106   : > { %v325_v14 = vadd.f32 %v435_v10, %v324_v13  ;;  %v478_v15 = vpop.f32.mrb[2].mxu0 }
 0x107   : > { %vm340_vm0 = vcmp.ge.f32.partialorder %v333_v12, 0.0  ;;  %v343_v16 = vmul.f32 0.01, %v333_v12  ;;  %v327_v17 = vpop.f32.mrb[3].mxu0 }
 0x108   : > { %vm338_vm1 = vcmp.ge.f32.partialorder %v325_v14, 0.0  ;;  %v341_v18 = vmul.f32 0.01, %v325_v14  ;;  %v328_v19 = vadd.f32 %v435_v10, %v327_v17 }
 0x109   : > { %v346_v20 = vsel %vm340_vm0, %v333_v12, %v343_v16 }
 0x10a   : > { %349 = vst [vmem:[%s204_s28 + $0x10] sm:$0xff] %v346_v20  ;;  %v344_v21 = vsel %vm338_vm1, %v325_v14, %v341_v18  ;;  %vm339_vm2 = vcmp.ge.f32.partialorder %v328_v19, 0.0  ;;  %v342_v22 = vmul.f32 0.01, %v328_v19 }
 0x10b   : > { %347 = vst [vmem:[%s204_s28] sm:$0xff] %v344_v21 }
 0x10c   : > { %v345_v23 = vsel %vm339_vm2, %v328_v19, %v342_v22 }
 0x10d   : > { %348 = vst [vmem:[%s204_s28 + $0x8] sm:$0xff] %v345_v23 }
 0x10e PF: > { %s13_s12 = sadd.s32 1, %s505_s12  }
 0x10f   : > { %p10_p4 = scmp.ge.s32.totalorder %s13_s12, 5  }
 0x111   :  { %12 = sbr.rel (!%p10_p4) target bundleno = 1 (0x1), region = 68 }

// kernel: squeeze.5
= control target key start
LH: loop header
LB: loop body
LE: loop exit
PB: predicated region body
PF: predicated region fallthrough
CT: control target
= control target key end

     0   :  { %vm50_vm0 = vcmask 130048   ;;  %v131_v8 = vmov 0.0   ;;  %s166_s0 = inlined_call_operand.vmem [shape: bf16[1,18,16], index: 0, kind: input, shape index: {}]   ;;  %s167_s1 = inlined_call_operand.vmem [shape: bf16[2,3,3,16], index: 1, kind: output, shape index: {}]  }
   0x1   :  { %v119_v0 = vld [vmem:[%s166_s0 + $0x8] sm:$0xf]  ;;  %v127_v1 = vld [vmem:[%s166_s0] sm:$0xff]  }
   0x2   :  { %v17_v2 = vunpack.c.l.bf16 %v119_v0  ;;  %v128_v3 = vunpack.c.l.bf16 %v127_v1  ;;  %v129_v4 = vunpack.c.h.bf16 %v127_v1 }
   0x4   :  { %20 = vst [vmem:[#allocation1 + $0x10] sm:$0xff] %v17_v2  ;;  %51 = vst.msk [vmem:[#allocation0] sm:$0x7] %vm50_vm0, %v128_v3  }
   0x5   :  { %53 = vst.msk [vmem:[#allocation0 + $0x5] sm:$0x38] %vm50_vm0, %v128_v3   ;;  %55 = vst.msk [vmem:[#allocation0 + $0xa] sm:$0xc0] %vm50_vm0, %v128_v3  }
   0x6   :  { %60 = vst.msk [vmem:[#allocation0 + $0x12] ss:$6 sm:$0x3] %vm50_vm0, %v129_v4   ;;  %62 = vst.msk [vmem:[#allocation0 + $0x17] sm:$0xc] %vm50_vm0, %v129_v4  }
   0x7   :  { %64 = vst.msk [vmem:[#allocation0 + $0x1c] sm:$0x70] %vm50_vm0, %v129_v4   ;;  %66 = vst.msk [vmem:[#allocation0 + $0x21] sm:$0x80] %vm50_vm0, %v129_v4  }
   0xb   :  { %v68_v5 = vld [vmem:[#allocation1 + $0x10] sm:$0x3]  }
   0xc   :  { %v76_v6 = vld [vmem:[#allocation0] sm:$0xf]  ;;  %v81_v7 = vld [vmem:[#allocation0 + $0x8] sm:$0xf]  ;;  %71 = vst.msk [vmem:[#allocation0 + $0x29] sm:$0x3] %vm50_vm0, %v68_v5  }
   0xd   :  { %v77_v9 = vpack.c.bf16 %v131_v8, %v76_v6  ;;  %v82_v10 = vpack.c.bf16 %v131_v8, %v81_v7  ;;  %v87_v11 = vld [vmem:[#allocation0 + $0x10] sm:$0xf]  ;;  %v94_v12 = vld [vmem:[#allocation0 + $0x18] sm:$0xf] }
   0xe   :  { %v101_v13 = vld [vmem:[#allocation0 + $0x20] sm:$0xf]  ;;  %v88_v14 = vpack.c.bf16 %v131_v8, %v87_v11  ;;  %v95_v15 = vpack.c.bf16 %v131_v8, %v94_v12 }
   0xf   :  { %v102_v16 = vpack.c.bf16 %v131_v8, %v101_v13  ;;  %79 = vst [vmem:[%s167_s1] sm:$0x3] %v77_v9  ;;  %121 = vst [vmem:[%s167_s1 + $0x2] sm:$0x3] %v82_v10 }
  0x10   :  { %122 = vst [vmem:[%s167_s1 + $0x4] sm:$0x3] %v88_v14  ;;  %123 = vst [vmem:[%s167_s1 + $0x6] sm:$0x3] %v95_v15 }
  0x11   :  { %124 = vst [vmem:[%s167_s1 + $0x8] sm:$0x3] %v102_v16 }
  0x13   :  { %v108_v17 = vld [vmem:[#allocation0 + $0x28] sm:$0xf] }
  0x14   :  { %v109_v18 = vpack.c.bf16 %v131_v8, %v108_v17 }
  0x16   :  { %125 = vst [vmem:[%s167_s1 + $0xa] sm:$0x3] %v109_v18 }

// kernel: psp_forward.3
= control target key start
LH: loop header
LB: loop body
LE: loop exit
PB: predicated region body
PF: predicated region fallthrough
CT: control target
= control target key end

     0   :  { %s5406_s12 = smov 0   ;;  %s5408_s13 = smov 0   ;;  %s6807_s0 = inlined_call_operand.vmem [shape: bf16[2,256,128], index: 0, kind: input, shape index: {}]   ;;  %s6808_s1 = inlined_call_operand.vmem [shape: bf16[3,3,128,128], index: 1, kind: input, shape index: {}]   ;;  %s6809_s2 = inlined_call_operand.vmem [shape: f32[1,128], index: 2, kind: input, shape index: {}]   ;;  %s6810_s3 = inlined_call_operand.vmem [shape: f32[2,256,128], index: 3, kind: output, shape index: {}]  }
   0x1   :  { %s5410_s14 = smov 0  }
   0x2 LB: > { %s25_s15 = sadd.s32 1, %s5377_s13  ;;  %p4269_p0 = scmp.ge.s32.totalorder %s5381_s14, 1  ;;  %s5381_s14 = sphi %s5410_s14, %s13_s14   ;;  %s5377_s13 = sphi %s5408_s13, %s6881_s13   ;;  %s5373_s12 = sphi %s5406_s12, %s6880_s12  }
   0x3   : > { %p27_p1 = scmp.ge.s32.totalorder %s25_s15, 2  ;;  %p165_p2 = scmp.lt.s32.totalorder %s5381_s14, 3 }
   0x5   : > { %s6883_s15 = smov (%p27_p1, %s25_s15), 0  ;;  %p166_p3 = pnand %p4269_p0, %p165_p2 }
   0x7   : > { %169 = sbr.rel (%p166_p3) target bundleno = 608 (0x260), region = 32 }
   0xe   : > { %v5255_v0 = vld [vmem:[%s6808_s1 + $0x40] sm:$0xff]   ;;  %p197_p4 = scmp.lt.s32.totalorder %s5373_s12, 1  ;;  %v389_v3 = vlaneseq  ;;  %v5258_v4 = vld [vmem:[%s6808_s1 + $0x48] sm:$0xff]   ;;  %v5261_v7 = vld [vmem:[%s6808_s1 + $0x50] sm:$0xff]   ;;  %v5383_v19 = vmov 0   ;;  %vm381_vm0 = vcmask 1043456  }
   0xf   : > { %v5430_v1 = vld [vmem:[%s6808_s1 + $0x80] sm:$0xff]   ;;  %4500 = vmatprep.subr.bf16.mxu0 %v5255_v0  ;;  %v5443_v5 = vld [vmem:[%s6808_s1 + $0x88] sm:$0xff]   ;;  %v5459_v9 = vld [vmem:[%s6808_s1 + $0x90] sm:$0xff]   ;;  %v5491_v20 = vrot.slane %v5383_v19, 1  ;;  %v6814_v34 = vmov 0.0   ;;  %v6811_v42 = vmov 1.0  }
  0x10   : > { %v5257_v2 = vld [vmem:[%s6808_s1] sm:$0xff]   ;;  %5052 = vmatprep.subr.bf16.mxu1 %v5430_v1  ;;  %v5260_v6 = vld [vmem:[%s6808_s1 + $0x8] sm:$0xff]   ;;  %s6885_s12 = smov (!%p197_p4, %s5373_s12), 1  ;;  %v5454_v8 = vshrl.u32 %v389_v3, 7  ;;  %v5263_v10 = vld [vmem:[%s6808_s1 + $0x10] sm:$0xff]   ;;  %vm1671_vm7 = vcmask 1046528  }
  0x11   : > { %4501 = vmatpush3.bf16.msra.mxu0 %v5257_v2  ;;  %5060 = vmatpush3.bf16.msra.mxu1 %v5430_v1  ;;  %v5264_v11 = vld [vmem:[%s6808_s1 + $0x58] sm:$0xff]   ;;  %s4498_s9 = sshll.u32 %s6885_s12, 7  ;;  %v5267_v16 = vld [vmem:[%s6808_s1 + $0x60] sm:$0xff]   ;;  %v5270_v25 = vld [vmem:[%s6808_s1 + $0x68] sm:$0xff]   ;;  %vm1310_vm5 = vsmask.f32 4352 }
  0x12   : > { %4502 = vmatprep.subr.bf16.mxu0 %v5258_v4  ;;  %5053 = vmatprep.subr.bf16.mxu1 %v5443_v5  ;;  %v5473_v12 = vld [vmem:[%s6808_s1 + $0x98] sm:$0xff]   ;;  %v405_v13 = vadd.s32 120, %v5454_v8  ;;  %v407_v15 = vadd.s32 136, %v5454_v8  ;;  %v409_v17 = vadd.s32 152, %v5454_v8  ;;  %v5489_v18 = vld [vmem:[%s6808_s1 + $0xa0] sm:$0xff]   ;;  %v411_v21 = vadd.s32 168, %v5454_v8  ;;  %s5528_s16 = scalar_lea.vmem %s6807_s0, %s4498_s9 }
  0x13   : > { %v5266_v14 = vld [vmem:[%s6808_s1 + $0x18] sm:$0xff]   ;;  %v5269_v23 = vld [vmem:[%s6808_s1 + $0x20] sm:$0xff]   ;;  %v5505_v27 = vld [vmem:[%s6808_s1 + $0xa8] sm:$0xff]   ;;  %vm1510_vm6 = vsmask.f32 7424  ;;  %s4499_s30 = sshll.u32 %s6885_s12, 8 }
  0x14   : > { %v535_v22 = vand.u32 15, %v405_v13  ;;  %v549_v24 = vand.u32 15, %v407_v15  ;;  %v563_v26 = vand.u32 15, %v409_v17  ;;  %v5272_v28 = vld [vmem:[%s6808_s1 + $0x28] sm:$0xff]   ;;  %v577_v29 = vand.u32 15, %v411_v21  ;;  %v5273_v30 = vld [vmem:[%s6808_s1 + $0x70] sm:$0xff]   ;;  %s6688_s6 = scalar_lea.vmem %s6810_s3, %s4499_s30 }
  0x15   : > { %4503 = vmatpush3.bf16.msra.mxu0 %v5260_v6  ;;  %5061 = vmatpush3.bf16.msra.mxu1 %v5443_v5  ;;  %v5518_v31 = vld [vmem:[%s6808_s1 + $0xb0] sm:$0xff]   ;;  %v5276_v36 = vld [vmem:[%s6808_s1 + $0x78] sm:$0xff]   ;;  %v5279_v40 = vld [vmem:[%s5528_s16] ss:$0 sps:$4 sm:$0xff]   ;;  %vm984_vm10 = vsmask.f32 3328 }
  0x16   : > { %4504 = vmatprep.subr.bf16.mxu0 %v5261_v7  ;;  %5054 = vmatprep.subr.bf16.mxu1 %v5459_v9  ;;  %vm1199_vm1 = vcmp.ne.s32.totalorder %v535_v22, 15  ;;  %vm1201_vm2 = vcmp.ne.s32.totalorder %v549_v24, 15  ;;  %vm1203_vm3 = vcmp.ne.s32.totalorder %v563_v26, 15  ;;  %v5275_v32 = vld [vmem:[%s6808_s1 + $0x30] sm:$0xff]   ;;  %vm5530_vm4 = vcmp.ne.s32.totalorder %v577_v29, 15  ;;  %v5545_v39 = vld [vmem:[%s6808_s1 + $0xb8] sm:$0xff]  }
  0x17   : > { %v4316_v35 = vsel %vm1199_vm1, 1.0, %v6814_v34  ;;  %v4317_v37 = vsel %vm1201_vm2, 1.0, %v6814_v34  ;;  %v4318_v38 = vsel %vm1203_vm3, 1.0, %v6814_v34  ;;  %v5549_v41 = vld [vmem:[%s5528_s16 + $0x4] sm:$0xff]   ;;  %v5278_v44 = vld [vmem:[%s6808_s1 + $0x38] sm:$0xff]   ;;  %v5557_v46 = vsel %vm381_vm0, 0, %v5279_v40 }
  0x18   : > { %v1299_v43 = vpack.c.bf16 %v4316_v35, %v6811_v42  ;;  %v1300_v45 = vpack.c.bf16 %v4317_v37, %v6811_v42  ;;  %v1525_v47 = vshll.u32 %v5549_v41, 16  ;;  %v1301_v48 = vpack.c.bf16 %v4318_v38, %v6811_v42  ;;  %v5281_v59 = vld [vmem:[%s5528_s16 + $0x34] sm:$0xff]   ;;  %v5285_v13 = vld [vmem:[%s6808_s1 + $0x100] sm:$0xff]  }
  0x19   : > { %4505 = vmatpush3.bf16.msra.mxu0 %v5263_v10  ;;  %5062 = vmatpush3.bf16.msra.mxu1 %v5459_v9  ;;  %v1517_v49 = vshll.u32 %v5557_v46, 16  ;;  %v1521_v50 = vshrl.u32 %v5557_v46, 16  ;;  %v4319_v52 = vsel %vm5530_vm4, 1.0, %v6814_v34  ;;  %v5282_v15 = vld [vmem:[%s5528_s16 + $0x3c] sm:$0xff]   ;;  %v392_v40 = vadd.s32 16, %v5454_v8 }
  0x1a   : > { %4506 = vmatprep.subr.bf16.mxu0 %v5264_v11  ;;  %5055 = vmatprep.subr.bf16.mxu1 %v5473_v12  ;;  %v5565_v51 = vrot.slane %v1525_v47, 1  ;;  %v1374_v53 = vshrl.u32 %v1299_v43, 16  ;;  %v1377_v54 = vshll.u32 %v1299_v43, 16  ;;  %v1302_v56 = vpack.c.bf16 %v4319_v52, %v6811_v42 }
  0x1b   : > { %v1519_v55 = vrot.slane %v1517_v49, 1  ;;  %v1383_v57 = vshrl.u32 %v1300_v45, 16  ;;  %v1386_v58 = vshll.u32 %v1300_v45, 16  ;;  %v1392_v62 = vshrl.u32 %v1301_v48, 16 }
  0x1c   : > { %v1376_v60 = vrot.slane %v1374_v53, 3  ;;  %v1379_v61 = vrot.slane %v1377_v54, 4  ;;  %v1395_v63 = vshll.u32 %v1301_v48, 16  ;;  %v1401_v19 = vshrl.u32 %v1302_v56, 16 }
  0x1d   : > { %4507 = vmatpush3.bf16.msra.mxu0 %v5266_v14  ;;  %5063 = vmatpush3.bf16.msra.mxu1 %v5473_v12  ;;  %v1520_v0 = vsel %vm1510_vm6, %v5491_v20, %v1519_v55  ;;  %v1523_v2 = vor.u32 %v1521_v50, %v1519_v55  ;;  %v1385_v3 = vrot.slane %v1383_v57, 3  ;;  %v1388_v4 = vrot.slane %v1386_v58, 4 }
  0x1e   : > { %4508 = vmatprep.subr.bf16.mxu0 %v5267_v16  ;;  %5056 = vmatprep.subr.bf16.mxu1 %v5489_v18  ;;  %v1807_v6 = vshrl.u32 %v1520_v0, 16  ;;  %v1810_v7 = vshll.u32 %v1520_v0, 16  ;;  %v5575_v10 = vor.u32 %v1379_v61, %v1376_v60  ;;  %v1394_v11 = vrot.slane %v1392_v62, 3 }
  0x1f   : > { %v1528_v14 = vsel %vm1510_vm6, %v1523_v2, %v5565_v51  ;;  %v1389_v16 = vor.u32 %v1388_v4, %v1385_v3  ;;  %v1397_v17 = vrot.slane %v1395_v63, 4  ;;  %v1404_v29 = vshll.u32 %v1302_v56, 16  ;;  %v5609_v2 = vld [vmem:[%s5528_s16 + $0xc] sm:$0xff]  }
  0x20   : > { %v1809_v21 = vrot.slane %v1807_v6, 3  ;;  %v1812_v22 = vrot.slane %v1810_v7, 4  ;;  %v1818_v24 = vshll.u32 %v1528_v14, 16  ;;  %v430_v47 = vand.u32 15, %v5454_v8 }
  0x21   : > { %4509 = vmatpush3.bf16.msra.mxu0 %v5269_v23  ;;  %5064 = vmatpush3.bf16.msra.mxu1 %v5489_v18  ;;  %v1815_v23 = vshrl.u32 %v1528_v14, 16  ;;  %v1398_v26 = vor.u32 %v1397_v17, %v1394_v11  ;;  %v1406_v38 = vrot.slane %v1404_v29, 4  ;;  %v444_v49 = vand.u32 15, %v392_v40 }
  0x22   : > { %4510 = vmatprep.subr.bf16.mxu0 %v5270_v25  ;;  %5057 = vmatprep.subr.bf16.mxu1 %v5505_v27  ;;  %v1390_v25 = vsel %vm1310_vm5, %v5575_v10, %v1389_v16  ;;  %v1820_v33 = vrot.slane %v1818_v24, 4  ;;  %v413_v50 = vadd.s32 184, %v5454_v8  ;;  %vm858_vm8 = vcmp.ne.s32.totalorder %v430_v47, 0 }
  0x23   : > { %v1499_v35 = vmul.bf16 %v5281_v59, %v1390_v25  ;;  %v1399_v37 = vsel %vm1310_vm5, %v1389_v16, %v1398_v26  ;;  %v1529_v54 = vshrl.u32 %v5549_v41, 16  ;;  %vm860_vm9 = vcmp.ne.s32.totalorder %v444_v49, 0  ;;  %v5284_v49 = vld [vmem:[%s5528_s16 + $0x4c] sm:$0xff]  }
  0x24   : > { %v4291_v56 = vsel %vm858_vm8, 1.0, %v6814_v34  ;;  %v591_v57 = vand.u32 15, %v413_v50  ;;  %v4292_v60 = vsel %vm860_vm9, 1.0, %v6814_v34 }
  0x25   : > { %4511 = vmatpush3.bf16.msra.mxu0 %v5272_v28  ;;  %5065 = vmatpush3.bf16.msra.mxu1 %v5505_v27  ;;  %v1403_v28 = vrot.slane %v1401_v19, 3  ;;  %v5591_v45 = vrot.slane %v1499_v35, 1  ;;  %v966_v61 = vpack.c.bf16 %v6811_v42, %v4291_v56  ;;  %v967_v0 = vpack.c.bf16 %v6811_v42, %v4292_v60 }
  0x26   : > { %4512 = vmatprep.subr.bf16.mxu0 %v5273_v30  ;;  %5058 = vmatprep.subr.bf16.mxu1 %v5518_v31  ;;  %v1813_v30 = vor.u32 %v1812_v22, %v1809_v21  ;;  %vm1207_vm11 = vcmp.ne.s32.totalorder %v591_v57, 15  ;;  %v1531_v35 = vor.u32 %v1529_v54, %v5565_v51 }
  0x27   : > { %v5594_v48 = vor.u32 %v1406_v38, %v1403_v28  ;;  %v986_v4 = vshrl.u32 %v966_v61, 16  ;;  %v989_v6 = vshll.u32 %v966_v61, 16  ;;  %v4320_v7 = vsel %vm1207_vm11, 1.0, %v6814_v34 }
  0x28   : > { %v994_v14 = vshrl.u32 %v967_v0, 16  ;;  %v1303_v21 = vpack.c.bf16 %v4320_v7, %v6811_v42 }
  0x29   : > { %4513 = vmatpush3.bf16.msra.mxu0 %v5275_v32  ;;  %5066 = vmatpush3.bf16.msra.mxu1 %v5518_v31  ;;  %v1817_v32 = vrot.slane %v1815_v23, 3  ;;  %v1408_v55 = vsel %vm1310_vm5, %v1398_v26, %v5594_v48  ;;  %v988_v17 = vrot.slane %v986_v4, 4  ;;  %v991_v19 = vrot.slane %v989_v6, 5 }
  0x2a   : > { %4514 = vmatprep.subr.bf16.mxu0 %v5276_v36  ;;  %5059 = vmatprep.subr.bf16.mxu1 %v5545_v39  ;;  %v5283_v36 = vld [vmem:[%s5528_s16 + $0x44] sm:$0xff]   ;;  %v996_v25 = vrot.slane %v994_v14, 4  ;;  %v1410_v29 = vshrl.u32 %v1303_v21, 16 }
  0x2b   : > { %v5589_v43 = vor.u32 %v1820_v33, %v1817_v32  ;;  %v1501_v58 = vmul.bf16 %v5283_v36, %v1408_v55  ;;  %v992_v26 = vor.u32 %v991_v19, %v988_v17  ;;  %v1533_v36 = vshll.u32 %v5609_v2, 16 }
  0x2c   : > { %v1412_v40 = vrot.slane %v1410_v29, 3 }
  0x2d   : > { %4515 = vmatpush3.bf16.msra.mxu0 %v5278_v44  ;;  %5067 = vmatpush3.bf16.msra.mxu1 %v5545_v39  ;;  %v1500_v44 = vmul.bf16 %v5282_v15, %v1399_v37  ;;  %v1822_v52 = vsel %vm1310_vm5, %v1813_v30, %v5589_v43  ;;  %v5611_v3 = vrot.slane %v1501_v58, 1  ;;  %v997_v15 = vshll.u32 %v967_v0, 16 }
  0x2e   : > { %4908 = vmatprep.subr.bf16.mxu0 %v5430_v1  ;;  %4636 = vmatprep.subr.bf16.mxu1 %v5285_v13  ;;  %v1413_v30 = vshll.u32 %v1303_v21, 16  ;;  %v1165_v38 = vmul.bf16 0, %v992_v26  ;;  %v1535_v50 = vrot.slane %v1533_v36, 1 }
  0x2f   : > { %v1689_v53 = vrot.slane %v1500_v44, 1  ;;  %2469 = vmatprep.mubr.bf16.mxu0 %v1822_v52  ;;  %v999_v28 = vrot.slane %v997_v15, 5  ;;  %v415_v52 = vadd.s32 200, %v5454_v8 }
  0x30   : > { %v1415_v44 = vrot.slane %v1413_v30, 4  ;;  %v1790_v56 = vshrl.u32 %v1165_v38, 16  ;;  %v1793_v51 = vshll.u32 %v1165_v38, 16 }
  0x31   : > { %v1690_v59 = vsel %vm1671_vm7, %v5591_v45, %v1689_v53  ;;  %v1692_v16 = vsel %vm1671_vm7, %v1689_v53, %v5611_v3  ;;  %v5621_v37 = vor.u32 %v999_v28, %v996_v25  ;;  %v394_v53 = vadd.s32 32, %v5454_v8 }
  0x32   : > { %v2021_v62 = vshrl.u32 %v1690_v59, 16  ;;  %v2024_v63 = vshll.u32 %v1690_v59, 16  ;;  %v2048_v23 = vshrl.u32 %v1692_v16, 16  ;;  %v2051_v24 = vshll.u32 %v1692_v16, 16 }
  0x33   : > { %v1001_v55 = vsel %vm984_vm10, %v992_v26, %v5621_v37  ;;  %v5630_v54 = vor.u32 %v1415_v44, %v1412_v40  ;;  %v1536_v59 = vsel %vm1510_vm6, %v1531_v35, %v1535_v50  ;;  %v605_v60 = vand.u32 15, %v415_v52  ;;  %v5665_v44 = vld [vmem:[%s5528_s16 + $0x14] sm:$0xff]  }
  0x34   : > { %v2023_v11 = vrot.slane %v2021_v62, 3  ;;  %v2026_v13 = vrot.slane %v2024_v63, 4  ;;  %v2050_v32 = vrot.slane %v2048_v23, 3  ;;  %v2053_v33 = vrot.slane %v2051_v24, 4 }
  0x35   : > { %v1166_v58 = vmul.bf16 %v1001_v55, %v5557_v46  ;;  %v1792_v61 = vrot.slane %v1790_v56, 3  ;;  %v1795_v62 = vrot.slane %v1793_v51, 4  ;;  %v1417_v63 = vsel %vm1310_vm5, %v5594_v48, %v5630_v54  ;;  %v5286_v55 = vld [vmem:[%s6808_s1 + $0xc0] sm:$0xff]  }
  0x36   : > { %v5617_v22 = vor.u32 %v2026_v13, %v2023_v11  ;;  %v5623_v47 = vor.u32 %v2053_v33, %v2050_v32  ;;  %v1850_v0 = vshrl.u32 %v1536_v59, 16  ;;  %v1502_v7 = vmul.bf16 %v5284_v49, %v1417_v63 }
  0x37   : > { %v1798_v4 = vshrl.u32 %v1166_v58, 16  ;;  %v1801_v6 = vshll.u32 %v1166_v58, 16  ;;  %v1853_v11 = vshll.u32 %v1536_v59, 16  ;;  %v1796_v13 = vor.u32 %v1795_v62, %v1792_v61 }
  0x38   : > { %v5635_v57 = vsel %vm1310_vm5, %v5617_v22, %v5623_v47  ;;  %v1852_v14 = vrot.slane %v1850_v0, 3  ;;  %vm1209_vm12 = vcmp.ne.s32.totalorder %v605_v60, 15  ;;  %v458_v15 = vand.u32 15, %v394_v53 }
  0x39   : > { %4940 = vmatprep.mubr.bf16.mxu1 %v5635_v57  ;;  %v1800_v16 = vrot.slane %v1798_v4, 3  ;;  %v1803_v17 = vrot.slane %v1801_v6, 4  ;;  %v5643_v19 = vrot.slane %v1502_v7, 1  ;;  %v1855_v21 = vrot.slane %v1853_v11, 4 }
  0x3a   : > { %v4321_v23 = vsel %vm1209_vm12, 1.0, %v6814_v34  ;;  %vm862_vm13 = vcmp.ne.s32.totalorder %v458_v15, 0  ;;  %v417_v48 = vadd.s32 216, %v5454_v8  ;;  %v1537_v24 = vshrl.u32 %v5609_v2, 16  ;;  %v5288_v15 = vld [vmem:[%s6808_s1 + $0xc8] sm:$0xff]  }
  0x3b   : > { %v5648_v25 = vor.u32 %v1803_v17, %v1800_v16  ;;  %v1694_v26 = vsel %vm1671_vm7, %v5611_v3, %v5643_v19  ;;  %v5653_v28 = vor.u32 %v1855_v21, %v1852_v14  ;;  %v1304_v29 = vpack.c.bf16 %v4321_v23, %v6811_v42 }
  0x3c   : > { %v2075_v30 = vshrl.u32 %v1694_v26, 16  ;;  %v2078_v32 = vshll.u32 %v1694_v26, 16  ;;  %v4293_v33 = vsel %vm862_vm13, 1.0, %v6814_v34  ;;  %v619_v35 = vand.u32 15, %v417_v48 }
  0x3d   : > { %v1805_v36 = vsel %vm1310_vm5, %v1796_v13, %v5648_v25  ;;  %v5662_v38 = vsel %vm1310_vm5, %v5589_v43, %v5653_v28  ;;  %v1419_v40 = vshrl.u32 %v1304_v29, 16  ;;  %v1422_v3 = vshll.u32 %v1304_v29, 16  ;;  %v5674_v43 = vld [vmem:[%s5528_s16 + $0x54] sm:$0xff]  }
  0x3e   : > { %2470 = vmatmul.mubr.bf16.vlgmr.msra.gmra.mrb[0].mxu0 %v1805_v36  ;;  %v2077_v49 = vrot.slane %v2075_v30, 3  ;;  %v2080_v52 = vrot.slane %v2078_v32, 4  ;;  %v968_v53 = vpack.c.bf16 %v6811_v42, %v4293_v33  ;;  %vm1211_vm14 = vcmp.ne.s32.totalorder %v619_v35, 15  ;;  %v5715_v35 = vld [vmem:[%s5528_s16 + $0x5c] sm:$0xff]   ;;  %v5293_v36 = vld [vmem:[%s6808_s1 + $0xd0] sm:$0xff]  }
  0x3f   : > { %4909 = vmatpush3.bf16.msra.mxu0 %v5430_v1  ;;  %2477 = vmatprep.mubr.bf16.mxu0 %v5662_v38  ;;  %v1421_v56 = vrot.slane %v1419_v40, 3  ;;  %v1424_v51 = vrot.slane %v1422_v3, 4  ;;  %v4322_v58 = vsel %vm1211_vm14, 1.0, %v6814_v34  ;;  %v1539_v59 = vor.u32 %v1537_v24, %v1535_v50  ;;  %v5287_v1 = vld [vmem:[%s6808_s1 + $0x108] sm:$0xff]  }
  0x40   : > { %v5677_v60 = vor.u32 %v2080_v52, %v2077_v49  ;;  %v1003_v61 = vshrl.u32 %v968_v53, 16  ;;  %v1006_v62 = vshll.u32 %v968_v53, 16  ;;  %v1305_v63 = vpack.c.bf16 %v4322_v58, %v6811_v42  ;;  %4910 = vmatprep.subr.bf16.mxu0 %v5443_v5  ;;  %v5294_v53 = vld [vmem:[%s6808_s1 + $0x118] sm:$0xff]  }
  0x41   : > { %v1425_v0 = vor.u32 %v1424_v51, %v1421_v56  ;;  %v1541_v4 = vshll.u32 %v5665_v44, 16  ;;  %v419_v6 = vadd.s32 232, %v5454_v8  ;;  %v396_v7 = vadd.s32 48, %v5454_v8 }
  0x42   : > { %v5690_v50 = vsel %vm1310_vm5, %v5623_v47, %v5677_v60  ;;  %v1005_v11 = vrot.slane %v1003_v61, 4  ;;  %v1008_v13 = vrot.slane %v1006_v62, 5  ;;  %v1428_v14 = vshrl.u32 %v1305_v63, 16 }
  0x43   : > { %4941 = vmatmul.mubr.bf16.vlgmr.msra.gmra.mrb[0].mxu1 %v5690_v50  ;;  %v1426_v16 = vsel %vm1310_vm5, %v5630_v54, %v1425_v0  ;;  %v1431_v17 = vshll.u32 %v1305_v63, 16  ;;  %v5698_v21 = vrot.slane %v1541_v4, 1  ;;  %v633_v23 = vand.u32 15, %v419_v6  ;;  %4911 = vmatpush3.bf16.msra.mxu0 %v5443_v5  ;;  %v5292_v54 = vld [vmem:[%s6808_s1 + $0x110] sm:$0xff]  }
  0x44   : > { %4637 = vmatpush3.bf16.msra.mxu1 %v5286_v55  ;;  %v1503_v47 = vmul.bf16 %v5674_v43, %v1426_v16  ;;  %v5702_v48 = vor.u32 %v1008_v13, %v1005_v11  ;;  %v1430_v24 = vrot.slane %v1428_v14, 3  ;;  %v472_v26 = vand.u32 15, %v396_v7  ;;  %4912 = vmatprep.subr.bf16.mxu0 %v5459_v9 }
  0x45   : > { %4638 = vmatprep.subr.bf16.mxu1 %v5287_v1  ;;  %v1433_v29 = vrot.slane %v1431_v17, 4  ;;  %v1544_v30 = vsel %vm1510_vm6, %v1539_v59, %v5698_v21  ;;  %vm1213_vm15 = vcmp.ne.s32.totalorder %v633_v23, 15  ;;  %v421_v5 = vadd.s32 248, %v5454_v8  ;;  %v5735_v1 = vld [vmem:[%s5528_s16 + $0x1c] sm:$0xff]   ;;  %v5751_v17 = vld [vmem:[%s5528_s16 + $0x64] sm:$0xff]  }
  0x46   : > { %v1695_v32 = vrot.slane %v1503_v47, 1  ;;  %v1010_v33 = vsel %vm984_vm10, %v5621_v37, %v5702_v48  ;;  %v1877_v40 = vshrl.u32 %v1544_v30, 16  ;;  %v1880_v3 = vshll.u32 %v1544_v30, 16 }
  0x47   : > { %v1167_v49 = vmul.bf16 %v5549_v41, %v1010_v33  ;;  %v1434_v52 = vor.u32 %v1433_v29, %v1430_v24  ;;  %v4323_v55 = vsel %vm1213_vm15, 1.0, %v6814_v34  ;;  %vm5725_vm1 = vcmp.ne.s32.totalorder %v472_v26, 0  ;;  %4913 = vmatpush3.bf16.msra.mxu0 %v5459_v9  ;;  %v5299_v24 = vld [vmem:[%s6808_s1 + $0x120] sm:$0xff]  }
  0x48   : > { %4639 = vmatpush3.bf16.msra.mxu1 %v5288_v15  ;;  %v1696_v56 = vsel %vm1671_vm7, %v5643_v19, %v1695_v32  ;;  %v1879_v51 = vrot.slane %v1877_v40, 3  ;;  %v1882_v41 = vrot.slane %v1880_v3, 4  ;;  %v1306_v58 = vpack.c.bf16 %v4323_v55, %v6811_v42  ;;  %4914 = vmatprep.subr.bf16.mxu0 %v5473_v12  ;;  %v5295_v15 = vld [vmem:[%s6808_s1 + $0xd8] sm:$0xff]  }
  0x49   : > { %v2102_v59 = vshrl.u32 %v1696_v56, 16  ;;  %v2105_v61 = vshll.u32 %v1696_v56, 16  ;;  %v1841_v62 = vshrl.u32 %v1167_v49, 16  ;;  %v1844_v63 = vshll.u32 %v1167_v49, 16  ;;  %4640 = vmatprep.subr.bf16.mxu1 %v5292_v54 }
  0x4a   : > { %v1435_v9 = vsel %vm1310_vm5, %v1425_v0, %v1434_v52  ;;  %v5738_v4 = vor.u32 %v1882_v41, %v1879_v51  ;;  %v1437_v6 = vshrl.u32 %v1306_v58, 16  ;;  %v1440_v19 = vshll.u32 %v1306_v58, 16 }
  0x4b   : > { %v2104_v7 = vrot.slane %v2102_v59, 3  ;;  %v2107_v11 = vrot.slane %v2105_v61, 4  ;;  %v1843_v13 = vrot.slane %v1841_v62, 3  ;;  %v1846_v14 = vrot.slane %v1844_v63, 4  ;;  %4915 = vmatpush3.bf16.msra.mxu0 %v5473_v12 }
  0x4c   : > { %v1504_v16 = vmul.bf16 %v5715_v35, %v1435_v9  ;;  %4641 = vmatpush3.bf16.msra.mxu1 %v5293_v36  ;;  %v5748_v0 = vsel %vm1310_vm5, %v5653_v28, %v5738_v4  ;;  %v1439_v23 = vrot.slane %v1437_v6, 3  ;;  %v1442_v47 = vrot.slane %v1440_v19, 4  ;;  %4916 = vmatprep.subr.bf16.mxu0 %v5489_v18 }
  0x4d   : > { %v2108_v26 = vor.u32 %v2107_v11, %v2104_v7  ;;  %v5757_v12 = vor.u32 %v1846_v14, %v1843_v13  ;;  %4642 = vmatprep.subr.bf16.mxu1 %v5294_v53  ;;  %v4294_v29 = vsel %vm5725_vm1, 1.0, %v6814_v34  ;;  %v647_v28 = vand.u32 15, %v421_v5  ;;  %v5302_v14 = vld [vmem:[%s6808_s1 + $0xe8] sm:$0xff]  }
  0x4e   : > { %v1697_v54 = vrot.slane %v1504_v16, 1  ;;  %v5762_v30 = vor.u32 %v1442_v47, %v1439_v23  ;;  %v969_v33 = vpack.c.bf16 %v6811_v42, %v4294_v29  ;;  %v1545_v36 = vshrl.u32 %v5665_v44, 16 }
  0x4f   : > { %v5768_v40 = vsel %vm1310_vm5, %v5677_v60, %v2108_v26  ;;  %v5773_v3 = vsel %vm1310_vm5, %v5648_v25, %v5757_v12  ;;  %vm1215_vm2 = vcmp.ne.s32.totalorder %v647_v28, 15  ;;  %v1549_v49 = vshll.u32 %v5735_v1, 16  ;;  %4917 = vmatpush3.bf16.msra.mxu0 %v5489_v18  ;;  %v5300_v25 = vld [vmem:[%s6808_s1 + $0xe0] sm:$0xff]   ;;  %v5306_v28 = vld [vmem:[%s6808_s1 + $0x130] sm:$0xff]  }
  0x50   : > { %4944 = vmatprep.mubr.bf16.mxu1 %v5768_v40  ;;  %2478 = vmatmul.mubr.bf16.gmra.mrb[4].mxu0 %v5773_v3  ;;  %v1698_v5 = vsel %vm1671_vm7, %v1695_v32, %v1697_v54  ;;  %v1444_v60 = vsel %vm1310_vm5, %v1434_v52, %v5762_v30  ;;  %v1012_v53 = vshrl.u32 %v969_v33, 16  ;;  %v1015_v55 = vshll.u32 %v969_v33, 16  ;;  %v5301_v32 = vld [vmem:[%s6808_s1 + $0x128] sm:$0xff]  }
  0x51   : > { %v2129_v37 = vshrl.u32 %v1698_v5, 16  ;;  %v2132_v56 = vshll.u32 %v1698_v5, 16  ;;  %4643 = vmatpush3.bf16.msra.mxu1 %v5295_v15  ;;  %2485 = vmatprep.mubr.bf16.mxu0 %v5748_v0  ;;  %v1505_v18 = vmul.bf16 %v5751_v17, %v1444_v60  ;;  %v4324_v51 = vsel %vm1215_vm2, 1.0, %v6814_v34  ;;  %v5305_v5 = vld [vmem:[%s5528_s16 + $0x7c] ss:$0 sps:$4 sm:$0xff]  }
  0x52   : > { %v1014_v52 = vrot.slane %v1012_v53, 4  ;;  %v1017_v41 = vrot.slane %v1015_v55, 5  ;;  %v1307_v58 = vpack.c.bf16 %v4324_v51, %v6811_v42  ;;  %4644 = vmatprep.subr.bf16.mxu1 %v5299_v24  ;;  %v1547_v59 = vor.u32 %v1545_v36, %v5698_v21  ;;  %4918 = vmatprep.subr.bf16.mxu0 %v5505_v27  ;;  %v5815_v24 = vld [vmem:[%s5528_s16 + $0x6c] sm:$0xff]  }
  0x53   : > { %v2131_v61 = vrot.slane %v2129_v37, 3  ;;  %v2134_v62 = vrot.slane %v2132_v56, 4  ;;  %v5794_v63 = vrot.slane %v1505_v18, 1  ;;  %v5796_v9 = vrot.slane %v1549_v49, 1  ;;  %4919 = vmatpush3.bf16.msra.mxu0 %v5505_v27 }
  0x54   : > { %v5799_v6 = vor.u32 %v1017_v41, %v1014_v52  ;;  %v1446_v19 = vshrl.u32 %v1307_v58, 16  ;;  %v1449_v7 = vshll.u32 %v1307_v58, 16  ;;  %v423_v11 = vadd.s32 264, %v5454_v8  ;;  %4920 = vmatprep.subr.bf16.mxu0 %v5518_v31 }
  0x55   : > { %v2135_v21 = vor.u32 %v2134_v62, %v2131_v61  ;;  %v1700_v13 = vsel %vm1671_vm7, %v1697_v54, %v5794_v63  ;;  %4645 = vmatpush3.bf16.msra.mxu1 %v5300_v25  ;;  %v1552_v27 = vsel %vm1510_vm6, %v1547_v59, %v5796_v9  ;;  %v398_v15 = vadd.s32 64, %v5454_v8 }
  0x56   : > { %v2156_v16 = vshrl.u32 %v1700_v13, 16  ;;  %v2159_v23 = vshll.u32 %v1700_v13, 16  ;;  %v1019_v47 = vsel %vm984_vm10, %v5702_v48, %v5799_v6  ;;  %v1448_v29 = vrot.slane %v1446_v19, 3  ;;  %4646 = vmatprep.subr.bf16.mxu1 %v5301_v32  ;;  %v5308_v32 = vld [vmem:[%s6808_s1 + $0x138] sm:$0xff]  }
  0x57   : > { %v5821_v54 = vsel %vm1310_vm5, %v2108_v26, %v2135_v21  ;;  %v1168_v33 = vmul.bf16 %v5609_v2, %v1019_v47  ;;  %v1451_v36 = vrot.slane %v1449_v7, 4  ;;  %v1904_v49 = vshrl.u32 %v1552_v27, 16  ;;  %4921 = vmatpush3.bf16.msra.mxu0 %v5518_v31  ;;  %v5307_v2 = vld [vmem:[%s6808_s1 + $0xf0] sm:$0xff]  }
  0x58   : > { %4945 = vmatmul.mubr.bf16.gmra.mrb[4].mxu1 %v5821_v54  ;;  %v2158_v48 = vrot.slane %v2156_v16, 3  ;;  %v2161_v60 = vrot.slane %v2159_v23, 4  ;;  %v1907_v53 = vshll.u32 %v1552_v27, 16  ;;  %v661_v55 = vand.u32 15, %v423_v11  ;;  %4922 = vmatprep.subr.bf16.mxu0 %v5545_v39  ;;  %v5866_v16 = vld [vmem:[%s6808_s1 + $0x140] sm:$0xff]  }
  0x59   : > { %v1868_v25 = vshrl.u32 %v1168_v33, 16  ;;  %v1871_v37 = vshll.u32 %v1168_v33, 16  ;;  %v1452_v56 = vor.u32 %v1451_v36, %v1448_v29  ;;  %4647 = vmatpush3.bf16.msra.mxu1 %v5302_v14  ;;  %v1906_v26 = vrot.slane %v1904_v49, 3 }
  0x5a   : > { %v5831_v18 = vor.u32 %v2161_v60, %v2158_v48  ;;  %v1909_v31 = vrot.slane %v1907_v53, 4  ;;  %vm1217_vm3 = vcmp.ne.s32.totalorder %v661_v55, 15  ;;  %v486_v51 = vand.u32 15, %v398_v15  ;;  %4648 = vmatprep.subr.bf16.mxu1 %v5306_v28  ;;  %v5875_v28 = vld [vmem:[%s5528_s16 + $0x24] sm:$0xff]   ;;  %v5887_v53 = vld [vmem:[%s5528_s16 + $0x74] sm:$0xff]  }
  0x5b   : > { %v1870_v52 = vrot.slane %v1868_v25, 3  ;;  %v1873_v41 = vrot.slane %v1871_v37, 4  ;;  %v1453_v58 = vsel %vm1310_vm5, %v5762_v30, %v1452_v56  ;;  %v4325_v59 = vsel %vm1217_vm3, 1.0, %v6814_v34  ;;  %4923 = vmatpush3.bf16.msra.mxu0 %v5545_v39 }
  0x5c   : > { %v5842_v61 = vsel %vm1310_vm5, %v2135_v21, %v5831_v18  ;;  %v1506_v62 = vmul.bf16 %v5815_v24, %v1453_v58  ;;  %v5845_v19 = vor.u32 %v1909_v31, %v1906_v26  ;;  %v1308_v7 = vpack.c.bf16 %v4325_v59, %v6811_v42  ;;  %v5309_v21 = vld [vmem:[%s6808_s1 + $0xf8] sm:$0xff]  }
  0x5d   : > { %6840 = vst [vmem:[#allocation3_spill] sm:$0xff] %v5842_v61  ;;  %4948 = vmatprep.mubr.bf16.mxu1 %v5842_v61  ;;  %v5849_v11 = vor.u32 %v1873_v41, %v1870_v52  ;;  %vm866_vm4 = vcmp.ne.s32.totalorder %v486_v51, 0  ;;  %v5852_v30 = vsel %vm381_vm0, %v5305_v5, 0  ;;  %v425_v39 = vadd.s32 280, %v5454_v8  ;;  %4649 = vmatpush3.bf16.msra.mxu1 %v5307_v2 }
  0x5e   : > { %v1701_v13 = vrot.slane %v1506_v62, 1  ;;  %v5861_v14 = vsel %vm1310_vm5, %v5738_v4, %v5845_v19  ;;  %v1455_v27 = vshrl.u32 %v1308_v7, 16  ;;  %v1458_v15 = vshll.u32 %v1308_v7, 16  ;;  %4650 = vmatprep.subr.bf16.mxu1 %v5308_v32 }
  0x5f   : > { %v5871_v23 = vsel %vm1310_vm5, %v5757_v12, %v5849_v11  ;;  %v4295_v47 = vsel %vm866_vm4, 1.0, %v6814_v34  ;;  %v675_v29 = vand.u32 15, %v425_v39  ;;  %v1553_v4 = vshrl.u32 %v5735_v1, 16  ;;  %v5318_v12 = vld [vmem:[%s6808_s1 + $0x1c0] sm:$0xff]  }
  0x60   : > { %2486 = vmatmul.mubr.bf16.gmra.mrb[8].mxu0 %v5871_v23  ;;  %v1702_v33 = vsel %vm1671_vm7, %v5794_v63, %v1701_v13  ;;  %v1457_v36 = vrot.slane %v1455_v27, 3  ;;  %v1460_v49 = vrot.slane %v1458_v15, 4  ;;  %v970_v5 = vpack.c.bf16 %v6811_v42, %v4295_v47  ;;  %4772 = vmatprep.subr.bf16.mxu0 %v5318_v12 }
  0x61   : > { %v2183_v48 = vshrl.u32 %v1702_v33, 16  ;;  %v2186_v60 = vshll.u32 %v1702_v33, 16  ;;  %2493 = vmatprep.mubr.bf16.mxu0 %v5861_v14  ;;  %vm1219_vm0 = vcmp.ne.s32.totalorder %v675_v29, 15  ;;  %4651 = vmatpush3.bf16.msra.mxu1 %v5309_v21  ;;  %v1555_v55 = vor.u32 %v1553_v4, %v5796_v9 }
  0x62   : > { %v1461_v25 = vor.u32 %v1460_v49, %v1457_v36  ;;  %v1021_v63 = vshrl.u32 %v970_v5, 16  ;;  %v1024_v37 = vshll.u32 %v970_v5, 16  ;;  %v4326_v26 = vsel %vm1219_vm0, 1.0, %v6814_v34  ;;  %4956 = vmatprep.subr.bf16.mxu1 %v5866_v16 }
  0x63   : > { %v2185_v2 = vrot.slane %v2183_v48, 3  ;;  %v2188_v31 = vrot.slane %v2186_v60, 4  ;;  %v1309_v51 = vpack.c.bf16 %v4326_v26, %v6811_v42  ;;  %v1557_v32 = vshll.u32 %v5875_v28, 16 }
  0x64   : > { %v1462_v52 = vsel %vm1310_vm5, %v1452_v56, %v1461_v25  ;;  %v1023_v41 = vrot.slane %v1021_v63, 4  ;;  %v1026_v58 = vrot.slane %v1024_v37, 5  ;;  %v400_v9 = vadd.s32 80, %v5454_v8  ;;  %v5914_v63 = vld [vmem:[%s5528_s16 + $0x2c] sm:$0xff]  }
  0x65   : > { %v2189_v59 = vor.u32 %v2188_v31, %v2185_v2  ;;  %v1507_v62 = vmul.bf16 %v5887_v53, %v1462_v52  ;;  %v1464_v7 = vshrl.u32 %v1309_v51, 16  ;;  %v1467_v39 = vshll.u32 %v1309_v51, 16 }
  0x66   : > { %v5897_v21 = vor.u32 %v1026_v58, %v1023_v41  ;;  %v1559_v27 = vrot.slane %v1557_v32, 1  ;;  %v500_v15 = vand.u32 15, %v400_v9  ;;  %v1561_v47 = vshrl.u32 %v5875_v28, 16 }
  0x67   : > { %v5902_v29 = vsel %vm1310_vm5, %v5831_v18, %v2189_v59  ;;  %v1703_v56 = vrot.slane %v1507_v62, 1  ;;  %v1466_v4 = vrot.slane %v1464_v7, 3  ;;  %v1469_v33 = vrot.slane %v1467_v39, 4 }
  0x68   : > { %6841 = vst [vmem:[#allocation4_spill] sm:$0xff] %v5902_v29  ;;  %4949 = vmatmul.mubr.bf16.gmra.mrb[8].mxu1 %v5902_v29  ;;  %v1028_v36 = vsel %vm984_vm10, %v5799_v6, %v5897_v21  ;;  %v1560_v49 = vsel %vm1510_vm6, %v1555_v55, %v1559_v27  ;;  %vm868_vm8 = vcmp.ne.s32.totalorder %v500_v15, 0  ;;  %v1563_v5 = vor.u32 %v1561_v47, %v1559_v27 }
  0x69   : > { %v1704_v12 = vsel %vm1671_vm7, %v1701_v13, %v1703_v56  ;;  %v1169_v48 = vmul.bf16 %v5665_v44, %v1028_v36  ;;  %v5911_v60 = vor.u32 %v1469_v33, %v1466_v4  ;;  %v1931_v18 = vshrl.u32 %v1560_v49, 16 }
  0x6a   : > { %v2210_v37 = vshrl.u32 %v1704_v12, 16  ;;  %v2213_v26 = vshll.u32 %v1704_v12, 16  ;;  %v1934_v2 = vshll.u32 %v1560_v49, 16  ;;  %v4296_v31 = vsel %vm868_vm8, 1.0, %v6814_v34 }
  0x6b   : > { %v1895_v51 = vshrl.u32 %v1169_v48, 16  ;;  %v1898_v6 = vshll.u32 %v1169_v48, 16  ;;  %v1471_v55 = vsel %vm1310_vm5, %v1461_v25, %v5911_v60  ;;  %v1933_v32 = vrot.slane %v1931_v18, 3 }
  0x6c   : > { %v2212_v52 = vrot.slane %v2210_v37, 3  ;;  %v2215_v13 = vrot.slane %v2213_v26, 4  ;;  %v1508_v44 = vmul.bf16 %v1471_v55, %v5852_v30  ;;  %v1936_v41 = vrot.slane %v1934_v2, 4 }
  0x6d   : > { %v1897_v58 = vrot.slane %v1895_v51, 3  ;;  %v1900_v9 = vrot.slane %v1898_v6, 4  ;;  %v971_v62 = vpack.c.bf16 %v6811_v42, %v4296_v31  ;;  %v1565_v7 = vshll.u32 %v5914_v63, 16 }
  0x6e   : > { %v2216_v39 = vor.u32 %v2215_v13, %v2212_v52  ;;  %v5922_v27 = vrot.slane %v1508_v44, 1  ;;  %v1937_v15 = vor.u32 %v1936_v41, %v1933_v32  ;;  %v402_v47 = vadd.s32 96, %v5454_v8  ;;  %v5948_v44 = vld [vmem:[%s5528_s16 + $0x34] sm:$0xff]  }
  0x6f   : > { %v5925_v4 = vor.u32 %v1900_v9, %v1897_v58  ;;  %v1030_v25 = vshrl.u32 %v971_v62, 16  ;;  %v1033_v33 = vshll.u32 %v971_v62, 16  ;;  %v1567_v36 = vrot.slane %v1565_v7, 1 }
  0x70   : > { %v5928_v49 = vsel %vm1310_vm5, %v2189_v59, %v2216_v39  ;;  %v1706_v12 = vsel %vm1671_vm7, %v1703_v56, %v5922_v27  ;;  %v5934_v48 = vsel %vm1310_vm5, %v5845_v19, %v1937_v15  ;;  %v514_v18 = vand.u32 15, %v402_v47 }
  0x71   : > { %6842 = vst [vmem:[#allocation5_spill] sm:$0xff] %v5928_v49  ;;  %4952 = vmatprep.mubr.bf16.mxu1 %v5928_v49  ;;  %v5940_v37 = vsel %vm1310_vm5, %v5849_v11, %v5925_v4  ;;  %v2237_v26 = vshrl.u32 %v1706_v12, 16  ;;  %v2240_v2 = vshll.u32 %v1706_v12, 16  ;;  %v1032_v59 = vrot.slane %v1030_v25, 4 }
  0x72   : > { %2494 = vmatmul.mubr.bf16.gmra.mrb[12].mxu0 %v5940_v37  ;;  %v1035_v31 = vrot.slane %v1033_v33, 5  ;;  %v1568_v56 = vsel %vm1510_vm6, %v1563_v5, %v1567_v36  ;;  %vm870_vm9 = vcmp.ne.s32.totalorder %v514_v18, 0  ;;  %v1569_v19 = vshrl.u32 %v5914_v63, 16 }
  0x73   : > { %v2239_v51 = vrot.slane %v2237_v26, 3  ;;  %v2242_v6 = vrot.slane %v2240_v2, 4  ;;  %2501 = vmatprep.mubr.bf16.mxu0 %v5934_v48  ;;  %v1958_v55 = vshrl.u32 %v1568_v56, 16  ;;  %v1961_v32 = vshll.u32 %v1568_v56, 16 }
  0x74   : > { %v1036_v11 = vor.u32 %v1035_v31, %v1032_v59  ;;  %v4297_v52 = vsel %vm870_vm9, 1.0, %v6814_v34  ;;  %v1571_v13 = vor.u32 %v1569_v19, %v1567_v36  ;;  %v1573_v41 = vshll.u32 %v5948_v44, 16 }
  0x75   : > { %v5951_v58 = vor.u32 %v2242_v6, %v2239_v51  ;;  %v1960_v5 = vrot.slane %v1958_v55, 3  ;;  %v1963_v9 = vrot.slane %v1961_v32, 4  ;;  %v972_v62 = vpack.c.bf16 %v6811_v42, %v4297_v52 }
  0x76   : > { %v1037_v7 = vsel %vm984_vm10, %v5897_v21, %v1036_v11  ;;  %v1575_v47 = vrot.slane %v1573_v41, 1  ;;  %v404_v25 = vadd.s32 112, %v5454_v8  ;;  %v1577_v33 = vshrl.u32 %v5948_v44, 16 }
  0x77   : > { %6843 = vst [vmem:[#allocation6_spill] sm:$0xff] %v5951_v58  ;;  %v5960_v36 = vsel %vm1310_vm5, %v2216_v39, %v5951_v58  ;;  %v1170_v12 = vmul.bf16 %v5735_v1, %v1037_v7  ;;  %v1964_v18 = vor.u32 %v1963_v9, %v1960_v5  ;;  %v1039_v26 = vshrl.u32 %v972_v62, 16  ;;  %v5971_v5 = vld [vmem:[%s5528_s16 + $0x3c] sm:$0xff]  }
  0x78   : > { %6844 = vst [vmem:[#allocation7_spill] sm:$0xff] %v5960_v36  ;;  %4953 = vmatmul.mubr.bf16.gmra.mrb[12].mxu1 %v5960_v36  ;;  %v1042_v2 = vshll.u32 %v972_v62, 16  ;;  %v1576_v59 = vsel %vm1510_vm6, %v1571_v13, %v1575_v47  ;;  %v528_v21 = vand.u32 15, %v404_v25  ;;  %v1579_v31 = vor.u32 %v1577_v33, %v1575_v47 }
  0x79   : > { %3046 = vmatprep.mubr.bf16.mxu1 %v5662_v38  ;;  %v1922_v56 = vshrl.u32 %v1170_v12, 16  ;;  %v1925_v19 = vshll.u32 %v1170_v12, 16  ;;  %v5967_v51 = vsel %vm1310_vm5, %v1937_v15, %v1964_v18  ;;  %v1041_v39 = vrot.slane %v1039_v26, 4 }
  0x7a   : > { %v1044_v6 = vrot.slane %v1042_v2, 5  ;;  %v1985_v1 = vshrl.u32 %v1576_v59, 16  ;;  %v1988_v55 = vshll.u32 %v1576_v59, 16  ;;  %vm872_vm11 = vcmp.ne.s32.totalorder %v528_v21, 0  ;;  %v5313_v21 = vld [vmem:[%s6808_s1 + $0x148] sm:$0xff]  }
  0x7b   : > { %v1924_v32 = vrot.slane %v1922_v56, 3  ;;  %v1927_v52 = vrot.slane %v1925_v19, 4  ;;  %v4298_v41 = vsel %vm872_vm11, 1.0, %v6814_v34  ;;  %v1581_v13 = vshll.u32 %v5971_v5, 16 }
  0x7c   : > { %v1045_v9 = vor.u32 %v1044_v6, %v1041_v39  ;;  %v1987_v38 = vrot.slane %v1985_v1, 3  ;;  %v1990_v62 = vrot.slane %v1988_v55, 4  ;;  %v973_v7 = vpack.c.bf16 %v6811_v42, %v4298_v41 }
  0x7d   : > { %v1928_v15 = vor.u32 %v1927_v52, %v1924_v32  ;;  %v1583_v47 = vrot.slane %v1581_v13, 1  ;;  %v406_v25 = vadd.s32 128, %v5454_v8  ;;  %v1585_v33 = vshrl.u32 %v5971_v5, 16  ;;  %v5314_v13 = vld [vmem:[%s6808_s1 + $0x150] sm:$0xff]  }
  0x7e   : > { %v1046_v12 = vsel %vm984_vm10, %v1036_v11, %v1045_v9  ;;  %v1991_v26 = vor.u32 %v1990_v62, %v1987_v38  ;;  %v1048_v2 = vshrl.u32 %v973_v7, 16  ;;  %v1051_v59 = vshll.u32 %v973_v7, 16 }
  0x7f   : > { %v5983_v56 = vsel %vm1310_vm5, %v5925_v4, %v1928_v15  ;;  %v1171_v19 = vmul.bf16 %v5875_v28, %v1046_v12  ;;  %v1584_v39 = vsel %vm1510_vm6, %v1579_v31, %v1583_v47  ;;  %v542_v6 = vand.u32 15, %v406_v25  ;;  %v6002_v12 = vld [vmem:[%s5528_s16 + $0x44] sm:$0xff]  }
  0x80   : > { %2502 = vmatmul.mubr.bf16.gmra.mrb[16].mxu0 %v5983_v56  ;;  %3047 = vmatmul.mubr.bf16.vlgmr.msra.gmra.mrb[16].mxu1 %v5773_v3  ;;  %v5990_v11 = vsel %vm1310_vm5, %v1964_v18, %v1991_v26  ;;  %v1050_v1 = vrot.slane %v1048_v2, 4  ;;  %v1053_v55 = vrot.slane %v1051_v59, 5  ;;  %v2012_v32 = vshrl.u32 %v1584_v39, 16 }
  0x81   : > { %4957 = vmatpush3.bf16.msra.mxu1 %v5866_v16  ;;  %2509 = vmatprep.mubr.bf16.mxu0 %v5967_v51  ;;  %v1949_v4 = vshrl.u32 %v1171_v19, 16  ;;  %v1952_v28 = vshll.u32 %v1171_v19, 16  ;;  %v2015_v52 = vshll.u32 %v1584_v39, 16  ;;  %vm874_vm12 = vcmp.ne.s32.totalorder %v542_v6, 0 }
  0x82   : > { %3054 = vmatprep.mubr.bf16.mxu1 %v5748_v0  ;;  %v1054_v31 = vor.u32 %v1053_v55, %v1050_v1  ;;  %4958 = vmatprep.subr.bf16.mxu1 %v5313_v21  ;;  %v2014_v3 = vrot.slane %v2012_v32, 3  ;;  %v4299_v18 = vsel %vm874_vm12, 1.0, %v6814_v34  ;;  %v1587_v41 = vor.u32 %v1585_v33, %v1583_v47 }
  0x83   : > { %v1951_v16 = vrot.slane %v1949_v4, 3  ;;  %v1954_v38 = vrot.slane %v1952_v28, 4  ;;  %v2017_v62 = vrot.slane %v2015_v52, 4  ;;  %v974_v7 = vpack.c.bf16 %v6811_v42, %v4299_v18  ;;  %v6009_v4 = vld [vmem:[%s5528_s16 + $0x4c] sm:$0xff]  }
  0x84   : > { %v1055_v25 = vsel %vm984_vm10, %v1045_v9, %v1054_v31  ;;  %v1589_v2 = vshll.u32 %v6002_v12, 16  ;;  %v408_v59 = vadd.s32 144, %v5454_v8  ;;  %v1593_v47 = vshrl.u32 %v6002_v12, 16 }
  0x85   : > { %v1955_v33 = vor.u32 %v1954_v38, %v1951_v16  ;;  %v1172_v19 = vmul.bf16 %v5914_v63, %v1055_v25  ;;  %4959 = vmatpush3.bf16.msra.mxu1 %v5313_v21  ;;  %v2018_v39 = vor.u32 %v2017_v62, %v2014_v3  ;;  %v1057_v6 = vshrl.u32 %v974_v7, 16  ;;  %v5315_v63 = vld [vmem:[%s6808_s1 + $0x158] sm:$0xff]  }
  0x86   : > { %v1060_v1 = vshll.u32 %v974_v7, 16  ;;  %v1591_v55 = vrot.slane %v1589_v2, 1  ;;  %v556_v32 = vand.u32 15, %v408_v59  ;;  %4960 = vmatprep.subr.bf16.mxu1 %v5314_v13  ;;  %v1597_v9 = vshll.u32 %v6009_v4, 16 }
  0x87   : > { %v6013_v28 = vsel %vm1310_vm5, %v1928_v15, %v1955_v33  ;;  %v1976_v52 = vshrl.u32 %v1172_v19, 16  ;;  %v1979_v18 = vshll.u32 %v1172_v19, 16  ;;  %v6016_v16 = vsel %vm1310_vm5, %v1991_v26, %v2018_v39 }
  0x88   : > { %6845 = vst [vmem:[#allocation8_spill] sm:$0xff] %v6016_v16  ;;  %2510 = vmatmul.mubr.bf16.gmra.mrb[20].mxu0 %v6013_v28  ;;  %3055 = vmatmul.mubr.bf16.gmra.mrb[20].mxu1 %v5871_v23  ;;  %v1059_v21 = vrot.slane %v1057_v6, 4  ;;  %v1062_v3 = vrot.slane %v1060_v1, 5  ;;  %v1592_v38 = vsel %vm1510_vm6, %v1587_v41, %v1591_v55  ;;  %vm876_vm13 = vcmp.ne.s32.totalorder %v556_v32, 0  ;;  %v5316_v32 = vld [vmem:[%s6808_s1 + $0x160] sm:$0xff]  }
  0x89   : > { %2517 = vmatprep.mubr.bf16.mxu0 %v5990_v11  ;;  %3062 = vmatprep.mubr.bf16.mxu1 %v5861_v14  ;;  %v1978_v15 = vrot.slane %v1976_v52, 3  ;;  %v1981_v26 = vrot.slane %v1979_v18, 4  ;;  %v2039_v62 = vshrl.u32 %v1592_v38, 16  ;;  %v2042_v7 = vshll.u32 %v1592_v38, 16 }
  0x8a   : > { %v1063_v25 = vor.u32 %v1062_v3, %v1059_v21  ;;  %v4300_v2 = vsel %vm876_vm13, 1.0, %v6814_v34  ;;  %4961 = vmatpush3.bf16.msra.mxu1 %v5314_v13  ;;  %v1595_v59 = vor.u32 %v1593_v47, %v1591_v55  ;;  %v1599_v19 = vrot.slane %v1597_v9, 1 }
  0x8b   : > { %v1982_v42 = vor.u32 %v1981_v26, %v1978_v15  ;;  %v2041_v6 = vrot.slane %v2039_v62, 3  ;;  %v2044_v1 = vrot.slane %v2042_v7, 4  ;;  %v6846_v58 = vmov 1.0   ;;  %4962 = vmatprep.subr.bf16.mxu1 %v5315_v63 }
  0x8c   : > { %v975_v41 = vpack.c.bf16 %v6846_v58, %v4300_v2  ;;  %v1064_v52 = vsel %vm984_vm10, %v1054_v31, %v1063_v25  ;;  %v1600_v18 = vsel %vm1510_vm6, %v1595_v59, %v1599_v19  ;;  %v410_v21 = vadd.s32 160, %v5454_v8 }
  0x8d   : > { %v1601_v13 = vshrl.u32 %v6009_v4, 16  ;;  %v6036_v47 = vsel %vm1310_vm5, %v1955_v33, %v1982_v42  ;;  %v1173_v55 = vmul.bf16 %v5948_v44, %v1064_v52  ;;  %v2045_v9 = vor.u32 %v2044_v1, %v2041_v6  ;;  %v5317_v33 = vld [vmem:[%s6808_s1 + $0x168] sm:$0xff]  }
  0x8e   : > { %6847 = vst [vmem:[#allocation9_spill] sm:$0xff] %v6036_v47  ;;  %v1066_v3 = vshrl.u32 %v975_v41, 16  ;;  %v1069_v38 = vshll.u32 %v975_v41, 16  ;;  %v2066_v15 = vshrl.u32 %v1600_v18, 16  ;;  %v2069_v26 = vshll.u32 %v1600_v18, 16  ;;  %4963 = vmatpush3.bf16.msra.mxu1 %v5315_v63 }
  0x8f   : > { %v570_v62 = vand.u32 15, %v410_v21  ;;  %v2003_v7 = vshrl.u32 %v1173_v55, 16  ;;  %v2006_v31 = vshll.u32 %v1173_v55, 16  ;;  %v6040_v2 = vsel %vm1310_vm5, %v2018_v39, %v2045_v9  ;;  %4964 = vmatprep.subr.bf16.mxu1 %v5316_v32 }
  0x90   : > { %6848 = vst [vmem:[#allocation10_spill] sm:$0xff] %v6040_v2  ;;  %v1068_v59 = vrot.slane %v1066_v3, 4  ;;  %2518 = vmatmul.mubr.bf16.gmra.mrb[24].mxu0 %v6036_v47  ;;  %3063 = vmatmul.mubr.bf16.gmra.mrb[24].mxu1 %v5940_v37  ;;  %v1071_v44 = vrot.slane %v1069_v38, 5  ;;  %v2068_v6 = vrot.slane %v2066_v15, 3  ;;  %v2071_v1 = vrot.slane %v2069_v26, 4 }
  0x91   : > { %vm878_vm14 = vcmp.ne.s32.totalorder %v570_v62, 0  ;;  %2525 = vmatprep.mubr.bf16.mxu0 %v6016_v16  ;;  %3070 = vmatprep.mubr.bf16.mxu1 %v5934_v48  ;;  %v2005_v39 = vrot.slane %v2003_v7, 3  ;;  %v2008_v63 = vrot.slane %v2006_v31, 4  ;;  %v1603_v52 = vor.u32 %v1601_v13, %v1599_v19  ;;  %v5320_v7 = vld [vmem:[%s6808_s1 + $0x170] sm:$0xff]  }
  0x92   : > { %v4301_v41 = vsel %vm878_vm14, 1.0, %v6814_v34  ;;  %v1072_v18 = vor.u32 %v1071_v44, %v1068_v59  ;;  %v2072_v21 = vor.u32 %v2071_v1, %v2068_v6  ;;  %v1605_v3 = vshll.u32 %v5674_v43, 16  ;;  %4965 = vmatpush3.bf16.msra.mxu1 %v5316_v32 }
  0x93   : > { %v976_v55 = vpack.c.bf16 %v6846_v58, %v4301_v41  ;;  %v2009_v38 = vor.u32 %v2008_v63, %v2005_v39  ;;  %v412_v15 = vadd.s32 176, %v5454_v8  ;;  %v1609_v26 = vshrl.u32 %v5674_v43, 16  ;;  %4966 = vmatprep.subr.bf16.mxu1 %v5317_v33 }
  0x94   : > { %v1613_v62 = vshll.u32 %v5715_v35, 16  ;;  %v1073_v19 = vsel %vm984_vm10, %v1063_v25, %v1072_v18  ;;  %v6060_v13 = vsel %vm1310_vm5, %v2045_v9, %v2072_v21  ;;  %v1607_v43 = vrot.slane %v1605_v3, 1 }
  0x95   : > { %6849 = vst [vmem:[#allocation11_spill] sm:$0xff] %v6060_v13  ;;  %v1075_v31 = vshrl.u32 %v976_v55, 16  ;;  %v1078_v59 = vshll.u32 %v976_v55, 16  ;;  %v6063_v32 = vsel %vm1310_vm5, %v1982_v42, %v2009_v38  ;;  %v1174_v44 = vmul.bf16 %v5971_v5, %v1073_v19  ;;  %v5329_v42 = vld [vmem:[%s6808_s1 + $0x178] sm:$0xff]  }
  0x96   : > { %6850 = vst [vmem:[#allocation12_spill] sm:$0xff] %v6063_v32  ;;  %v584_v6 = vand.u32 15, %v412_v15  ;;  %v1615_v63 = vrot.slane %v1613_v62, 1  ;;  %v414_v41 = vadd.s32 192, %v5454_v8  ;;  %4967 = vmatpush3.bf16.msra.mxu1 %v5317_v33  ;;  %v1608_v9 = vsel %vm1510_vm6, %v1603_v52, %v1607_v43 }
  0x97   : > { %v1077_v1 = vrot.slane %v1075_v31, 4  ;;  %v1080_v39 = vrot.slane %v1078_v59, 5  ;;  %v2030_v34 = vshrl.u32 %v1174_v44, 16  ;;  %v2033_v25 = vshll.u32 %v1174_v44, 16  ;;  %4968 = vmatprep.subr.bf16.mxu1 %v5320_v7 }
  0x98   : > { %vm880_vm15 = vcmp.ne.s32.totalorder %v584_v6, 0  ;;  %2526 = vmatmul.mubr.bf16.gmra.mrb[28].mxu0 %v6063_v32  ;;  %3071 = vmatmul.mubr.bf16.gmra.mrb[28].mxu1 %v5983_v56  ;;  %v2093_v55 = vshrl.u32 %v1608_v9, 16  ;;  %v2096_v3 = vshll.u32 %v1608_v9, 16  ;;  %v6851_v15 = vmov 0.0  }
  0x99   : > { %v1081_v5 = vor.u32 %v1080_v39, %v1077_v1  ;;  %v4302_v62 = vsel %vm880_vm15, 1.0, %v6851_v15  ;;  %2533 = vmatprep.mubr.bf16.mxu0 %v6040_v2  ;;  %3078 = vmatprep.mubr.bf16.mxu1 %v5967_v51  ;;  %v2032_v33 = vrot.slane %v2030_v34, 3  ;;  %v2035_v52 = vrot.slane %v2033_v25, 4  ;;  %v6082_v34 = vld [vmem:[%s6808_s1 + $0x200] sm:$0xff]  }
  0x9a   : > { %v977_v19 = vpack.c.bf16 %v6846_v58, %v4302_v62  ;;  %v1611_v31 = vor.u32 %v1609_v26, %v1607_v43  ;;  %v2095_v44 = vrot.slane %v2093_v55, 3  ;;  %v2098_v6 = vrot.slane %v2096_v3, 4  ;;  %4969 = vmatpush3.bf16.msra.mxu1 %v5320_v7 }
  0x9b   : > { %v1082_v59 = vsel %vm984_vm10, %v1072_v18, %v1081_v5  ;;  %v598_v36 = vand.u32 15, %v414_v41  ;;  %v2036_v1 = vor.u32 %v2035_v52, %v2032_v33  ;;  %4970 = vmatprep.subr.bf16.mxu1 %v5329_v42  ;;  %v1617_v18 = vshrl.u32 %v5715_v35, 16 }
  0x9c   : > { %v1175_v39 = vmul.bf16 %v6002_v12, %v1082_v59  ;;  %v1084_v9 = vshrl.u32 %v977_v19, 16  ;;  %v1087_v49 = vshll.u32 %v977_v19, 16  ;;  %v2099_v25 = vor.u32 %v2098_v6, %v2095_v44 }
  0x9d   : > { %v1616_v26 = vsel %vm1510_vm6, %v1611_v31, %v1615_v63  ;;  %vm882_vm1 = vcmp.ne.s32.totalorder %v598_v36, 0  ;;  %v6087_v43 = vsel %vm1310_vm5, %v2009_v38, %v2036_v1  ;;  %v1619_v36 = vor.u32 %v1617_v18, %v1615_v63 }
  0x9e   : > { %6852 = vst [vmem:[#allocation13_spill] sm:$0xff] %v6087_v43  ;;  %v2057_v7 = vshrl.u32 %v1175_v39, 16  ;;  %v2060_v41 = vshll.u32 %v1175_v39, 16  ;;  %v1086_v12 = vrot.slane %v1084_v9, 4  ;;  %v6090_v55 = vsel %vm1310_vm5, %v2072_v21, %v2099_v25  ;;  %4971 = vmatpush3.bf16.msra.mxu1 %v5329_v42 }
  0x9f   : > { %6853 = vst [vmem:[#allocation14_spill] sm:$0xff] %v6090_v55  ;;  %v1089_v3 = vrot.slane %v1087_v49, 5  ;;  %v2120_v62 = vshrl.u32 %v1616_v26, 16  ;;  %v2123_v33 = vshll.u32 %v1616_v26, 16  ;;  %v4303_v31 = vsel %vm882_vm1, 1.0, %v6851_v15  ;;  %5004 = vmatprep.subr.bf16.mxu1 %v6082_v34 }
  0xa0   : > { %v2059_v52 = vrot.slane %v2057_v7, 3  ;;  %v2062_v19 = vrot.slane %v2060_v41, 4  ;;  %2534 = vmatmul.mubr.bf16.gmra.mrb[32].mxu0 %v6087_v43  ;;  %3079 = vmatmul.mubr.bf16.gmra.mrb[32].mxu1 %v6013_v28  ;;  %v978_v21 = vpack.c.bf16 %v6846_v58, %v4303_v31  ;;  %v1621_v42 = vshll.u32 %v5751_v17, 16 }
  0xa1   : > { %v1090_v35 = vor.u32 %v1089_v3, %v1086_v12  ;;  %v2122_v38 = vrot.slane %v2120_v62, 3  ;;  %v2125_v59 = vrot.slane %v2123_v33, 4  ;;  %2541 = vmatprep.mubr.bf16.mxu0 %v6060_v13  ;;  %3086 = vmatprep.mubr.bf16.mxu1 %v5990_v11  ;;  %v416_v63 = vadd.s32 208, %v5454_v8 }
  0xa2   : > { %v2063_v49 = vor.u32 %v2062_v19, %v2059_v52  ;;  %v1625_v44 = vshrl.u32 %v5751_v17, 16  ;;  %v1093_v9 = vshrl.u32 %v978_v21, 16  ;;  %v1096_v26 = vshll.u32 %v978_v21, 16 }
  0xa3   : > { %v1091_v6 = vsel %vm984_vm10, %v1081_v5, %v1090_v35  ;;  %v2126_v39 = vor.u32 %v2125_v59, %v2122_v38  ;;  %v1623_v41 = vrot.slane %v1621_v42, 1  ;;  %v612_v12 = vand.u32 15, %v416_v63 }
  0xa4   : > { %v6104_v18 = vsel %vm1310_vm5, %v2036_v1, %v2063_v49  ;;  %v1176_v7 = vmul.bf16 %v6009_v4, %v1091_v6  ;;  %v1095_v62 = vrot.slane %v1093_v9, 4  ;;  %v1098_v33 = vrot.slane %v1096_v26, 5 }
  0xa5   : > { %6854 = vst [vmem:[#allocation15_spill] sm:$0xff] %v6104_v18  ;;  %v6108_v3 = vsel %vm1310_vm5, %v2099_v25, %v2126_v39  ;;  %v1629_v52 = vshll.u32 %v5815_v24, 16  ;;  %v1624_v5 = vsel %vm1510_vm6, %v1619_v36, %v1623_v41  ;;  %vm884_vm2 = vcmp.ne.s32.totalorder %v612_v12, 0 }
  0xa6   : > { %6855 = vst [vmem:[#allocation16_spill] sm:$0xff] %v6108_v3  ;;  %v2084_v17 = vshrl.u32 %v1176_v7, 16  ;;  %v2087_v19 = vshll.u32 %v1176_v7, 16  ;;  %v1099_v31 = vor.u32 %v1098_v33, %v1095_v62  ;;  %v2147_v38 = vshrl.u32 %v1624_v5, 16  ;;  %v5348_v7 = vld [vmem:[%s5528_s16 + $0x54] sm:$0xff]  }
  0xa7   : > { %v2150_v1 = vshll.u32 %v1624_v5, 16  ;;  %v4304_v4 = vsel %vm884_vm2, 1.0, %v6851_v15  ;;  %v1627_v42 = vor.u32 %v1625_v44, %v1623_v41  ;;  %v1631_v9 = vrot.slane %v1629_v52, 1 }
  0xa8   : > { %v2086_v59 = vrot.slane %v2084_v17, 3  ;;  %v2089_v21 = vrot.slane %v2087_v19, 4  ;;  %v979_v25 = vpack.c.bf16 %v6846_v58, %v4304_v4  ;;  %2542 = vmatmul.mubr.bf16.gmra.mrb[36].mxu0 %v6104_v18  ;;  %3087 = vmatmul.mubr.bf16.gmra.mrb[36].mxu1 %v6036_v47  ;;  %v1100_v63 = vsel %vm984_vm10, %v1090_v35, %v1099_v31 }
  0xa9   : > { %v2149_v6 = vrot.slane %v2147_v38, 3  ;;  %v2152_v36 = vrot.slane %v2150_v1, 4  ;;  %2549 = vmatprep.mubr.bf16.mxu0 %v6090_v55  ;;  %3094 = vmatprep.mubr.bf16.mxu1 %v6016_v16  ;;  %v1177_v12 = vmul.bf16 %v5348_v7, %v1100_v63  ;;  %v1632_v44 = vsel %vm1510_vm6, %v1627_v42, %v1631_v9 }
  0xaa   : > { %v2090_v26 = vor.u32 %v2089_v21, %v2086_v59  ;;  %v1102_v62 = vshrl.u32 %v979_v25, 16  ;;  %v1105_v33 = vshll.u32 %v979_v25, 16  ;;  %v418_v41 = vadd.s32 224, %v5454_v8 }
  0xab   : > { %v2153_v17 = vor.u32 %v2152_v36, %v2149_v6  ;;  %v1633_v19 = vshrl.u32 %v5815_v24, 16  ;;  %v2111_v52 = vshrl.u32 %v1177_v12, 16  ;;  %v2114_v5 = vshll.u32 %v1177_v12, 16 }
  0xac   : > { %v6124_v35 = vsel %vm1310_vm5, %v2063_v49, %v2090_v26  ;;  %v1104_v38 = vrot.slane %v1102_v62, 4  ;;  %v1107_v4 = vrot.slane %v1105_v33, 5  ;;  %v2174_v59 = vshrl.u32 %v1632_v44, 16 }
  0xad   : > { %6856 = vst [vmem:[#allocation17_spill] sm:$0xff] %v6124_v35  ;;  %v6127_v1 = vsel %vm1310_vm5, %v2126_v39, %v2153_v17  ;;  %v2177_v21 = vshll.u32 %v1632_v44, 16  ;;  %v2113_v25 = vrot.slane %v2111_v52, 3  ;;  %v2116_v63 = vrot.slane %v2114_v5, 4 }
  0xae   : > { %6857 = vst [vmem:[#allocation18_spill] sm:$0xff] %v6127_v1  ;;  %v626_v6 = vand.u32 15, %v418_v41  ;;  %v1635_v42 = vor.u32 %v1633_v19, %v1631_v9  ;;  %v1108_v36 = vor.u32 %v1107_v4, %v1104_v38  ;;  %v2176_v7 = vrot.slane %v2174_v59, 3  ;;  %v5349_v19 = vld [vmem:[%s5528_s16 + $0x5c] sm:$0xff]  }
  0xaf   : > { %v2179_v24 = vrot.slane %v2177_v21, 4  ;;  %v1637_v49 = vshll.u32 %v5887_v53, 16  ;;  %v2117_v29 = vor.u32 %v2116_v63, %v2113_v25  ;;  %v420_v12 = vadd.s32 240, %v5454_v8 }
  0xb0   : > { %vm886_vm3 = vcmp.ne.s32.totalorder %v626_v6, 0  ;;  %v1641_v39 = vshrl.u32 %v5887_v53, 16  ;;  %2550 = vmatmul.mubr.bf16.gmra.mrb[40].mxu0 %v6124_v35  ;;  %3095 = vmatmul.mubr.bf16.gmra.mrb[40].mxu1 %v6063_v32  ;;  %v1109_v62 = vsel %vm984_vm10, %v1099_v31, %v1108_v36  ;;  %v1644_v59 = vshll.u32 %v5852_v30, 16 }
  0xb1   : > { %v2180_v33 = vor.u32 %v2179_v24, %v2176_v7  ;;  %v4305_v9 = vsel %vm886_vm3, 1.0, %v6851_v15  ;;  %v1639_v44 = vrot.slane %v1637_v49, 1  ;;  %2557 = vmatprep.mubr.bf16.mxu0 %v6108_v3  ;;  %3102 = vmatprep.mubr.bf16.mxu1 %v6040_v2  ;;  %v6139_v41 = vsel %vm1310_vm5, %v2090_v26, %v2117_v29 }
  0xb2   : > { %6858 = vst [vmem:[#allocation19_spill] sm:$0xff] %v6139_v41  ;;  %v1178_v52 = vmul.bf16 %v5349_v19, %v1109_v62  ;;  %v980_v53 = vpack.c.bf16 %v6846_v58, %v4305_v9  ;;  %v640_v5 = vand.u32 15, %v420_v12  ;;  %v6148_v24 = vrot.slane %v1644_v59, 1 }
  0xb3   : > { %v6144_v38 = vsel %vm1310_vm5, %v2153_v17, %v2180_v33  ;;  %v1640_v31 = vsel %vm1510_vm6, %v1635_v42, %v1639_v44  ;;  %v1643_v4 = vor.u32 %v1641_v39, %v1639_v44 }
  0xb4   : > { %v2138_v21 = vshrl.u32 %v1178_v52, 16  ;;  %v2141_v25 = vshll.u32 %v1178_v52, 16  ;;  %v1111_v63 = vshrl.u32 %v980_v53, 16  ;;  %v1114_v6 = vshll.u32 %v980_v53, 16 }
  0xb5   : > { %v2201_v7 = vshrl.u32 %v1640_v31, 16  ;;  %v2204_v26 = vshll.u32 %v1640_v31, 16  ;;  %vm888_vm4 = vcmp.ne.s32.totalorder %v640_v5, 0  ;;  %v1647_v39 = vsel %vm1510_vm6, %v1643_v4, %v6148_v24 }
  0xb6   : > { %v2140_v49 = vrot.slane %v2138_v21, 3  ;;  %v2143_v62 = vrot.slane %v2141_v25, 4  ;;  %v1113_v12 = vrot.slane %v1111_v63, 4  ;;  %v1116_v9 = vrot.slane %v1114_v6, 5 }
  0xb7   : > { %v2203_v17 = vrot.slane %v2201_v7, 3  ;;  %v2206_v19 = vrot.slane %v2204_v26, 4  ;;  %v4306_v42 = vsel %vm888_vm4, 1.0, %v6851_v15  ;;  %v2228_v31 = vshrl.u32 %v1647_v39, 16  ;;  %v5350_v26 = vld [vmem:[%s5528_s16 + $0x64] sm:$0xff]  }
  0xb8   : > { %v2144_v44 = vor.u32 %v2143_v62, %v2140_v49  ;;  %v1117_v52 = vor.u32 %v1116_v9, %v1113_v12  ;;  %v981_v53 = vpack.c.bf16 %v6846_v58, %v4306_v42  ;;  %2558 = vmatmul.mubr.bf16.gmra.mrb[44].mxu0 %v6139_v41  ;;  %3103 = vmatmul.mubr.bf16.gmra.mrb[44].mxu1 %v6087_v43  ;;  %v2231_v59 = vshll.u32 %v1647_v39, 16 }
  0xb9   : > { %v2207_v5 = vor.u32 %v2206_v19, %v2203_v17  ;;  %v422_v21 = vadd.s32 256, %v5454_v8  ;;  %v391_v25 = vadd.s32 8, %v5454_v8  ;;  %2565 = vmatprep.mubr.bf16.mxu0 %v6127_v1  ;;  %3110 = vmatprep.mubr.bf16.mxu1 %v6060_v13  ;;  %v2230_v12 = vrot.slane %v2228_v31, 3 }
  0xba   : > { %v6161_v4 = vsel %vm1310_vm5, %v2117_v29, %v2144_v44  ;;  %v1118_v63 = vsel %vm984_vm10, %v1108_v36, %v1117_v52  ;;  %v1120_v6 = vshrl.u32 %v981_v53, 16  ;;  %v1123_v7 = vshll.u32 %v981_v53, 16 }
  0xbb   : > { %v1179_v49 = vmul.bf16 %v5350_v26, %v1118_v63  ;;  %v6166_v62 = vsel %vm1310_vm5, %v2180_v33, %v2207_v5  ;;  %v2233_v9 = vrot.slane %v2231_v59, 4  ;;  %v654_v42 = vand.u32 15, %v422_v21 }
  0xbc   : > { %v1122_v17 = vrot.slane %v1120_v6, 4  ;;  %v1125_v19 = vrot.slane %v1123_v7, 5  ;;  %v393_v39 = vadd.s32 24, %v5454_v8  ;;  %v395_v36 = vadd.s32 40, %v5454_v8 }
  0xbd   : > { %v2165_v13 = vshrl.u32 %v1179_v49, 16  ;;  %v2168_v43 = vshll.u32 %v1179_v49, 16  ;;  %v6169_v29 = vor.u32 %v2233_v9, %v2230_v12  ;;  %vm890_vm0 = vcmp.ne.s32.totalorder %v654_v42, 0  ;;  %v5351_v49 = vld [vmem:[%s5528_s16 + $0x6c] sm:$0xff]  }
  0xbe   : > { %v1126_v53 = vor.u32 %v1125_v19, %v1122_v17  ;;  %v437_v63 = vand.u32 15, %v391_v25  ;;  %v451_v26 = vand.u32 15, %v393_v39  ;;  %v4307_v59 = vsel %vm890_vm0, 1.0, %v6851_v15 }
  0xbf   : > { %v2167_v33 = vrot.slane %v2165_v13, 3  ;;  %v2170_v2 = vrot.slane %v2168_v43, 4  ;;  %v6174_v31 = vsel %vm1310_vm5, %v2207_v5, %v6169_v29  ;;  %v982_v6 = vpack.c.bf16 %v6846_v58, %v4307_v59 }
  0xc0   : > { %v1127_v21 = vsel %vm984_vm10, %v1117_v52, %v1126_v53  ;;  %v465_v7 = vand.u32 15, %v395_v36  ;;  %vm1185_vm8 = vcmp.ne.s32.totalorder %v437_v63, 15  ;;  %2566 = vmatmul.mubr.bf16.gmra.mrb[48].mxu0 %v6161_v4  ;;  %3111 = vmatmul.mubr.bf16.gmra.mrb[48].mxu1 %v6104_v18  ;;  %vm1187_vm9 = vcmp.ne.s32.totalorder %v451_v26, 15 }
  0xc1   : > { %v2171_v25 = vor.u32 %v2170_v2, %v2167_v33  ;;  %v1180_v13 = vmul.bf16 %v5351_v49, %v1127_v21  ;;  %v4309_v43 = vsel %vm1185_vm8, 1.0, %v6851_v15  ;;  %2573 = vmatprep.mubr.bf16.mxu0 %v6144_v38  ;;  %3118 = vmatprep.mubr.bf16.mxu1 %v6090_v55  ;;  %v1129_v5 = vshrl.u32 %v982_v6, 16 }
  0xc2   : > { %v1132_v52 = vshll.u32 %v982_v6, 16  ;;  %vm1189_vm11 = vcmp.ne.s32.totalorder %v465_v7, 15  ;;  %v4310_v12 = vsel %vm1187_vm9, 1.0, %v6851_v15  ;;  %v1292_v36 = vpack.c.bf16 %v4309_v43, %v6846_v58 }
  0xc3   : > { %v6187_v9 = vsel %vm1310_vm5, %v2144_v44, %v2171_v25  ;;  %v2192_v17 = vshrl.u32 %v1180_v13, 16  ;;  %v2195_v19 = vshll.u32 %v1180_v13, 16  ;;  %v4311_v2 = vsel %vm1189_vm11, 1.0, %v6851_v15 }
  0xc4   : > { %v1131_v42 = vrot.slane %v1129_v5, 4  ;;  %v1134_v39 = vrot.slane %v1132_v52, 5  ;;  %v1293_v63 = vpack.c.bf16 %v4310_v12, %v6846_v58  ;;  %v1294_v59 = vpack.c.bf16 %v4311_v2, %v6846_v58 }
  0xc5   : > { %v2194_v26 = vrot.slane %v2192_v17, 3  ;;  %v2197_v33 = vrot.slane %v2195_v19, 4  ;;  %v397_v21 = vadd.s32 56, %v5454_v8  ;;  %v1312_v44 = vshrl.u32 %v1292_v36, 16 }
  0xc6   : > { %v6194_v6 = vor.u32 %v1134_v39, %v1131_v42  ;;  %v1315_v7 = vshll.u32 %v1292_v36, 16  ;;  %v1320_v49 = vshrl.u32 %v1293_v63, 16  ;;  %v1323_v55 = vshll.u32 %v1293_v63, 16  ;;  %v5352_v42 = vld [vmem:[%s5528_s16 + $0x74] sm:$0xff]  }
  0xc7   : > { %v2198_v13 = vor.u32 %v2197_v33, %v2194_v26  ;;  %v1329_v5 = vshrl.u32 %v1294_v59, 16  ;;  %v1332_v52 = vshll.u32 %v1294_v59, 16  ;;  %v1314_v12 = vrot.slane %v1312_v44, 3 }
  0xc8   : > { %v1136_v43 = vsel %vm984_vm10, %v1126_v53, %v6194_v6  ;;  %v1317_v17 = vrot.slane %v1315_v7, 4  ;;  %v1322_v19 = vrot.slane %v1320_v49, 3  ;;  %2574 = vmatmul.mubr.bf16.gmra.mrb[52].mxu0 %v6187_v9  ;;  %3119 = vmatmul.mubr.bf16.gmra.mrb[52].mxu1 %v6124_v35  ;;  %v1325_v36 = vrot.slane %v1323_v55, 4 }
  0xc9   : > { %v6201_v2 = vsel %vm1310_vm5, %v2171_v25, %v2198_v13  ;;  %v1181_v39 = vmul.bf16 %v5352_v42, %v1136_v43  ;;  %v1331_v26 = vrot.slane %v1329_v5, 3  ;;  %2581 = vmatprep.mubr.bf16.mxu0 %v6166_v62  ;;  %3126 = vmatprep.mubr.bf16.mxu1 %v6108_v3  ;;  %v1334_v53 = vrot.slane %v1332_v52, 4 }
  0xca   : > { %v1318_v63 = vor.u32 %v1317_v17, %v1314_v12  ;;  %v479_v33 = vand.u32 15, %v397_v21  ;;  %v399_v59 = vadd.s32 72, %v5454_v8  ;;  %v1326_v49 = vor.u32 %v1325_v36, %v1322_v19  ;;  %v5353_v36 = vld [vmem:[%s5528_s16 + $0x4] sm:$0xff]  }
  0xcb   : > { %v2219_v44 = vshrl.u32 %v1181_v39, 16  ;;  %v2222_v7 = vshll.u32 %v1181_v39, 16  ;;  %v401_v25 = vadd.s32 88, %v5454_v8  ;;  %v1335_v35 = vor.u32 %v1334_v53, %v1331_v26 }
  0xcc   : > { %v1491_v18 = vmul.bf16 0, %v1318_v63  ;;  %vm1191_vm12 = vcmp.ne.s32.totalorder %v479_v33, 15  ;;  %v493_v55 = vand.u32 15, %v399_v59  ;;  %v1327_v42 = vsel %vm1310_vm5, %v1318_v63, %v1326_v49 }
  0xcd   : > { %v2221_v5 = vrot.slane %v2219_v44, 3  ;;  %v2224_v43 = vrot.slane %v2222_v7, 4  ;;  %v4312_v12 = vsel %vm1191_vm12, 1.0, %v6851_v15  ;;  %v1336_v21 = vsel %vm1310_vm5, %v1326_v49, %v1335_v35 }
  0xce   : > { %v1492_v52 = vmul.bf16 %v1327_v42, %v5557_v46  ;;  %v1672_v17 = vrot.slane %v1491_v18, 1  ;;  %v1295_v39 = vpack.c.bf16 %v4312_v12, %v6846_v58  ;;  %v1493_v26 = vmul.bf16 %v5353_v36, %v1336_v21 }
  0xcf   : > { %v6213_v19 = vor.u32 %v2224_v43, %v2221_v5  ;;  %vm1193_vm13 = vcmp.ne.s32.totalorder %v493_v55, 15  ;;  %v507_v53 = vand.u32 15, %v401_v25 }
  0xd0   : > { %v1673_v33 = vrot.slane %v1492_v52, 1  ;;  %v1338_v59 = vshrl.u32 %v1295_v39, 16  ;;  %v1341_v44 = vshll.u32 %v1295_v39, 16  ;;  %v4313_v63 = vsel %vm1193_vm13, 1.0, %v6851_v15  ;;  %2582 = vmatmul.mubr.bf16.gmra.mrb[56].mxu0 %v6201_v2  ;;  %3127 = vmatmul.mubr.bf16.gmra.mrb[56].mxu1 %v6139_v41 }
  0xd1   : > { %v6221_v46 = vsel %vm1310_vm5, %v2198_v13, %v6213_v19  ;;  %v1675_v18 = vrot.slane %v1493_v26, 1  ;;  %v1296_v7 = vpack.c.bf16 %v4313_v63, %v6846_v58  ;;  %vm1195_vm14 = vcmp.ne.s32.totalorder %v507_v53, 15  ;;  %2589 = vmatprep.mubr.bf16.mxu0 %v6174_v31  ;;  %3134 = vmatprep.mubr.bf16.mxu1 %v6127_v1 }
  0xd2   : > { %v1674_v49 = vsel %vm1671_vm7, %v1672_v17, %v1673_v33  ;;  %v1340_v25 = vrot.slane %v1338_v59, 3  ;;  %v1343_v55 = vrot.slane %v1341_v44, 4  ;;  %v4314_v5 = vsel %vm1195_vm14, 1.0, %v6851_v15 }
  0xd3   : > { %v1676_v43 = vsel %vm1671_vm7, %v1673_v33, %v1675_v18  ;;  %v1824_v42 = vshrl.u32 %v1674_v49, 16  ;;  %v1827_v13 = vshll.u32 %v1674_v49, 16  ;;  %v1347_v12 = vshrl.u32 %v1296_v7, 16  ;;  %v5354_v33 = vld [vmem:[%s5528_s16 + $0xc] sm:$0xff]  }
  0xd4   : > { %v1832_v21 = vshrl.u32 %v1676_v43, 16  ;;  %v1835_v52 = vshll.u32 %v1676_v43, 16  ;;  %v1344_v39 = vor.u32 %v1343_v55, %v1340_v25  ;;  %v1350_v36 = vshll.u32 %v1296_v7, 16 }
  0xd5   : > { %v1826_v26 = vrot.slane %v1824_v42, 3  ;;  %v1829_v53 = vrot.slane %v1827_v13, 4  ;;  %v1349_v63 = vrot.slane %v1347_v12, 3  ;;  %v1297_v1 = vpack.c.bf16 %v4314_v5, %v6846_v58 }
  0xd6   : > { %v1834_v17 = vrot.slane %v1832_v21, 3  ;;  %v1837_v59 = vrot.slane %v1835_v52, 4  ;;  %v1345_v44 = vsel %vm1310_vm5, %v1335_v35, %v1344_v39  ;;  %v1352_v41 = vrot.slane %v1350_v36, 4  ;;  %v5355_v21 = vld [vmem:[%s5528_s16 + $0x14] sm:$0xff]  }
  0xd7   : > { %v1830_v3 = vor.u32 %v1829_v53, %v1826_v26  ;;  %v1494_v32 = vmul.bf16 %v5354_v33, %v1345_v44  ;;  %v1356_v61 = vshrl.u32 %v1297_v1, 16  ;;  %v1359_v49 = vshll.u32 %v1297_v1, 16 }
  0xd8   : > { %v1838_v16 = vor.u32 %v1837_v59, %v1834_v17  ;;  %v1353_v47 = vor.u32 %v1352_v41, %v1349_v63  ;;  %v403_v7 = vadd.s32 104, %v5454_v8  ;;  %v1648_v25 = vshrl.u32 %v5852_v30, 16  ;;  %2590 = vmatmul.mubr.bf16.gmra.mrb[60].mxu0 %v6221_v46  ;;  %3135 = vmatmul.mubr.bf16.gmra.mrb[60].mxu1 %v6161_v4  ;;  %v5356_v59 = vld [vmem:[%s5528_s16 + $0x1c] sm:$0xff]  }
  0xd9   : > { %v1677_v55 = vrot.slane %v1494_v32, 1  ;;  %v1358_v5 = vrot.slane %v1356_v61, 3  ;;  %v1361_v35 = vrot.slane %v1359_v49, 4  ;;  %v424_v43 = vadd.s32 272, %v5454_v8  ;;  %3142 = vmatprep.mubr.bf16.mxu1 %v6144_v38 }
  0xda   : > { %v1839_v42 = vsel %vm1310_vm5, %v1830_v3, %v1838_v16  ;;  %v1354_v1 = vsel %vm1310_vm5, %v1344_v39, %v1353_v47  ;;  %v521_v41 = vand.u32 15, %v403_v7  ;;  %v1650_v13 = vor.u32 %v1648_v25, %v6148_v24 }
  0xdb   : > { %4924 = vmatprep.mubr.bf16.mxu0 %v1839_v42  ;;  %v1678_v12 = vsel %vm1671_vm7, %v1675_v18, %v1677_v55  ;;  %v1495_v52 = vmul.bf16 %v5355_v21, %v1354_v1  ;;  %v1362_v32 = vor.u32 %v1361_v35, %v1358_v5  ;;  %v668_v61 = vand.u32 15, %v424_v43  ;;  %v5319_v5 = vld [vmem:[%s6808_s1 + $0x180] sm:$0xff]   ;;  %v5321_v42 = vld [vmem:[%s6808_s1 + $0x1c8] sm:$0xff]  }
  0xdc   : > { %v1859_v36 = vshrl.u32 %v1678_v12, 16  ;;  %v1862_v26 = vshll.u32 %v1678_v12, 16  ;;  %vm1197_vm15 = vcmp.ne.s32.totalorder %v521_v41, 15  ;;  %v1651_v8 = vsel %vm1510_vm6, %v1650_v13, %v5491_v20 }
  0xdd   : > { %v1679_v3 = vrot.slane %v1495_v52, 1  ;;  %v1363_v39 = vsel %vm1310_vm5, %v1353_v47, %v1362_v32  ;;  %v4315_v53 = vsel %vm1197_vm15, 1.0, %v6851_v15  ;;  %v2850_v24 = vshrl.u32 %v1651_v8, 16 }
  0xde   : > { %v1861_v63 = vrot.slane %v1859_v36, 3  ;;  %v1864_v17 = vrot.slane %v1862_v26, 4  ;;  %v1496_v18 = vmul.bf16 %v5356_v59, %v1363_v39  ;;  %v1298_v44 = vpack.c.bf16 %v4315_v53, %v6846_v58 }
  0xdf   : > { %v1680_v33 = vsel %vm1671_vm7, %v1677_v55, %v1679_v3  ;;  %v2852_v49 = vrot.slane %v2850_v24, 3  ;;  %v2853_v7 = vshll.u32 %v1651_v8, 16  ;;  %vm892_vm1 = vcmp.ne.s32.totalorder %v668_v61, 0 }
  0xe0   : > { %v1865_v25 = vor.u32 %v1864_v17, %v1861_v63  ;;  %v1886_v47 = vshrl.u32 %v1680_v33, 16  ;;  %v1889_v35 = vshll.u32 %v1680_v33, 16  ;;  %v1681_v43 = vrot.slane %v1496_v18, 1  ;;  %3143 = vmatmul.mubr.bf16.gmra.mrb[64].mxu1 %v6187_v9 }
  0xe1   : > { %v1365_v1 = vshrl.u32 %v1298_v44, 16  ;;  %v1368_v41 = vshll.u32 %v1298_v44, 16  ;;  %v2855_v55 = vrot.slane %v2853_v7, 4  ;;  %v4308_v13 = vsel %vm892_vm1, 1.0, %v6851_v15  ;;  %3150 = vmatprep.mubr.bf16.mxu1 %v6166_v62  ;;  %v5322_v15 = vld [vmem:[%s6808_s1 + $0x188] sm:$0xff]  }
  0xe2   : > { %v6259_v12 = vsel %vm1310_vm5, %v1838_v16, %v1865_v25  ;;  %v1888_v21 = vrot.slane %v1886_v47, 3  ;;  %v1891_v52 = vrot.slane %v1889_v35, 4  ;;  %v1682_v61 = vsel %vm1671_vm7, %v1679_v3, %v1681_v43  ;;  %v5323_v3 = vld [vmem:[%s6808_s1 + $0x1d0] sm:$0xff]   ;;  %v5357_v35 = vld [vmem:[%s5528_s16 + $0x24] sm:$0xff]  }
  0xe3   : > { %4925 = vmatmul.mubr.bf16.vlgmr.msra.gmra.mrb[64].mxu0 %v6259_v12  ;;  %v1913_v36 = vshrl.u32 %v1682_v61, 16  ;;  %v1916_v26 = vshll.u32 %v1682_v61, 16  ;;  %v1367_v8 = vrot.slane %v1365_v1, 3  ;;  %v1370_v39 = vrot.slane %v1368_v41, 4  ;;  %v5358_v1 = vld [vmem:[%s5528_s16 + $0x2c] sm:$0xff]  }
  0xe4   : > { %4773 = vmatpush3.bf16.msra.mxu0 %v5319_v5  ;;  %v1892_v53 = vor.u32 %v1891_v52, %v1888_v21  ;;  %v983_v16 = vpack.c.bf16 %v6846_v58, %v4308_v13  ;;  %v1509_v33 = vmul.bf16 0, %v5911_v60  ;;  %v6279_v47 = vor.u32 %v2855_v55, %v2852_v49 }
  0xe5   : > { %4774 = vmatprep.subr.bf16.mxu0 %v5321_v42  ;;  %v1915_v24 = vrot.slane %v1913_v36, 3  ;;  %v1918_v63 = vrot.slane %v1916_v26, 4  ;;  %v1371_v17 = vor.u32 %v1370_v39, %v1367_v8  ;;  %v5326_v36 = vld [vmem:[%s6808_s1 + $0x198] sm:$0xff]  }
  0xe6   : > { %v6272_v59 = vsel %vm1310_vm5, %v1865_v25, %v1892_v53  ;;  %v1138_v18 = vshrl.u32 %v983_v16, 16  ;;  %v1141_v44 = vshll.u32 %v983_v16, 16  ;;  %v5324_v25 = vld [vmem:[%s6808_s1 + $0x190] sm:$0xff]   ;;  %v6294_v52 = vrot.slane %v1509_v33, 1 }
  0xe7   : > { %4928 = vmatprep.mubr.bf16.mxu0 %v6272_v59  ;;  %v1919_v58 = vor.u32 %v1918_v63, %v1915_v24  ;;  %v1372_v7 = vsel %vm1310_vm5, %v1362_v32, %v1371_v17  ;;  %v1381_v5 = vsel %vm1310_vm5, %v1371_v17, %v5575_v10  ;;  %v5325_v10 = vld [vmem:[%s6808_s1 + $0x1d8] sm:$0xff]   ;;  %v6300_v61 = vsel %vm1310_vm5, %v6169_v29, %v6279_v47  ;;  %v5327_v63 = vld [vmem:[%s6808_s1 + $0x1e0] sm:$0xff]  }
  0xe8   : > { %4775 = vmatpush3.bf16.msra.mxu0 %v5322_v15  ;;  %v1497_v42 = vmul.bf16 %v5357_v35, %v1372_v7  ;;  %v1498_v41 = vmul.bf16 %v5358_v1, %v1381_v5  ;;  %v1140_v60 = vrot.slane %v1138_v18, 4  ;;  %v1143_v13 = vrot.slane %v1141_v44, 5  ;;  %3151 = vmatmul.mubr.bf16.gmra.mrb[68].mxu1 %v6201_v2  ;;  %v5328_v7 = vld [vmem:[%s6808_s1 + $0x1a0] sm:$0xff]  }
  0xe9   : > { %v6287_v21 = vsel %vm1310_vm5, %v1892_v53, %v1919_v58  ;;  %4776 = vmatprep.subr.bf16.mxu0 %v5323_v3  ;;  %3158 = vmatprep.mubr.bf16.mxu1 %v6174_v31 }
  0xea   : > { %v1683_v32 = vrot.slane %v1497_v42, 1  ;;  %v1685_v49 = vrot.slane %v1498_v41, 1  ;;  %v1144_v55 = vor.u32 %v1143_v13, %v1140_v60 }
  0xeb   : > { %4929 = vmatmul.mubr.bf16.gmra.mrb[68].mxu0 %v6287_v21 }
  0xec   : > { %4777 = vmatpush3.bf16.msra.mxu0 %v5324_v25  ;;  %v1684_v26 = vsel %vm1671_vm7, %v1681_v43, %v1683_v32  ;;  %v1686_v8 = vsel %vm1671_vm7, %v1683_v32, %v1685_v49  ;;  %v1688_v39 = vsel %vm1671_vm7, %v1685_v49, %v5591_v45  ;;  %v1145_v15 = vsel %vm984_vm10, %v6194_v6, %v1144_v55 }
  0xed   : > { %4778 = vmatprep.subr.bf16.mxu0 %v5325_v10  ;;  %v1940_v53 = vshrl.u32 %v1684_v26, 16  ;;  %v1943_v16 = vshll.u32 %v1684_v26, 16  ;;  %v1967_v29 = vshrl.u32 %v1686_v8, 16  ;;  %v1970_v24 = vshll.u32 %v1686_v8, 16  ;;  %v5331_v26 = vld [vmem:[%s6808_s1 + $0x1a8] sm:$0xff]  }
  0xee   : > { %v1994_v3 = vshrl.u32 %v1688_v39, 16  ;;  %v1997_v17 = vshll.u32 %v1688_v39, 16  ;;  %v1182_v43 = vmul.bf16 %v1145_v15, %v5852_v30  ;;  %v1708_v45 = vsel %vm1671_vm7, %v5922_v27, %v6294_v52  ;;  %v5330_v30 = vld [vmem:[%s6808_s1 + $0x1e8] sm:$0xff]  }
  0xef   : > { %v1942_v18 = vrot.slane %v1940_v53, 3  ;;  %v1945_v44 = vrot.slane %v1943_v16, 4  ;;  %v1969_v6 = vrot.slane %v1967_v29, 3  ;;  %v1972_v33 = vrot.slane %v1970_v24, 4 }
  0xf0   : > { %4779 = vmatpush3.bf16.msra.mxu0 %v5326_v36  ;;  %v1996_v5 = vrot.slane %v1994_v3, 3  ;;  %v1999_v25 = vrot.slane %v1997_v17, 4  ;;  %v2841_v35 = vshrl.u32 %v1182_v43, 16  ;;  %v2844_v42 = vshll.u32 %v1182_v43, 16  ;;  %3159 = vmatmul.mubr.bf16.gmra.mrb[72].mxu1 %v6221_v46  ;;  %v5333_v17 = vld [vmem:[%s6808_s1 + $0x1b0] sm:$0xff]  }
  0xf1   : > { %v1946_v1 = vor.u32 %v1945_v44, %v1942_v18  ;;  %v1973_v41 = vor.u32 %v1972_v33, %v1969_v6  ;;  %4780 = vmatprep.subr.bf16.mxu0 %v5327_v63  ;;  %3166 = vmatprep.mubr.bf16.mxu1 %v6300_v61  ;;  %v2859_v49 = vshrl.u32 %v1708_v45, 16  ;;  %v2862_v36 = vshll.u32 %v1708_v45, 16 }
  0xf2   : > { %v2000_v27 = vor.u32 %v1999_v25, %v1996_v5  ;;  %v2843_v60 = vrot.slane %v2841_v35, 3  ;;  %v2846_v13 = vrot.slane %v2844_v42, 4  ;;  %v1183_v15 = vmul.bf16 0, %v1144_v55  ;;  %v5335_v5 = vld [vmem:[%s6808_s1 + $0x1b8] sm:$0xff]   ;;  %v5338_v35 = vld [vmem:[%s6808_s1 + $0x210] sm:$0xff]  }
  0xf3   : > { %v6327_v10 = vsel %vm1310_vm5, %v1919_v58, %v1946_v1  ;;  %v6330_v32 = vsel %vm1310_vm5, %v1946_v1, %v1973_v41  ;;  %v5332_v58 = vld [vmem:[%s6808_s1 + $0x1f0] sm:$0xff]   ;;  %v3436_v24 = vshrl.u32 %v6294_v52, 16  ;;  %v2861_v63 = vrot.slane %v2859_v49, 3 }
  0xf4   : > { %4932 = vmatprep.mubr.bf16.mxu0 %v6327_v10  ;;  %4781 = vmatpush3.bf16.msra.mxu0 %v5328_v7  ;;  %v6337_v8 = vsel %vm1310_vm5, %v1973_v41, %v2000_v27  ;;  %v2847_v39 = vor.u32 %v2846_v13, %v2843_v60  ;;  %v3418_v16 = vshrl.u32 %v1183_v15, 16  ;;  %v3421_v29 = vshll.u32 %v1183_v15, 16  ;;  %v6860_v13 = vld [vmem:[#allocation8_spill] sm:$0xff] }
  0xf5   : > { %4933 = vmatmul.mubr.bf16.gmra.mrb[72].mxu0 %v6330_v32  ;;  %4782 = vmatprep.subr.bf16.mxu0 %v5330_v30  ;;  %v2864_v3 = vrot.slane %v2862_v36, 4  ;;  %v3439_v55 = vshll.u32 %v6294_v52, 16  ;;  %v3438_v18 = vrot.slane %v3436_v24, 3  ;;  %v6359_v6 = vsel %vm1310_vm5, %v2000_v27, %v5617_v22  ;;  %v5343_v27 = vld [vmem:[%s6808_s1 + $0x238] sm:$0xff]   ;;  %v6863_v15 = vld [vmem:[#allocation12_spill] sm:$0xff] }
  0xf6   : > { %4936 = vmatprep.mubr.bf16.mxu0 %v6337_v8  ;;  %v6346_v53 = vsel %vm1310_vm5, %v6213_v19, %v2847_v39  ;;  %v3420_v43 = vrot.slane %v3418_v16, 3  ;;  %v3423_v45 = vrot.slane %v3421_v29, 4  ;;  %v5334_v19 = vld [vmem:[%s6808_s1 + $0x1f8] sm:$0xff]   ;;  %v6865_v16 = vld [vmem:[#allocation5_spill] sm:$0xff]  ;;  %v6866_v29 = vld [vmem:[#allocation7_spill] sm:$0xff] }
  0xf7   : > { %v3441_v44 = vrot.slane %v3439_v55, 4  ;;  %v6362_v33 = vor.u32 %v2864_v3, %v2861_v63  ;;  %v6867_v63 = vld [vmem:[#allocation13_spill] sm:$0xff]  ;;  %v6868_v55 = vld [vmem:[#allocation11_spill] sm:$0xff] }
  0xf8   : > { %4783 = vmatpush3.bf16.msra.mxu0 %v5331_v26  ;;  %3167 = vmatmul.mubr.bf16.gmra.mrb[76].mxu1 %v6346_v53  ;;  %v3424_v52 = vor.u32 %v3423_v45, %v3420_v43 }
  0xf9   : > { %4784 = vmatprep.subr.bf16.mxu0 %v5332_v58  ;;  %4972 = vmatprep.mubr.bf16.mxu1 %v6259_v12  ;;  %v3442_v7 = vor.u32 %v3441_v44, %v3438_v18  ;;  %v5337_v12 = vld [vmem:[%s6808_s1 + $0x208] sm:$0xff]   ;;  %v6864_v58 = vld [vmem:[#allocation10_spill] sm:$0xff] }
  0xfa   : > { %v6368_v25 = vsel %vm1310_vm5, %v2847_v39, %v3424_v52  ;;  %v6870_v52 = vld [vmem:[#allocation15_spill] sm:$0xff] }
  0xfb   : > { %v6373_v22 = vsel %vm1310_vm5, %v6362_v33, %v3442_v7  ;;  %v6871_v7 = vld [vmem:[#allocation14_spill] sm:$0xff] }
  0xfc   : > { %4785 = vmatpush3.bf16.msra.mxu0 %v5333_v17  ;;  %v6869_v17 = vld [vmem:[#allocation6_spill] sm:$0xff] }
  0xfd   : > { %4937 = vmatmul.mubr.bf16.gmra.mrb[76].mxu0 %v6359_v6  ;;  %4786 = vmatprep.subr.bf16.mxu0 %v5334_v19  ;;  %v6437_v43 = vsel %vm1310_vm5, %v6869_v17, %v6362_v33  ;;  %v6872_v33 = vld [vmem:[#allocation17_spill] sm:$0xff] }
  0xfe   : > { %3623 = vmatprep.mubr.bf16.mxu0 %v5748_v0  ;;  %v5339_v0 = vld [vmem:[%s6808_s1 + $0x218] sm:$0xff]  }
 0x100   : > { %4787 = vmatpush3.bf16.msra.mxu0 %v5335_v5  ;;  %4973 = vmatmul.mubr.bf16.vlgmr.msra.gmra.mrb[80].mxu1 %v6272_v59  ;;  %v6873_v5 = vld [vmem:[#allocation16_spill] sm:$0xff] }
 0x101   : > { %5005 = vmatpush3.bf16.msra.mxu1 %v6082_v34  ;;  %4976 = vmatprep.mubr.bf16.mxu1 %v6287_v21  ;;  %v5340_v34 = vld [vmem:[%s6808_s1 + $0x220] sm:$0xff]  }
 0x102   : > { %5006 = vmatprep.subr.bf16.mxu1 %v5337_v12 }
 0x105   : > { %3624 = vmatmul.mubr.bf16.vlgmr.msra.gmra.mrb[80].mxu0 %v5871_v23  ;;  %5007 = vmatpush3.bf16.msra.mxu1 %v5337_v12 }
 0x106   : > { %3631 = vmatprep.mubr.bf16.mxu0 %v5861_v14  ;;  %5008 = vmatprep.subr.bf16.mxu1 %v5338_v35  ;;  %v5341_v14 = vld [vmem:[%s6808_s1 + $0x228] sm:$0xff]  }
 0x108   : > { %4977 = vmatmul.mubr.bf16.gmra.mrb[84].mxu1 %v6327_v10 }
 0x109   : > { %4980 = vmatprep.mubr.bf16.mxu1 %v6330_v32  ;;  %5009 = vmatpush3.bf16.msra.mxu1 %v5338_v35 }
 0x10a   : > { %5010 = vmatprep.subr.bf16.mxu1 %v5339_v0 }
 0x10d   : > { %3632 = vmatmul.mubr.bf16.gmra.mrb[84].mxu0 %v5940_v37  ;;  %5011 = vmatpush3.bf16.msra.mxu1 %v5339_v0  ;;  %v5342_v37 = vld [vmem:[%s6808_s1 + $0x230] sm:$0xff]  }
 0x10e   : > { %3639 = vmatprep.mubr.bf16.mxu0 %v5934_v48  ;;  %5012 = vmatprep.subr.bf16.mxu1 %v5340_v34 }
 0x110   : > { %4981 = vmatmul.mubr.bf16.gmra.mrb[88].mxu1 %v6337_v8 }
 0x111   : > { %4984 = vmatprep.mubr.bf16.mxu1 %v6359_v6  ;;  %5013 = vmatpush3.bf16.msra.mxu1 %v5340_v34  ;;  %v4516_v23 = vpop.f32.mrb[0].mxu0 }
 0x112   : > { %5014 = vmatprep.subr.bf16.mxu1 %v5341_v14  ;;  %v4517_v42 = vpop.f32.mrb[1].mxu0 }
 0x113   : > { %v6405_v1 = vadd.f32 %v4517_v42, %v4516_v23  ;;  %v4519_v48 = vpop.f32.mrb[2].mxu0  ;;  %v6874_v23 = vld [vmem:[#allocation19_spill] sm:$0xff] }
 0x114   : > { %v4520_v41 = vpop.f32.mrb[3].mxu0 }
 0x115   : > { %3640 = vmatmul.mubr.bf16.gmra.mrb[88].mxu0 %v5983_v56  ;;  %5015 = vmatpush3.bf16.msra.mxu1 %v5341_v14  ;;  %v6409_v30 = vadd.f32 %v4520_v41, %v4519_v48  ;;  %v6859_v56 = vld [vmem:[#allocation9_spill] sm:$0xff] }
 0x116   : > { %3647 = vmatprep.mubr.bf16.mxu0 %v5967_v51  ;;  %5016 = vmatprep.subr.bf16.mxu1 %v5342_v37 }
 0x118   : > { %4985 = vmatmul.mubr.bf16.gmra.mrb[92].mxu1 %v5635_v57 }
 0x119   : > { %4988 = vmatprep.mubr.bf16.mxu1 %v5690_v50  ;;  %5017 = vmatpush3.bf16.msra.mxu1 %v5342_v37 }
 0x11a   : > { %5018 = vmatprep.subr.bf16.mxu1 %v5343_v27 }
 0x11d   : > { %3648 = vmatmul.mubr.bf16.gmra.mrb[92].mxu0 %v6013_v28  ;;  %5019 = vmatpush3.bf16.msra.mxu1 %v5343_v27  ;;  %v6861_v28 = vld [vmem:[#allocation3_spill] sm:$0xff] }
 0x11e   : > { %3655 = vmatprep.mubr.bf16.mxu0 %v5990_v11  ;;  %v6862_v11 = vld [vmem:[#allocation4_spill] sm:$0xff] }
 0x120   : > { %4989 = vmatmul.mubr.bf16.gmra.mrb[0].mxu1 %v5768_v40 }
 0x121   : > { %4992 = vmatprep.mubr.bf16.mxu1 %v5821_v54 }
 0x123   : > { %v4522_v51 = vpop.f32.mrb[4].mxu0 }
 0x124   : > { %v4523_v60 = vpop.f32.mrb[5].mxu0 }
 0x125   : > { %3656 = vmatmul.mubr.bf16.gmra.mrb[96].mxu0 %v6859_v56  ;;  %v6422_v49 = vadd.f32 %v4523_v60, %v4522_v51  ;;  %v4525_v36 = vpop.f32.mrb[6].mxu0 }
 0x126   : > { %3663 = vmatprep.mubr.bf16.mxu0 %v6860_v13  ;;  %v4526_v26 = vpop.f32.mrb[7].mxu0 }
 0x127   : > { %v6424_v39 = vadd.f32 %v4526_v26, %v4525_v36 }
 0x128   : > { %4993 = vmatmul.mubr.bf16.gmra.mrb[4].mxu1 %v6861_v28 }
 0x129   : > { %4996 = vmatprep.mubr.bf16.mxu1 %v6862_v11 }
 0x12d   : > { %3664 = vmatmul.mubr.bf16.gmra.mrb[100].mxu0 %v6863_v15 }
 0x12e   : > { %3671 = vmatprep.mubr.bf16.mxu0 %v6864_v58 }
 0x130   : > { %4997 = vmatmul.mubr.bf16.gmra.mrb[8].mxu1 %v6865_v16 }
 0x131   : > { %5000 = vmatprep.mubr.bf16.mxu1 %v6866_v29 }
 0x133   : > { %v4528_v24 = vpop.f32.mrb[8].mxu0 }
 0x134   : > { %v4529_v3 = vpop.f32.mrb[9].mxu0 }
 0x135   : > { %3672 = vmatmul.mubr.bf16.gmra.mrb[104].mxu0 %v6867_v63  ;;  %v6439_v45 = vadd.f32 %v4529_v3, %v4528_v24  ;;  %v4531_v18 = vpop.f32.mrb[10].mxu0 }
 0x136   : > { %3679 = vmatprep.mubr.bf16.mxu0 %v6868_v55  ;;  %v4532_v19 = vpop.f32.mrb[11].mxu0 }
 0x137   : > { %v6441_v44 = vadd.f32 %v4532_v19, %v4531_v18 }
 0x138   : > { %5001 = vmatmul.mubr.bf16.gmra.mrb[12].mxu1 %v6437_v43 }
 0x139   : > { %5020 = vmatprep.mubr.bf16.mxu1 %v6272_v59 }
 0x13d   : > { %3680 = vmatmul.mubr.bf16.gmra.mrb[108].mxu0 %v6870_v52 }
 0x13e   : > { %3687 = vmatprep.mubr.bf16.mxu0 %v6871_v7 }
 0x140   : > { %5021 = vmatmul.mubr.bf16.vlgmr.msra.gmra.mrb[80].mxu1 %v6287_v21  ;;  %v6875_v21 = vld [vmem:[#allocation18_spill] sm:$0xff] }
 0x141   : > { %5024 = vmatprep.mubr.bf16.mxu1 %v6327_v10 }
 0x145   : > { %3688 = vmatmul.mubr.bf16.gmra.mrb[112].mxu0 %v6872_v33  ;;  %v4534_v12 = vpop.f32.mrb[12].mxu0 }
 0x146   : > { %3695 = vmatprep.mubr.bf16.mxu0 %v6873_v5  ;;  %v4535_v35 = vpop.f32.mrb[13].mxu0 }
 0x147   : > { %v6451_v0 = vadd.f32 %v4535_v35, %v4534_v12  ;;  %v4537_v34 = vpop.f32.mrb[14].mxu0 }
 0x148   : > { %5025 = vmatmul.mubr.bf16.gmra.mrb[84].mxu1 %v6330_v32  ;;  %v4538_v59 = vpop.f32.mrb[15].mxu0 }
 0x149   : > { %v6454_v14 = vadd.f32 %v4538_v59, %v4537_v34  ;;  %5028 = vmatprep.mubr.bf16.mxu1 %v6337_v8 }
 0x14d   : > { %3696 = vmatmul.mubr.bf16.gmra.mrb[116].mxu0 %v6874_v23 }
 0x14e   : > { %3703 = vmatprep.mubr.bf16.mxu0 %v6875_v21 }
 0x150   : > { %5029 = vmatmul.mubr.bf16.gmra.mrb[88].mxu1 %v6359_v6 }
 0x151   : > { %5032 = vmatprep.mubr.bf16.mxu1 %v5635_v57 }
 0x153   : > { %v4540_v10 = vpop.f32.mrb[16].mxu0  ;;  %v4652_v42 = vpop.f32.mrb[16].mxu1 }
 0x154   : > { %v4541_v37 = vpop.f32.mrb[17].mxu0  ;;  %v4653_v48 = vpop.f32.mrb[17].mxu1 }
 0x155   : > { %3704 = vmatmul.mubr.bf16.gmra.mrb[120].mxu0 %v6161_v4  ;;  %v6462_v32 = vadd.f32 %v4541_v37, %v4540_v10  ;;  %v4543_v41 = vpop.f32.mrb[18].mxu0  ;;  %v6464_v27 = vadd.f32 %v4653_v48, %v4652_v42  ;;  %v4655_v8 = vpop.f32.mrb[18].mxu1 }
 0x156   : > { %3711 = vmatprep.mubr.bf16.mxu0 %v6144_v38  ;;  %v4544_v51 = vpop.f32.mrb[19].mxu0  ;;  %v4656_v56 = vpop.f32.mrb[19].mxu1 }
 0x157   : > { %v6467_v60 = vadd.f32 %v4544_v51, %v4543_v41  ;;  %v6469_v6 = vadd.f32 %v4656_v56, %v4655_v8 }
 0x158   : > { %5033 = vmatmul.mubr.bf16.gmra.mrb[92].mxu1 %v5690_v50 }
 0x159   : > { %5036 = vmatprep.mubr.bf16.mxu1 %v5768_v40 }
 0x15b   : > { %v4546_v57 = vpop.f32.mrb[20].mxu0  ;;  %v4658_v4 = vpop.f32.mrb[20].mxu1 }
 0x15c   : > { %v4547_v13 = vpop.f32.mrb[21].mxu0  ;;  %v4659_v36 = vpop.f32.mrb[21].mxu1 }
 0x15d   : > { %3712 = vmatmul.mubr.bf16.gmra.mrb[124].mxu0 %v6187_v9  ;;  %v6474_v26 = vadd.f32 %v4547_v13, %v4546_v57  ;;  %v4549_v15 = vpop.f32.mrb[22].mxu0  ;;  %v6476_v38 = vadd.f32 %v4659_v36, %v4658_v4  ;;  %v4661_v58 = vpop.f32.mrb[22].mxu1 }
 0x15e   : > { %3719 = vmatprep.mubr.bf16.mxu0 %v6166_v62  ;;  %v4550_v24 = vpop.f32.mrb[23].mxu0  ;;  %v4662_v63 = vpop.f32.mrb[23].mxu1 }
 0x15f   : > { %v6479_v3 = vadd.f32 %v4550_v24, %v4549_v15  ;;  %v6481_v50 = vadd.f32 %v4662_v63, %v4661_v58 }
 0x160   : > { %5037 = vmatmul.mubr.bf16.gmra.mrb[0].mxu1 %v5821_v54  ;;  %v3427_v54 = vshrl.u32 %v5491_v20, 16 }
 0x161   : > { %5040 = vmatprep.mubr.bf16.mxu1 %v6861_v28  ;;  %v3430_v28 = vshll.u32 %v5491_v20, 16 }
 0x163   : > { %v4552_v40 = vpop.f32.mrb[24].mxu0  ;;  %v4664_v9 = vpop.f32.mrb[24].mxu1  ;;  %v3432_v35 = vrot.slane %v3430_v28, 4 }
 0x164   : > { %v4553_v55 = vpop.f32.mrb[25].mxu0  ;;  %v4665_v17 = vpop.f32.mrb[25].mxu1 }
 0x165   : > { %3720 = vmatmul.mubr.bf16.gmra.mrb[128].mxu0 %v6201_v2  ;;  %v6486_v18 = vadd.f32 %v4553_v55, %v4552_v40  ;;  %v4555_v19 = vpop.f32.mrb[26].mxu0  ;;  %v6488_v62 = vadd.f32 %v4665_v17, %v4664_v9  ;;  %v4667_v52 = vpop.f32.mrb[26].mxu1  ;;  %v3429_v2 = vrot.slane %v3427_v54, 3 }
 0x166   : > { %3727 = vmatprep.mubr.bf16.mxu0 %v6174_v31  ;;  %v4556_v7 = vpop.f32.mrb[27].mxu0  ;;  %v4668_v33 = vpop.f32.mrb[27].mxu1 }
 0x167   : > { %v6493_v5 = vadd.f32 %v4556_v7, %v4555_v19  ;;  %v6495_v12 = vadd.f32 %v4668_v33, %v4667_v52  ;;  %v3433_v48 = vor.u32 %v3432_v35, %v3429_v2 }
 0x168   : > { %5041 = vmatmul.mubr.bf16.gmra.mrb[4].mxu1 %v6862_v11 }
 0x169   : > { %5044 = vmatprep.mubr.bf16.mxu1 %v6865_v16 }
 0x16b   : > { %v4558_v34 = vpop.f32.mrb[28].mxu0  ;;  %v4670_v59 = vpop.f32.mrb[28].mxu1 }
 0x16c   : > { %v4559_v31 = vpop.f32.mrb[29].mxu0  ;;  %v4671_v23 = vpop.f32.mrb[29].mxu1 }
 0x16d   : > { %3728 = vmatmul.mubr.bf16.gmra.mrb[132].mxu0 %v6221_v46  ;;  %v6500_v21 = vadd.f32 %v4559_v31, %v4558_v34  ;;  %v4561_v10 = vpop.f32.mrb[30].mxu0  ;;  %v6502_v20 = vadd.f32 %v4671_v23, %v4670_v59  ;;  %v4673_v42 = vpop.f32.mrb[30].mxu1  ;;  %v3434_v46 = vsel %vm1310_vm5, %v6279_v47, %v3433_v48 }
 0x16e   : > { %3735 = vmatprep.mubr.bf16.mxu0 %v6300_v61  ;;  %v4562_v37 = vpop.f32.mrb[31].mxu0  ;;  %v4674_v11 = vpop.f32.mrb[31].mxu1 }
 0x16f   : > { %v6505_v16 = vadd.f32 %v4562_v37, %v4561_v10  ;;  %v6507_v41 = vadd.f32 %v4674_v11, %v4673_v42 }
 0x170   : > { %5045 = vmatmul.mubr.bf16.gmra.mrb[8].mxu1 %v6866_v29 }
 0x171   : > { %5048 = vmatprep.mubr.bf16.mxu1 %v6437_v43 }
 0x173   : > { %v4564_v8 = vpop.f32.mrb[32].mxu0  ;;  %v4676_v51 = vpop.f32.mrb[32].mxu1 }
 0x174   : > { %v4565_v56 = vpop.f32.mrb[33].mxu0  ;;  %v4677_v61 = vpop.f32.mrb[33].mxu1 }
 0x175   : > { %3736 = vmatmul.mubr.bf16.gmra.mrb[136].mxu0 %v6346_v53  ;;  %v4566_v57 = vadd.f32 %v4565_v56, %v4564_v8  ;;  %v4567_v4 = vpop.f32.mrb[34].mxu0  ;;  %v6514_v13 = vadd.f32 %v4677_v61, %v4676_v51  ;;  %v4679_v36 = vpop.f32.mrb[34].mxu1 }
 0x176   : > { %3743 = vmatprep.mubr.bf16.mxu0 %v3434_v46  ;;  %v4568_v15 = vpop.f32.mrb[35].mxu0  ;;  %v4680_v58 = vpop.f32.mrb[35].mxu1 }
 0x177   : > { %v4569_v29 = vadd.f32 %v4568_v15, %v4567_v4  ;;  %v6516_v24 = vadd.f32 %v4680_v58, %v4679_v36 }
 0x178   : > { %5049 = vmatmul.mubr.bf16.gmra.mrb[12].mxu1 %v6373_v22 }
 0x17b   : > { %v4570_v47 = vpop.f32.mrb[36].mxu0  ;;  %v4682_v43 = vpop.f32.mrb[36].mxu1 }
 0x17c   : > { %v4571_v53 = vpop.f32.mrb[37].mxu0  ;;  %v4683_v63 = vpop.f32.mrb[37].mxu1 }
 0x17d   : > { %3744 = vmatmul.mubr.bf16.gmra.mrb[140].mxu0 %v6368_v25  ;;  %v4572_v40 = vadd.f32 %v4571_v53, %v4570_v47  ;;  %v4573_v9 = vpop.f32.mrb[38].mxu0  ;;  %v6520_v55 = vadd.f32 %v4683_v63, %v4682_v43  ;;  %v4685_v17 = vpop.f32.mrb[38].mxu1 }
 0x17e   : > { %v4574_v19 = vpop.f32.mrb[39].mxu0  ;;  %v4686_v52 = vpop.f32.mrb[39].mxu1 }
 0x17f   : > { %v4575_v7 = vadd.f32 %v4574_v19, %v4573_v9  ;;  %v6522_v33 = vadd.f32 %v4686_v52, %v4685_v17 }
 0x183   : > { %v4576_v54 = vpop.f32.mrb[40].mxu0  ;;  %v4688_v28 = vpop.f32.mrb[40].mxu1 }
 0x184   : > { %v4577_v2 = vpop.f32.mrb[41].mxu0  ;;  %v4689_v22 = vpop.f32.mrb[41].mxu1 }
 0x185   : > { %v4578_v35 = vadd.f32 %v4577_v2, %v4576_v54  ;;  %v4579_v34 = vpop.f32.mrb[42].mxu0  ;;  %v6524_v59 = vadd.f32 %v4689_v22, %v4688_v28  ;;  %v4691_v25 = vpop.f32.mrb[42].mxu1 }
 0x186   : > { %v4580_v31 = vpop.f32.mrb[43].mxu0  ;;  %v4692_v23 = vpop.f32.mrb[43].mxu1 }
 0x187   : > { %v4581_v10 = vadd.f32 %v4580_v31, %v4579_v34  ;;  %v6526_v42 = vadd.f32 %v4692_v23, %v4691_v25 }
 0x18b   : > { %v4582_v37 = vpop.f32.mrb[44].mxu0  ;;  %v4694_v11 = vpop.f32.mrb[44].mxu1 }
 0x18c   : > { %v4583_v48 = vpop.f32.mrb[45].mxu0  ;;  %v4695_v46 = vpop.f32.mrb[45].mxu1 }
 0x18d   : > { %v4584_v8 = vadd.f32 %v4583_v48, %v4582_v37  ;;  %v4585_v51 = vpop.f32.mrb[46].mxu0  ;;  %v6528_v56 = vadd.f32 %v4695_v46, %v4694_v11  ;;  %v4697_v61 = vpop.f32.mrb[46].mxu1 }
 0x18e   : > { %v4586_v4 = vpop.f32.mrb[47].mxu0  ;;  %v4698_v36 = vpop.f32.mrb[47].mxu1 }
 0x18f   : > { %v4587_v15 = vadd.f32 %v4586_v4, %v4585_v51  ;;  %v6530_v58 = vadd.f32 %v4698_v36, %v4697_v61 }
 0x193   : > { %v4588_v47 = vpop.f32.mrb[48].mxu0  ;;  %v4700_v43 = vpop.f32.mrb[48].mxu1 }
 0x194   : > { %v4589_v53 = vpop.f32.mrb[49].mxu0  ;;  %v4701_v63 = vpop.f32.mrb[49].mxu1 }
 0x195   : > { %v4590_v9 = vadd.f32 %v4589_v53, %v4588_v47  ;;  %v4702_v17 = vadd.f32 %v4701_v63, %v4700_v43  ;;  %v4591_v19 = vpop.f32.mrb[50].mxu0  ;;  %v4703_v52 = vpop.f32.mrb[50].mxu1 }
 0x196   : > { %v4592_v54 = vpop.f32.mrb[51].mxu0  ;;  %v4704_v28 = vpop.f32.mrb[51].mxu1 }
 0x197   : > { %v6532_v2 = vadd.f32 %v4702_v17, %v4566_v57  ;;  %v4593_v22 = vadd.f32 %v4592_v54, %v4591_v19  ;;  %v4705_v34 = vadd.f32 %v4704_v28, %v4703_v52 }
 0x199   : > { %v6534_v25 = vadd.f32 %v4705_v34, %v4569_v29 }
 0x19b   : > { %v4594_v31 = vpop.f32.mrb[52].mxu0  ;;  %v4706_v23 = vpop.f32.mrb[52].mxu1 }
 0x19c   : > { %v4595_v37 = vpop.f32.mrb[53].mxu0  ;;  %v4707_v11 = vpop.f32.mrb[53].mxu1 }
 0x19d   : > { %v6536_v48 = vadd.f32 %v4595_v37, %v4594_v31  ;;  %v4708_v46 = vadd.f32 %v4707_v11, %v4706_v23  ;;  %v4597_v51 = vpop.f32.mrb[54].mxu0  ;;  %v4709_v61 = vpop.f32.mrb[54].mxu1 }
 0x19e   : > { %v4598_v4 = vpop.f32.mrb[55].mxu0  ;;  %v4710_v36 = vpop.f32.mrb[55].mxu1 }
 0x19f   : > { %v6538_v47 = vadd.f32 %v4708_v46, %v4572_v40  ;;  %v6540_v43 = vadd.f32 %v4598_v4, %v4597_v51  ;;  %v4711_v57 = vadd.f32 %v4710_v36, %v4709_v61 }
 0x1a1   : > { %v6542_v53 = vadd.f32 %v4711_v57, %v4575_v7 }
 0x1a3   : > { %6876 = vst [vmem:[#allocation9_spill] sm:$0xff] %v6542_v53  ;;  %v4600_v29 = vpop.f32.mrb[56].mxu0  ;;  %v4712_v63 = vpop.f32.mrb[56].mxu1 }
 0x1a4   : > { %v4601_v17 = vpop.f32.mrb[57].mxu0  ;;  %v4713_v19 = vpop.f32.mrb[57].mxu1 }
 0x1a5   : > { %v6544_v52 = vadd.f32 %v4601_v17, %v4600_v29  ;;  %v4714_v54 = vadd.f32 %v4713_v19, %v4712_v63  ;;  %v4603_v28 = vpop.f32.mrb[58].mxu0  ;;  %v4715_v34 = vpop.f32.mrb[58].mxu1 }
 0x1a6   : > { %v4604_v31 = vpop.f32.mrb[59].mxu0  ;;  %v4716_v23 = vpop.f32.mrb[59].mxu1 }
 0x1a7   : > { %v6546_v37 = vadd.f32 %v4714_v54, %v4578_v35  ;;  %v6548_v40 = vadd.f32 %v4604_v31, %v4603_v28  ;;  %v4717_v11 = vadd.f32 %v4716_v23, %v4715_v34 }
 0x1a9   : > { %v6550_v46 = vadd.f32 %v4717_v11, %v4581_v10 }
 0x1ab   : > { %6877 = vst [vmem:[#allocation8_spill] sm:$0xff] %v6550_v46  ;;  %v4606_v7 = vpop.f32.mrb[60].mxu0  ;;  %v4718_v51 = vpop.f32.mrb[60].mxu1 }
 0x1ac   : > { %v4607_v61 = vpop.f32.mrb[61].mxu0  ;;  %v4719_v4 = vpop.f32.mrb[61].mxu1 }
 0x1ad   : > { %v6552_v36 = vadd.f32 %v4607_v61, %v4606_v7  ;;  %v4720_v57 = vadd.f32 %v4719_v4, %v4718_v51  ;;  %v4609_v29 = vpop.f32.mrb[62].mxu0  ;;  %v4721_v63 = vpop.f32.mrb[62].mxu1 }
 0x1ae   : > { %v4610_v17 = vpop.f32.mrb[63].mxu0  ;;  %v4722_v19 = vpop.f32.mrb[63].mxu1 }
 0x1af   : > { %v6554_v53 = vadd.f32 %v4720_v57, %v4584_v8  ;;  %v6556_v35 = vadd.f32 %v4610_v17, %v4609_v29  ;;  %v4723_v54 = vadd.f32 %v4722_v19, %v4721_v63 }
 0x1b1   : > { %v6558_v28 = vadd.f32 %v4723_v54, %v4587_v15 }
 0x1b3   : > { %v4724_v10 = vpop.f32.mrb[64].mxu1 }
 0x1b4   : > { %v4725_v34 = vpop.f32.mrb[65].mxu1 }
 0x1b5   : > { %v4726_v23 = vadd.f32 %v4725_v34, %v4724_v10  ;;  %v4727_v11 = vpop.f32.mrb[66].mxu1 }
 0x1b6   : > { %v4926_v31 = vpop.f32.mrb[64].mxu0  ;;  %v4728_v51 = vpop.f32.mrb[67].mxu1 }
 0x1b7   : > { %v2641_v7 = vadd.f32 %v4926_v31, %v6422_v49  ;;  %v2632_v61 = vpop.f32.mrb[65].mxu0  ;;  %v6562_v46 = vadd.f32 %v4726_v23, %v4590_v9  ;;  %v4729_v57 = vadd.f32 %v4728_v51, %v4727_v11 }
 0x1b8   : > { %v2633_v4 = vadd.f32 %v6405_v1, %v2632_v61  ;;  %v4927_v8 = vpop.f32.mrb[66].mxu0 }
 0x1b9   : > { %v6565_v29 = vadd.f32 %v6476_v38, %v2641_v7  ;;  %v2644_v15 = vadd.f32 %v4927_v8, %v6424_v39  ;;  %v2635_v63 = vpop.f32.mrb[67].mxu0  ;;  %v6572_v49 = vadd.f32 %v4729_v57, %v4593_v22 }
 0x1ba   : > { %v6569_v17 = vadd.f32 %v6464_v27, %v2633_v4  ;;  %v2636_v19 = vadd.f32 %v6409_v30, %v2635_v63 }
 0x1bb   : > { %v6575_v54 = vadd.f32 %v6481_v50, %v2644_v15  ;;  %v4730_v9 = vpop.f32.mrb[68].mxu1 }
 0x1bc   : > { %v6578_v1 = vadd.f32 %v6469_v6, %v2636_v19  ;;  %v4731_v10 = vpop.f32.mrb[69].mxu1 }
 0x1bd   : > { %v4732_v34 = vadd.f32 %v4731_v10, %v4730_v9  ;;  %v4733_v31 = vpop.f32.mrb[70].mxu1 }
 0x1be   : > { %v4930_v38 = vpop.f32.mrb[68].mxu0  ;;  %v4734_v27 = vpop.f32.mrb[71].mxu1 }
 0x1bf   : > { %v2657_v39 = vadd.f32 %v4930_v38, %v6451_v0  ;;  %v2648_v23 = vpop.f32.mrb[69].mxu0  ;;  %v6583_v30 = vadd.f32 %v4732_v34, %v6536_v48  ;;  %v4735_v50 = vadd.f32 %v4734_v27, %v4733_v31 }
 0x1c0   : > { %v2649_v11 = vadd.f32 %v6439_v45, %v2648_v23  ;;  %v4931_v22 = vpop.f32.mrb[70].mxu0 }
 0x1c1   : > { %v6586_v7 = vadd.f32 %v6502_v20, %v2657_v39  ;;  %v2660_v6 = vadd.f32 %v4931_v22, %v6454_v14  ;;  %v2651_v61 = vpop.f32.mrb[71].mxu0  ;;  %v6594_v4 = vadd.f32 %v4735_v50, %v6540_v43 }
 0x1c2   : > { %v6590_v51 = vadd.f32 %v6488_v62, %v2649_v11  ;;  %v2652_v0 = vadd.f32 %v6441_v44, %v2651_v61 }
 0x1c3   : > { %v6597_v45 = vadd.f32 %v6507_v41, %v2660_v6  ;;  %v4736_v8 = vpop.f32.mrb[72].mxu1 }
 0x1c4   : > { %v6600_v48 = vadd.f32 %v6495_v12, %v2652_v0  ;;  %v4737_v20 = vpop.f32.mrb[73].mxu1 }
 0x1c5   : > { %v4738_v57 = vadd.f32 %v4737_v20, %v4736_v8  ;;  %v4739_v15 = vpop.f32.mrb[74].mxu1 }
 0x1c6   : > { %v4740_v14 = vpop.f32.mrb[75].mxu1 }
 0x1c7   : > { %v6603_v62 = vadd.f32 %v4738_v57, %v6544_v52  ;;  %v4741_v19 = vadd.f32 %v4740_v14, %v4739_v15 }
 0x1c8   : > { %v4934_v63 = vpop.f32.mrb[72].mxu0 }
 0x1c9   : > { %v2673_v44 = vadd.f32 %v4934_v63, %v6474_v26  ;;  %v2664_v43 = vpop.f32.mrb[73].mxu0  ;;  %v6608_v10 = vadd.f32 %v4741_v19, %v6548_v40 }
 0x1ca   : > { %v2665_v9 = vadd.f32 %v6462_v32, %v2664_v43  ;;  %v4935_v41 = vpop.f32.mrb[74].mxu0 }
 0x1cb   : > { %v6611_v12 = vadd.f32 %v6520_v55, %v2673_v44  ;;  %v2676_v38 = vadd.f32 %v4935_v41, %v6479_v3  ;;  %v2667_v34 = vpop.f32.mrb[75].mxu0  ;;  %v4742_v39 = vpop.f32.mrb[76].mxu1 }
 0x1cc   : > { %v5105_v31 = vadd.f32 %v6514_v13, %v2665_v9  ;;  %v2668_v52 = vadd.f32 %v6467_v60, %v2667_v34  ;;  %v4743_v23 = vpop.f32.mrb[77].mxu1 }
 0x1cd   : > { %v6617_v26 = vadd.f32 %v6522_v33, %v2676_v38  ;;  %v4744_v27 = vadd.f32 %v4743_v23, %v4742_v39  ;;  %v4745_v40 = vpop.f32.mrb[78].mxu1 }
 0x1ce   : > { %v5113_v32 = vadd.f32 %v6516_v24, %v2668_v52  ;;  %v4746_v11 = vpop.f32.mrb[79].mxu1 }
 0x1cf   : > { %v6621_v55 = vadd.f32 %v4744_v27, %v6552_v36  ;;  %v4747_v3 = vadd.f32 %v4746_v11, %v4745_v40 }
 0x1d0   : > { %v4938_v22 = vpop.f32.mrb[76].mxu0 }
 0x1d1   : > { %v2689_v50 = vadd.f32 %v4938_v22, %v6500_v21  ;;  %v2680_v13 = vpop.f32.mrb[77].mxu0  ;;  %v6626_v33 = vadd.f32 %v4747_v3, %v6556_v35 }
 0x1d2   : > { %v2681_v60 = vadd.f32 %v6486_v18, %v2680_v13  ;;  %v4939_v6 = vpop.f32.mrb[78].mxu0 }
 0x1d3   : > { %v6629_v61 = vadd.f32 %v6528_v56, %v2689_v50  ;;  %v2692_v24 = vadd.f32 %v4939_v6, %v6505_v16  ;;  %v2683_v0 = vpop.f32.mrb[79].mxu0 }
 0x1d4   : > { %v5121_v8 = vadd.f32 %v6524_v59, %v2681_v60  ;;  %v2684_v36 = vadd.f32 %v6493_v5, %v2683_v0 }
 0x1d5   : > { %v6635_v20 = vadd.f32 %v6530_v58, %v2692_v24 }
 0x1d6   : > { %v5129_v21 = vadd.f32 %v6526_v42, %v2684_v36 }
 0x1d8   : > { %v4788_v18 = vpop.f32.mrb[80].mxu0 }
 0x1d9   : > { %v4789_v57 = vpop.f32.mrb[81].mxu0 }
 0x1da   : > { %v4790_v15 = vadd.f32 %v4789_v57, %v4788_v18  ;;  %v4791_v35 = vpop.f32.mrb[82].mxu0 }
 0x1db   : > { %v4792_v14 = vpop.f32.mrb[83].mxu0 }
 0x1dc   : > { %v4793_v63 = vadd.f32 %v4792_v14, %v4791_v35  ;;  %v5074_v56 = vadd.f32 %v6569_v17, %v4790_v15 }
 0x1de   : > { %v6640_v16 = vadd.f32 %v6578_v1, %v4793_v63 }
 0x1e0   : > { %v4794_v19 = vpop.f32.mrb[84].mxu0 }
 0x1e1   : > { %v4795_v59 = vpop.f32.mrb[85].mxu0 }
 0x1e2   : > { %v4796_v44 = vadd.f32 %v4795_v59, %v4794_v19  ;;  %v4797_v5 = vpop.f32.mrb[86].mxu0 }
 0x1e3   : > { %v4798_v43 = vpop.f32.mrb[87].mxu0 }
 0x1e4   : > { %v4799_v58 = vadd.f32 %v4798_v43, %v4797_v5  ;;  %v5070_v9 = vadd.f32 %v6565_v29, %v4796_v44 }
 0x1e6   : > { %v5078_v42 = vadd.f32 %v6575_v54, %v4799_v58 }
 0x1e8   : > { %v4800_v41 = vpop.f32.mrb[88].mxu0 }
 0x1e9   : > { %v4801_v38 = vpop.f32.mrb[89].mxu0 }
 0x1ea   : > { %v4802_v34 = vadd.f32 %v4801_v38, %v4800_v41  ;;  %v4803_v52 = vpop.f32.mrb[90].mxu0 }
 0x1eb   : > { %v4804_v39 = vpop.f32.mrb[91].mxu0 }
 0x1ec   : > { %v4805_v23 = vadd.f32 %v4804_v39, %v4803_v52  ;;  %v6645_v17 = vadd.f32 %v6590_v51, %v4802_v34 }
 0x1ee   : > { %v6648_v1 = vadd.f32 %v6600_v48, %v4805_v23 }
 0x1f0   : > { %v4806_v27 = vpop.f32.mrb[92].mxu0 }
 0x1f1   : > { %v4807_v40 = vpop.f32.mrb[93].mxu0 }
 0x1f2   : > { %v4808_v11 = vadd.f32 %v4807_v40, %v4806_v27  ;;  %v4809_v22 = vpop.f32.mrb[94].mxu0 }
 0x1f3   : > { %v4810_v3 = vpop.f32.mrb[95].mxu0 }
 0x1f4   : > { %v4811_v29 = vadd.f32 %v4810_v3, %v4809_v22  ;;  %v6651_v54 = vadd.f32 %v6586_v7, %v4808_v11 }
 0x1f6   : > { %v6654_v50 = vadd.f32 %v6597_v45, %v4811_v29 }
 0x1f8   : > { %v4812_v13 = vpop.f32.mrb[96].mxu0 }
 0x1f9   : > { %v4813_v60 = vpop.f32.mrb[97].mxu0 }
 0x1fa   : > { %v4814_v6 = vadd.f32 %v4813_v60, %v4812_v13  ;;  %v4815_v51 = vpop.f32.mrb[98].mxu0 }
 0x1fb   : > { %v4816_v24 = vpop.f32.mrb[99].mxu0 }
 0x1fc   : > { %v4817_v0 = vadd.f32 %v4816_v24, %v4815_v51  ;;  %v6656_v48 = vadd.f32 %v5105_v31, %v4814_v6 }
 0x1fe   : > { %v6658_v36 = vadd.f32 %v5113_v32, %v4817_v0 }
 0x200   : > { %v4818_v18 = vpop.f32.mrb[100].mxu0 }
 0x201   : > { %v4819_v57 = vpop.f32.mrb[101].mxu0 }
 0x202   : > { %v4820_v15 = vadd.f32 %v4819_v57, %v4818_v18  ;;  %v4821_v35 = vpop.f32.mrb[102].mxu0 }
 0x203   : > { %v4822_v14 = vpop.f32.mrb[103].mxu0 }
 0x204   : > { %v4823_v7 = vadd.f32 %v4822_v14, %v4821_v35  ;;  %v6661_v63 = vadd.f32 %v6611_v12, %v4820_v15 }
 0x206   : > { %v6664_v45 = vadd.f32 %v6617_v26, %v4823_v7  ;;  %v6673_v26 = vld [vmem:[%s6809_s2] ss:$0 sm:$0xff] }
 0x208   : > { %v4824_v19 = vpop.f32.mrb[104].mxu0 }
 0x209   : > { %v4825_v59 = vpop.f32.mrb[105].mxu0 }
 0x20a   : > { %v4826_v44 = vadd.f32 %v4825_v59, %v4824_v19  ;;  %v4827_v5 = vpop.f32.mrb[106].mxu0 }
 0x20b   : > { %v4828_v31 = vpop.f32.mrb[107].mxu0 }
 0x20c   : > { %v4829_v32 = vadd.f32 %v4828_v31, %v4827_v5  ;;  %v6666_v43 = vadd.f32 %v5121_v8, %v4826_v44 }
 0x20e   : > { %v6668_v58 = vadd.f32 %v5129_v21, %v4829_v32 }
 0x210   : > { %v4830_v41 = vpop.f32.mrb[108].mxu0 }
 0x211   : > { %v4831_v38 = vpop.f32.mrb[109].mxu0 }
 0x212   : > { %v4832_v34 = vadd.f32 %v4831_v38, %v4830_v41  ;;  %v4833_v52 = vpop.f32.mrb[110].mxu0 }
 0x213   : > { %v4834_v12 = vpop.f32.mrb[111].mxu0  ;;  %v5022_v23 = vpop.f32.mrb[80].mxu1 }
 0x214   : > { %v4835_v39 = vadd.f32 %v4834_v12, %v4833_v52  ;;  %v6676_v27 = vadd.f32 %v6629_v61, %v4832_v34  ;;  %v5071_v40 = vadd.f32 %v5070_v9, %v5022_v23  ;;  %v3786_v8 = vpop.f32.mrb[81].mxu1 }
 0x215   : > { %v5075_v21 = vadd.f32 %v5074_v56, %v3786_v8  ;;  %v5023_v11 = vpop.f32.mrb[82].mxu1 }
 0x216   : > { %v6680_v22 = vadd.f32 %v6635_v20, %v4835_v39  ;;  %v4021_v3 = vadd.f32 %v5071_v40, %v6673_v26  ;;  %v5079_v29 = vadd.f32 %v5078_v42, %v5023_v11  ;;  %v3789_v13 = vpop.f32.mrb[83].mxu1 }
 0x217   : > { %v4019_v6 = vadd.f32 %v5075_v21, %v6673_v26  ;;  %v5083_v51 = vadd.f32 %v6640_v16, %v3789_v13 }
 0x218   : > { %v4836_v60 = vpop.f32.mrb[112].mxu0  ;;  %vm4053_vm5 = vcmp.ge.f32.partialorder %v4021_v3, 0.0  ;;  %v4085_v61 = vmul.f32 0.01, %v4021_v3  ;;  %v4022_v20 = vadd.f32 %v5079_v29, %v6673_v26 }
 0x219   : > { %v4837_v56 = vpop.f32.mrb[113].mxu0  ;;  %vm4051_vm6 = vcmp.ge.f32.partialorder %v4019_v6, 0.0  ;;  %v4083_v42 = vmul.f32 0.01, %v4019_v6  ;;  %v4020_v0 = vadd.f32 %v5083_v51, %v6673_v26 }
 0x21a   : > { %v4838_v9 = vadd.f32 %v4837_v56, %v4836_v60  ;;  %v4839_v24 = vpop.f32.mrb[114].mxu0  ;;  %v4117_v16 = vsel %vm4053_vm5, %v4021_v3, %v4085_v61  ;;  %vm4054_vm7 = vcmp.ge.f32.partialorder %v4022_v20, 0.0  ;;  %v4086_v18 = vmul.f32 0.01, %v4022_v20 }
 0x21b   : > { %v4840_v57 = vpop.f32.mrb[115].mxu0  ;;  %4149 = vst [vmem:[%s6688_s6 + $0x10] sm:$0xff] %v4117_v16  ;;  %v4115_v15 = vsel %vm4051_vm6, %v4019_v6, %v4083_v42  ;;  %vm4052_vm10 = vcmp.ge.f32.partialorder %v4020_v0, 0.0  ;;  %v4084_v14 = vmul.f32 0.01, %v4020_v0  ;;  %v5026_v7 = vpop.f32.mrb[84].mxu1 }
 0x21c   : > { %v4841_v35 = vadd.f32 %v4840_v57, %v4839_v24  ;;  %4147 = vst [vmem:[%s6688_s6] sm:$0xff] %v4115_v15  ;;  %v4118_v19 = vsel %vm4054_vm7, %v4022_v20, %v4086_v18  ;;  %v5087_v59 = vadd.f32 %v6651_v54, %v5026_v7  ;;  %v3802_v44 = vpop.f32.mrb[85].mxu1  ;;  %v6696_v5 = vadd.f32 %v6532_v2, %v4838_v9 }
 0x21d   : > { %4150 = vst [vmem:[%s6688_s6 + $0x18] sm:$0xff] %v4118_v19  ;;  %v4116_v31 = vsel %vm4052_vm10, %v4020_v0, %v4084_v14  ;;  %v5091_v32 = vadd.f32 %v6645_v17, %v3802_v44  ;;  %v5027_v41 = vpop.f32.mrb[86].mxu1  ;;  %v6878_v0 = vld [vmem:[#allocation9_spill] sm:$0xff] }
 0x21e   : > { %v6701_v38 = vadd.f32 %v6534_v25, %v4841_v35  ;;  %4148 = vst [vmem:[%s6688_s6 + $0x8] sm:$0xff] %v4116_v31  ;;  %v4025_v34 = vadd.f32 %v5087_v59, %v6673_v26  ;;  %v5095_v52 = vadd.f32 %v6654_v50, %v5027_v41  ;;  %v3805_v12 = vpop.f32.mrb[87].mxu1 }
 0x21f   : > { %v4023_v54 = vadd.f32 %v5091_v32, %v6673_v26  ;;  %v5099_v2 = vadd.f32 %v6648_v1, %v3805_v12 }
 0x220   : > { %v4842_v39 = vpop.f32.mrb[116].mxu0  ;;  %vm4057_vm2 = vcmp.ge.f32.partialorder %v4025_v34, 0.0  ;;  %v4089_v23 = vmul.f32 0.01, %v4025_v34  ;;  %v4026_v17 = vadd.f32 %v5095_v52, %v6673_v26 }
 0x221   : > { %v4843_v40 = vpop.f32.mrb[117].mxu0  ;;  %vm4055_vm3 = vcmp.ge.f32.partialorder %v4023_v54, 0.0  ;;  %v4087_v8 = vmul.f32 0.01, %v4023_v54  ;;  %v4024_v11 = vadd.f32 %v5099_v2, %v6673_v26 }
 0x222   : > { %v4844_v25 = vadd.f32 %v4843_v40, %v4842_v39  ;;  %v4845_v21 = vpop.f32.mrb[118].mxu0  ;;  %v4121_v50 = vsel %vm4057_vm2, %v4025_v34, %v4089_v23  ;;  %vm4058_vm4 = vcmp.ge.f32.partialorder %v4026_v17, 0.0  ;;  %v4090_v3 = vmul.f32 0.01, %v4026_v17 }
 0x223   : > { %v4846_v29 = vpop.f32.mrb[119].mxu0  ;;  %4153 = vst [vmem:[%s6688_s6 + $0x30] sm:$0xff] %v4121_v50  ;;  %v4119_v1 = vsel %vm4055_vm3, %v4023_v54, %v4087_v8  ;;  %vm4056_vm0 = vcmp.ge.f32.partialorder %v4024_v11, 0.0  ;;  %v4088_v60 = vmul.f32 0.01, %v4024_v11  ;;  %v5030_v6 = vpop.f32.mrb[88].mxu1 }
 0x224   : > { %v4847_v13 = vadd.f32 %v4846_v29, %v4845_v21  ;;  %4151 = vst [vmem:[%s6688_s6 + $0x20] sm:$0xff] %v4119_v1  ;;  %v4122_v51 = vsel %vm4058_vm4, %v4026_v17, %v4090_v3  ;;  %v5103_v61 = vadd.f32 %v6661_v63, %v5030_v6  ;;  %v3818_v56 = vpop.f32.mrb[89].mxu1  ;;  %v6714_v20 = vadd.f32 %v6538_v47, %v4844_v25  ;;  %v6879_v8 = vld [vmem:[#allocation8_spill] sm:$0xff] }
 0x225   : > { %4154 = vst [vmem:[%s6688_s6 + $0x38] sm:$0xff] %v4122_v51  ;;  %v4120_v9 = vsel %vm4056_vm0, %v4024_v11, %v4088_v60  ;;  %v5107_v42 = vadd.f32 %v6656_v48, %v3818_v56  ;;  %v5031_v24 = vpop.f32.mrb[90].mxu1 }
 0x226   : > { %v6719_v16 = vadd.f32 %v6878_v0, %v4847_v13  ;;  %4152 = vst [vmem:[%s6688_s6 + $0x28] sm:$0xff] %v4120_v9  ;;  %v4029_v18 = vadd.f32 %v5103_v61, %v6673_v26  ;;  %v5111_v57 = vadd.f32 %v6664_v45, %v5031_v24  ;;  %v3821_v15 = vpop.f32.mrb[91].mxu1 }
 0x227   : > { %v4027_v63 = vadd.f32 %v5107_v42, %v6673_v26  ;;  %v5115_v47 = vadd.f32 %v6658_v36, %v3821_v15 }
 0x228   : > { %v4848_v35 = vpop.f32.mrb[120].mxu0  ;;  %vm4061_vm8 = vcmp.ge.f32.partialorder %v4029_v18, 0.0  ;;  %v4093_v14 = vmul.f32 0.01, %v4029_v18  ;;  %v4030_v48 = vadd.f32 %v5111_v57, %v6673_v26 }
 0x229   : > { %v4849_v7 = vpop.f32.mrb[121].mxu0  ;;  %vm4059_vm9 = vcmp.ge.f32.partialorder %v4027_v63, 0.0  ;;  %v4091_v59 = vmul.f32 0.01, %v4027_v63  ;;  %v4028_v31 = vadd.f32 %v5115_v47, %v6673_v26 }
 0x22a   : > { %v4850_v19 = vadd.f32 %v4849_v7, %v4848_v35  ;;  %v4851_v44 = vpop.f32.mrb[122].mxu0  ;;  %v4125_v45 = vsel %vm4061_vm8, %v4029_v18, %v4093_v14  ;;  %vm4062_vm11 = vcmp.ge.f32.partialorder %v4030_v48, 0.0  ;;  %v4094_v32 = vmul.f32 0.01, %v4030_v48 }
 0x22b   : > { %v4852_v41 = vpop.f32.mrb[123].mxu0  ;;  %4157 = vst [vmem:[%s6688_s6 + $0x50] sm:$0xff] %v4125_v45  ;;  %v4123_v36 = vsel %vm4059_vm9, %v4027_v63, %v4091_v59  ;;  %vm4060_vm12 = vcmp.ge.f32.partialorder %v4028_v31, 0.0  ;;  %v4092_v52 = vmul.f32 0.01, %v4028_v31  ;;  %v5034_v12 = vpop.f32.mrb[92].mxu1 }
 0x22c   : > { %v4853_v34 = vadd.f32 %v4852_v41, %v4851_v44  ;;  %4155 = vst [vmem:[%s6688_s6 + $0x40] sm:$0xff] %v4123_v36  ;;  %v4126_v39 = vsel %vm4062_vm11, %v4030_v48, %v4094_v32  ;;  %v5119_v54 = vadd.f32 %v6676_v27, %v5034_v12  ;;  %v3834_v2 = vpop.f32.mrb[93].mxu1  ;;  %v6732_v23 = vadd.f32 %v6546_v37, %v4850_v19 }
 0x22d   : > { %4158 = vst [vmem:[%s6688_s6 + $0x58] sm:$0xff] %v4126_v39  ;;  %v4124_v40 = vsel %vm4060_vm12, %v4028_v31, %v4092_v52  ;;  %v5123_v17 = vadd.f32 %v6666_v43, %v3834_v2  ;;  %v5035_v25 = vpop.f32.mrb[94].mxu1 }
 0x22e   : > { %v6737_v21 = vadd.f32 %v6879_v8, %v4853_v34  ;;  %4156 = vst [vmem:[%s6688_s6 + $0x48] sm:$0xff] %v4124_v40  ;;  %v4033_v11 = vadd.f32 %v5119_v54, %v6673_v26  ;;  %v5127_v50 = vadd.f32 %v6680_v22, %v5035_v25  ;;  %v3837_v3 = vpop.f32.mrb[95].mxu1 }
 0x22f   : > { %v4031_v27 = vadd.f32 %v5123_v17, %v6673_v26  ;;  %v5131_v37 = vadd.f32 %v6668_v58, %v3837_v3 }
 0x230   : > { %v4854_v29 = vpop.f32.mrb[124].mxu0  ;;  %vm4065_vm13 = vcmp.ge.f32.partialorder %v4033_v11, 0.0  ;;  %v4097_v1 = vmul.f32 0.01, %v4033_v11  ;;  %v4034_v43 = vadd.f32 %v5127_v50, %v6673_v26 }
 0x231   : > { %v4855_v13 = vpop.f32.mrb[125].mxu0  ;;  %vm4063_vm14 = vcmp.ge.f32.partialorder %v4031_v27, 0.0  ;;  %v4095_v6 = vmul.f32 0.01, %v4031_v27  ;;  %v4032_v61 = vadd.f32 %v5131_v37, %v6673_v26 }
 0x232   : > { %v4856_v60 = vadd.f32 %v4855_v13, %v4854_v29  ;;  %v4857_v51 = vpop.f32.mrb[126].mxu0  ;;  %v4129_v22 = vsel %vm4065_vm13, %v4033_v11, %v4097_v1  ;;  %vm4066_vm15 = vcmp.ge.f32.partialorder %v4034_v43, 0.0  ;;  %v4098_v56 = vmul.f32 0.01, %v4034_v43 }
 0x233   : > { %v4858_v9 = vpop.f32.mrb[127].mxu0  ;;  %4161 = vst [vmem:[%s6688_s6 + $0x70] sm:$0xff] %v4129_v22  ;;  %v4127_v58 = vsel %vm4063_vm14, %v4031_v27, %v4095_v6  ;;  %vm4064_vm1 = vcmp.ge.f32.partialorder %v4032_v61, 0.0  ;;  %v4096_v24 = vmul.f32 0.01, %v4032_v61  ;;  %v5038_v0 = vpop.f32.mrb[0].mxu1 }
 0x234   : > { %v4859_v42 = vadd.f32 %v4858_v9, %v4857_v51  ;;  %4159 = vst [vmem:[%s6688_s6 + $0x60] sm:$0xff] %v4127_v58  ;;  %v4130_v18 = vsel %vm4066_vm15, %v4034_v43, %v4098_v56  ;;  %v5134_v57 = vadd.f32 %v6714_v20, %v5038_v0  ;;  %v3850_v15 = vpop.f32.mrb[1].mxu1  ;;  %v5145_v35 = vadd.f32 %v6554_v53, %v4856_v60 }
 0x235   : > { %4162 = vst [vmem:[%s6688_s6 + $0x78] sm:$0xff] %v4130_v18  ;;  %v4128_v63 = vsel %vm4064_vm1, %v4032_v61, %v4096_v24  ;;  %v5137_v47 = vadd.f32 %v6696_v5, %v3850_v15  ;;  %v5039_v14 = vpop.f32.mrb[2].mxu1 }
 0x236   : > { %v5151_v7 = vadd.f32 %v6558_v28, %v4859_v42  ;;  %4160 = vst [vmem:[%s6688_s6 + $0x68] sm:$0xff] %v4128_v63  ;;  %v4037_v48 = vadd.f32 %v5134_v57, %v6673_v26  ;;  %v5140_v19 = vadd.f32 %v6719_v16, %v5039_v14  ;;  %v3853_v59 = vpop.f32.mrb[3].mxu1 }
 0x237   : > { %v4035_v20 = vadd.f32 %v5137_v47, %v6673_v26  ;;  %v5143_v31 = vadd.f32 %v6701_v38, %v3853_v59 }
 0x238   : > { %v4860_v44 = vpop.f32.mrb[128].mxu0  ;;  %vm4069_vm5 = vcmp.ge.f32.partialorder %v4037_v48, 0.0  ;;  %v4101_v53 = vmul.f32 0.01, %v4037_v48  ;;  %v4038_v5 = vadd.f32 %v5140_v19, %v6673_v26 }
 0x239   : > { %v4861_v45 = vpop.f32.mrb[129].mxu0  ;;  %vm4067_vm6 = vcmp.ge.f32.partialorder %v4035_v20, 0.0  ;;  %v4099_v28 = vmul.f32 0.01, %v4035_v20  ;;  %v4036_v36 = vadd.f32 %v5143_v31, %v6673_v26 }
 0x23a   : > { %v4862_v32 = vadd.f32 %v4861_v45, %v4860_v44  ;;  %v4863_v41 = vpop.f32.mrb[130].mxu0  ;;  %v4133_v16 = vsel %vm4069_vm5, %v4037_v48, %v4101_v53  ;;  %vm4070_vm7 = vcmp.ge.f32.partialorder %v4038_v5, 0.0  ;;  %v4102_v34 = vmul.f32 0.01, %v4038_v5 }
 0x23b   : > { %v4864_v52 = vpop.f32.mrb[131].mxu0  ;;  %4165 = vst [vmem:[%s6688_s6 + $0x90] sm:$0xff] %v4133_v16  ;;  %v4131_v38 = vsel %vm4067_vm6, %v4035_v20, %v4099_v28  ;;  %vm4068_vm10 = vcmp.ge.f32.partialorder %v4036_v36, 0.0  ;;  %v4100_v39 = vmul.f32 0.01, %v4036_v36  ;;  %v5042_v54 = vpop.f32.mrb[4].mxu1 }
 0x23c   : > { %v4865_v12 = vadd.f32 %v4864_v52, %v4863_v41  ;;  %4163 = vst [vmem:[%s6688_s6 + $0x80] sm:$0xff] %v4131_v38  ;;  %v4134_v2 = vsel %vm4070_vm7, %v4038_v5, %v4102_v34  ;;  %v5146_v40 = vadd.f32 %v5145_v35, %v5042_v54  ;;  %v3866_v17 = vpop.f32.mrb[5].mxu1  ;;  %v5160_v25 = vadd.f32 %v6562_v46, %v4862_v32 }
 0x23d   : > { %4166 = vst [vmem:[%s6688_s6 + $0x98] sm:$0xff] %v4134_v2  ;;  %v4132_v8 = vsel %vm4068_vm10, %v4036_v36, %v4100_v39  ;;  %v5149_v11 = vadd.f32 %v6732_v23, %v3866_v17  ;;  %v5043_v50 = vpop.f32.mrb[6].mxu1 }
 0x23e   : > { %v5166_v3 = vadd.f32 %v6572_v49, %v4865_v12  ;;  %4164 = vst [vmem:[%s6688_s6 + $0x88] sm:$0xff] %v4132_v8  ;;  %v4041_v29 = vadd.f32 %v5146_v40, %v6673_v26  ;;  %v5152_v27 = vadd.f32 %v5151_v7, %v5043_v50  ;;  %v3869_v37 = vpop.f32.mrb[7].mxu1 }
 0x23f   : > { %v4039_v13 = vadd.f32 %v5149_v11, %v6673_v26  ;;  %v5155_v43 = vadd.f32 %v6737_v21, %v3869_v37 }
 0x240   : > { %v4866_v1 = vpop.f32.mrb[132].mxu0  ;;  %vm4073_vm2 = vcmp.ge.f32.partialorder %v4041_v29, 0.0  ;;  %v4105_v46 = vmul.f32 0.01, %v4041_v29  ;;  %v4042_v6 = vadd.f32 %v5152_v27, %v6673_v26 }
 0x241   : > { %v4867_v60 = vpop.f32.mrb[133].mxu0  ;;  %vm4071_vm3 = vcmp.ge.f32.partialorder %v4039_v13, 0.0  ;;  %v4103_v49 = vmul.f32 0.01, %v4039_v13  ;;  %v4040_v61 = vadd.f32 %v5155_v43, %v6673_v26 }
 0x242   : > { %v4868_v23 = vadd.f32 %v4867_v60, %v4866_v1  ;;  %v4869_v51 = vpop.f32.mrb[134].mxu0  ;;  %v4137_v22 = vsel %vm4073_vm2, %v4041_v29, %v4105_v46  ;;  %vm4074_vm4 = vcmp.ge.f32.partialorder %v4042_v6, 0.0  ;;  %v4106_v56 = vmul.f32 0.01, %v4042_v6 }
 0x243   : > { %v4870_v9 = vpop.f32.mrb[135].mxu0  ;;  %4169 = vst [vmem:[%s6688_s6 + $0xb0] sm:$0xff] %v4137_v22  ;;  %v4135_v21 = vsel %vm4071_vm3, %v4039_v13, %v4103_v49  ;;  %vm4072_vm0 = vcmp.ge.f32.partialorder %v4040_v61, 0.0  ;;  %v4104_v42 = vmul.f32 0.01, %v4040_v61  ;;  %v5046_v24 = vpop.f32.mrb[8].mxu1 }
 0x244   : > { %v4871_v58 = vadd.f32 %v4870_v9, %v4869_v51  ;;  %4167 = vst [vmem:[%s6688_s6 + $0xa0] sm:$0xff] %v4135_v21  ;;  %v4138_v0 = vsel %vm4074_vm4, %v4042_v6, %v4106_v56  ;;  %v5157_v18 = vadd.f32 %v6583_v30, %v4868_v23  ;;  %v3882_v57 = vpop.f32.mrb[9].mxu1 }
 0x245   : > { %4170 = vst [vmem:[%s6688_s6 + $0xb8] sm:$0xff] %v4138_v0  ;;  %v4136_v15 = vsel %vm4072_vm0, %v4040_v61, %v4104_v42  ;;  %v5161_v35 = vadd.f32 %v5160_v25, %v3882_v57  ;;  %v5047_v63 = vpop.f32.mrb[10].mxu1 }
 0x246   : > { %v5163_v47 = vadd.f32 %v6594_v4, %v4871_v58  ;;  %4168 = vst [vmem:[%s6688_s6 + $0xa8] sm:$0xff] %v4136_v15  ;;  %v5158_v14 = vadd.f32 %v5157_v18, %v5046_v24  ;;  %v3885_v7 = vpop.f32.mrb[11].mxu1 }
 0x247   : > { %v4043_v19 = vadd.f32 %v5161_v35, %v6673_v26  ;;  %v5167_v44 = vadd.f32 %v5166_v3, %v3885_v7 }
 0x248   : > { %v4872_v48 = vpop.f32.mrb[136].mxu0  ;;  %v5164_v59 = vadd.f32 %v5163_v47, %v5047_v63  ;;  %v4045_v20 = vadd.f32 %v5158_v14, %v6673_v26 }
 0x249   : > { %v4873_v31 = vpop.f32.mrb[137].mxu0  ;;  %vm4075_vm8 = vcmp.ge.f32.partialorder %v4043_v19, 0.0  ;;  %v4107_v53 = vmul.f32 0.01, %v4043_v19  ;;  %v4044_v28 = vadd.f32 %v5167_v44, %v6673_v26 }
 0x24a   : > { %v4874_v30 = vadd.f32 %v4873_v31, %v4872_v48  ;;  %v4875_v45 = vpop.f32.mrb[138].mxu0  ;;  %v4046_v5 = vadd.f32 %v5164_v59, %v6673_v26  ;;  %vm4077_vm9 = vcmp.ge.f32.partialorder %v4045_v20, 0.0  ;;  %v4109_v4 = vmul.f32 0.01, %v4045_v20 }
 0x24b   : > { %v4876_v32 = vpop.f32.mrb[139].mxu0  ;;  %v4139_v41 = vsel %vm4075_vm8, %v4043_v19, %v4107_v53  ;;  %v5050_v34 = vpop.f32.mrb[12].mxu1  ;;  %vm4076_vm12 = vcmp.ge.f32.partialorder %v4044_v28, 0.0  ;;  %v4108_v38 = vmul.f32 0.01, %v4044_v28 }
 0x24c   : > { %vm4078_vm11 = vcmp.ge.f32.partialorder %v4046_v5, 0.0  ;;  %v4110_v36 = vmul.f32 0.01, %v4046_v5  ;;  %v4877_v16 = vadd.f32 %v4876_v32, %v4875_v45  ;;  %v4141_v52 = vsel %vm4077_vm9, %v4045_v20, %v4109_v4  ;;  %4171 = vst [vmem:[%s6688_s6 + $0xc0] sm:$0xff] %v4139_v41  ;;  %v3898_v12 = vpop.f32.mrb[13].mxu1 }
 0x24d   : > { %v5172_v39 = vadd.f32 %v6603_v62, %v4874_v30  ;;  %4173 = vst [vmem:[%s6688_s6 + $0xd0] sm:$0xff] %v4141_v52  ;;  %v5051_v2 = vpop.f32.mrb[14].mxu1  ;;  %v4140_v17 = vsel %vm4076_vm12, %v4044_v28, %v4108_v38 }
 0x24e   : > { %v4142_v54 = vsel %vm4078_vm11, %v4046_v5, %v4110_v36  ;;  %v5178_v40 = vadd.f32 %v6608_v10, %v4877_v16  ;;  %v3901_v8 = vpop.f32.mrb[15].mxu1  ;;  %4172 = vst [vmem:[%s6688_s6 + $0xc8] sm:$0xff] %v4140_v17 }
 0x24f   : > { %4174 = vst [vmem:[%s6688_s6 + $0xd8] sm:$0xff] %v4142_v54  ;;  %v5173_v25 = vadd.f32 %v5172_v39, %v3898_v12 }
 0x250   : > { %v4878_v11 = vpop.f32.mrb[140].mxu0  ;;  %v5179_v50 = vadd.f32 %v5178_v40, %v3901_v8 }
 0x251   : > { %v4879_v3 = vpop.f32.mrb[141].mxu0  ;;  %v4047_v29 = vadd.f32 %v5173_v25, %v6673_v26 }
 0x252   : > { %v4880_v27 = vadd.f32 %v4879_v3, %v4878_v11  ;;  %v4881_v37 = vpop.f32.mrb[142].mxu0  ;;  %v4048_v62 = vadd.f32 %v5179_v50, %v6673_v26 }
 0x253   : > { %vm4079_vm13 = vcmp.ge.f32.partialorder %v4047_v29, 0.0  ;;  %v4111_v1 = vmul.f32 0.01, %v4047_v29  ;;  %v4882_v13 = vpop.f32.mrb[143].mxu0 }
 0x254   : > { %v5169_v10 = vadd.f32 %v6621_v55, %v4880_v27  ;;  %v4883_v43 = vadd.f32 %v4882_v13, %v4881_v37  ;;  %vm4080_vm14 = vcmp.ge.f32.partialorder %v4048_v62, 0.0  ;;  %v4112_v46 = vmul.f32 0.01, %v4048_v62 }
 0x255   : > { %v4143_v60 = vsel %vm4079_vm13, %v4047_v29, %v4111_v1 }
 0x256   : > { %v5170_v6 = vadd.f32 %v5169_v10, %v5050_v34  ;;  %4175 = vst [vmem:[%s6688_s6 + $0xe0] sm:$0xff] %v4143_v60  ;;  %v5175_v23 = vadd.f32 %v6626_v33, %v4883_v43  ;;  %v4144_v49 = vsel %vm4080_vm14, %v4048_v62, %v4112_v46 }
 0x257   : > { %4176 = vst [vmem:[%s6688_s6 + $0xe8] sm:$0xff] %v4144_v49 }
 0x258   : > { %v4049_v51 = vadd.f32 %v5170_v6, %v6673_v26  ;;  %v5176_v61 = vadd.f32 %v5175_v23, %v5051_v2 }
 0x25a   : > { %vm4081_vm15 = vcmp.ge.f32.partialorder %v4049_v51, 0.0  ;;  %v4113_v22 = vmul.f32 0.01, %v4049_v51  ;;  %v4050_v56 = vadd.f32 %v5176_v61, %v6673_v26 }
 0x25c   : > { %v4145_v55 = vsel %vm4081_vm15, %v4049_v51, %v4113_v22  ;;  %vm4082_vm1 = vcmp.ge.f32.partialorder %v4050_v56, 0.0  ;;  %v4114_v9 = vmul.f32 0.01, %v4050_v56 }
 0x25d   : > { %4177 = vst [vmem:[%s6688_s6 + $0xf0] sm:$0xff] %v4145_v55 }
 0x25e   : > { %v4146_v21 = vsel %vm4082_vm1, %v4050_v56, %v4114_v9 }
 0x25f   : > { %4178 = vst [vmem:[%s6688_s6 + $0xf8] sm:$0xff] %v4146_v21 }
 0x260 PF: > { %s13_s14 = sadd.s32 1, %s5381_s14   ;;  %s6880_s12 = smov %s5377_s13 }
 0x261   : > { %p10_p5 = scmp.ge.s32.totalorder %s13_s14, 4   ;;  %s6881_s13 = smov %s6883_s15 }
 0x263   :  { %12 = sbr.rel (!%p10_p5) target bundleno = 2 (0x2), region = 75 }

</bundles_post_ra>
